<compile_context>
chip_gen: v5e
topology: v5e:2x2
jax: 0.10.0
libtpu: 0.0.40
codegen_flags: <defaults>
</compile_context>

<pallas_src>
import math
from functools import partial

import jax
import jax.numpy as jnp
from jax.experimental import pallas as pl
from jax.experimental.pallas import tpu as pltpu

EPS = 1e-5          # nn.LayerNorm default eps
LANE = 128          # TPU lane width


def _round_up(n, m=LANE):
    return ((n + m - 1) // m) * m


def _gelu_exact(x):
    # nn.GELU() default (erf-based, not tanh approximation)
    return 0.5 * x * (1.0 + jax.lax.erf(x * (1.0 / math.sqrt(2.0))))


def _pick_batch_block(B, T, target_m=512, max_m=1024):
    """Largest divisor Bb of B with Bb*T <= max_m (stop once >= target_m)."""
    best = 1
    for bb in range(1, B + 1):
        if B % bb:
            continue
        if bb * T > max_m:
            break
        best = bb
        if bb * T >= target_m:
            break
    return best


def _vmem_capacity_bytes():
    try:
        return int(pltpu.get_tpu_info().vmem_capacity_bytes)
    except Exception:
        return 64 * 1024 * 1024      # conservative (v7x per-TC) fallback


def _decoder_kernel(x_ref, *refs, num_layers, K, pad, ln_dim, add_res, use_bf16):
    """Fused Decoder1d for one batch block (channels last, lane-padded).

    x_ref : (Bb, T, C_in_pad)
    refs  : w_0, b_0, ..., w_{L-1}, b_{L-1}, w_proj, b_proj, out_ref
              w_i    : (K, C_i_pad, D_pad)  per-tap conv weight (block-diag over groups)
              b_i    : (1, D_pad)
              w_proj : (D_pad, O_pad),  b_proj : (1, O_pad)
    out   : (Bb, T, O_store)   O_store == real input_dim (unpadded store)
    """
    out_ref = refs[-1]
    wb = refs[:-1]
    Bb, T, C0 = x_ref.shape
    M = Bb * T
    D_pad = wb[1].shape[-1]

    # Fold batch rows into the matmul M dimension.
    h = x_ref[...].astype(jnp.float32).reshape(M, C0)
    residual = h
    inv_d = 1.0 / float(ln_dim)

    for i in range(num_layers):
        C = h.shape[-1]
        w_ref = wb[2 * i]
        b = wb[2 * i + 1][...].astype(jnp.float32)

        # SamePad per batch row: zero slab on the time axis of the 3-D view.
        h3 = h.reshape(Bb, T, C)
        if pad > 0:
            zeros = jnp.zeros((Bb, pad, C), jnp.float32)
            xpad = jnp.concatenate([zeros, h3, zeros], axis=1)
        else:
            xpad = h3

        # Tap-wise conv: K dots accumulated in f32 (no K-times im2col buffer).
        acc = None
        for k in range(K):
            xk = xpad[:, k:k + T, :].reshape(M, C)
            lhs = xk.astype(jnp.bfloat16) if use_bf16 else xk
            d = jnp.dot(lhs, w_ref[k], preferred_element_type=jnp.float32)
            acc = d if acc is None else acc + d
        acc = acc + b

        # LayerNorm over the real channels.  Invariant: padded lanes of `acc` are
        # exactly zero (weight columns / bias lanes for padded outputs are zero),
        # so summing over all D_pad lanes and dividing by ln_dim is exact.  Junk in
        # padded lanes of the *activation* (from the uncentered padded lanes below)
        # is annihilated by the zero weight rows of the next matmul.
        mean = jnp.sum(acc, axis=-1, keepdims=True) * inv_d
        msq = jnp.sum(acc * acc, axis=-1, keepdims=True) * inv_d
        var = msq - mean * mean
        y = (acc - mean) * jax.lax.rsqrt(var + EPS)

        y = _gelu_exact(y)
        if add_res[i]:            # statically specialized residual add
            y = y + residual
        h = y
        residual = h

    w_p = wb[2 * num_layers]
    b_p = wb[2 * num_layers + 1][...].astype(jnp.float32)
    lhs = h.astype(jnp.bfloat16) if use_bf16 else h
    out2 = jnp.dot(lhs, w_p[...], preferred_element_type=jnp.float32) + b_p

    o_dim = out_ref.shape[-1]
    out3 = out2.reshape(Bb, T, out2.shape[-1])
    out_ref[...] = out3[:, :, :o_dim].astype(out_ref.dtype)


def conv_to_taps(conv_w, groups, c_in_pad, d_pad):
    """PyTorch grouped Conv1d weight (D, C_in/G, K) -> per-tap (K, C_in_pad, D_pad)."""
    D, in_g, K = conv_w.shape
    out_g = D // groups
    w = jnp.zeros((K, c_in_pad, d_pad), conv_w.dtype)
    for g in range(groups):
        blk = conv_w[g * out_g:(g + 1) * out_g]      # (out_g, in_g, K)
        blk = jnp.transpose(blk, (2, 1, 0))          # (K, in_g, out_g)
        w = w.at[:, g * in_g:(g + 1) * in_g,
                 g * out_g:(g + 1) * out_g].set(blk)
    return w


def init_params(key, input_dim, cfg):
    D = cfg["decoder_dim"]
    K = cfg["decoder_kernel"]
    G = cfg["decoder_groups"]
    D_pad = _round_up(D)
    O_pad = _round_up(input_dim)

    blocks, blocks_raw = [], []
    for i in range(cfg["decoder_layers"]):
        in_dim = input_dim if i == 0 else D
        c_pad = _round_up(in_dim)
        key, k1, k2 = jax.random.split(key, 3)
        fan_in = (in_dim // G) * K
        bound = 1.0 / math.sqrt(fan_in)
        conv_w = jax.random.uniform(k1, (D, in_dim // G, K), jnp.float32, -bound, bound)
        conv_b = jax.random.uniform(k2, (D,), jnp.float32, -bound, bound)
        blocks_raw.append((conv_w, conv_b))
        w = conv_to_taps(conv_w, G, c_pad, D_pad)
        b = jnp.zeros((1, D_pad), jnp.float32).at[0, :D].set(conv_b)
        blocks.append((w, b))

    # projection_layers == 1 -> self.proj is a single Linear(decoder_dim, input_dim)
    key, k1, k2 = jax.random.split(key, 3)
    bound = 1.0 / math.sqrt(D)
    lin_w = jax.random.uniform(k1, (input_dim, D), jnp.float32, -bound, bound)
    lin_b = jax.random.uniform(k2, (input_dim,), jnp.float32, -bound, bound)
    w_p = jnp.zeros((D_pad, O_pad), jnp.float32).at[:D, :input_dim].set(lin_w.T)
    b_p = jnp.zeros((1, O_pad), jnp.float32).at[0, :input_dim].set(lin_b)

    params = {"blocks": blocks, "proj": (w_p, b_p)}
    raw = {"blocks": blocks_raw, "proj": (lin_w, lin_b)}
    return params, raw


def decoder1d_forward(x, params, cfg, use_bf16_matmul=False):
    """x: (B, T, input_dim) — same layout as the PyTorch forward's input."""
    B, T, C_in = x.shape
    K = cfg["decoder_kernel"]
    D = cfg["decoder_dim"]
    L = cfg["decoder_layers"]
    assert K % 2 == 1, "SamePad is a no-op only for odd kernels"
    assert cfg.get("projection_layers", 1) == 1
    pad = K // 2

    C_in_pad = _round_up(C_in)
    D_pad = _round_up(D)

    # One-time lane padding of the input so in-kernel matmuls / VPU ops are lane-dense.
    x_in = x if C_in_pad == C_in else jnp.pad(x, ((0, 0), (0, 0), (0, C_in_pad - C_in)))

    # add_residual semantics: skip when residual disabled or channel counts differ
    # (layer 0 whenever input_dim != decoder_dim).
    add_res = tuple(bool(cfg["decoder_residual"]) and (i > 0 or C_in == D)
                    for i in range(L))

    # Host pre-cast weights when using the bf16 MXU path (halves weight DMA + VMEM,
    # removes in-kernel per-step casts).  Biases stay f32 (added to f32 accumulator).
    def maybe_bf16(a):
        return a.astype(jnp.bfloat16) if use_bf16_matmul else a

    flat = []
    for (w_l, b_l) in params["blocks"]:
        flat += [maybe_bf16(w_l), b_l]
    w_p, b_p = params["proj"]
    flat += [maybe_bf16(w_p), b_p]

    # Batch blocking: fold Bb rows into the matmul M dimension (Bb*T ~ 512).
    Bb = _pick_batch_block(B, T)
    assert B % Bb == 0

    # Generation-aware VMEM limit from the real footprint.
    weight_bytes = sum(int(a.size) * a.dtype.itemsize for a in flat)
    act_bytes = Bb * T * max(C_in_pad, D_pad) * 4
    out_bytes = Bb * T * C_in * 4
    est = 2 * weight_bytes + 12 * act_bytes + 2 * out_bytes + (4 << 20)
    cap = _vmem_capacity_bytes()
    vmem_limit = int(min(max(est, 32 << 20), int(0.75 * cap)))

    kernel = partial(_decoder_kernel, num_layers=L, K=K, pad=pad, ln_dim=D,
                     add_res=add_res, use_bf16=use_bf16_matmul)

    def build_call(use_buffered):
        def const_spec(shape):
            idx = lambda b, n=len(shape): (0,) * n
            if use_buffered and hasattr(pl, "Buffered"):
                # Constant block index -> a single buffer is enough; halves weight VMEM.
                return pl.BlockSpec(shape, idx, pipeline_mode=pl.Buffered(1))
            return pl.BlockSpec(shape, idx)

        in_specs = [pl.BlockSpec((Bb, T, C_in_pad), lambda b: (b, 0, 0))]
        in_specs += [const_spec(a.shape) for a in flat]
        return pl.pallas_call(
            kernel,
            grid=(B // Bb,),
            out_shape=jax.ShapeDtypeStruct((B, T, C_in), x.dtype),
            in_specs=in_specs,
            # Unpadded output written directly from the kernel (no extra slice pass).
            out_specs=pl.BlockSpec((Bb, T, C_in), lambda b: (b, 0, 0)),
            compiler_params=pltpu.CompilerParams(
                dimension_semantics=("parallel",),   # shards grid across TCs on v7x
                vmem_limit_bytes=vmem_limit),
        )

    try:
        out = build_call(True)(x_in, *flat)
    except Exception:
        # pipeline_mode=pl.Buffered(1) unsupported on this JAX/Mosaic build -> default.
        out = build_call(False)(x_in, *flat)
    return out


def ref_forward(x, raw, cfg):
    """Pure-JAX reference mirroring the PyTorch Decoder1d forward (channels-last)."""
    K = cfg["decoder_kernel"]
    G = cfg["decoder_groups"]
    pad = K // 2
    h = x.astype(jnp.float32)
    residual = h
    for (conv_w, conv_b) in raw["blocks"]:
        y = jax.lax.conv_general_dilated(
            h, jnp.transpose(conv_w, (2, 1, 0)), window_strides=(1,),
            padding=[(pad, pad)], dimension_numbers=("NWC", "WIO", "NWC"),
            feature_group_count=G, precision=jax.lax.Precision.HIGHEST)
        y = y + conv_b[None, None, :]
        mean = jnp.mean(y, axis=-1, keepdims=True)
        var = jnp.mean((y - mean) ** 2, axis=-1, keepdims=True)
        y = (y - mean) * jax.lax.rsqrt(var + EPS)
        y = jax.nn.gelu(y, approximate=False)
        if cfg["decoder_residual"] and residual.shape[-1] == y.shape[-1]:
            y = y + residual
        h = y
        residual = h
    lin_w, lin_b = raw["proj"]
    return jnp.dot(h, lin_w.T, precision=jax.lax.Precision.HIGHEST) + lin_b[None, None, :]


if __name__ == "__main__":
    cfg = dict(
        decoder_dim=32,
        decoder_kernel=5,
        decoder_groups=4,
        decoder_layers=2,
        decoder_residual=True,
        projection_layers=1,
        projection_ratio=2.0,
    )
    B, T, input_dim = 2, 16, 16

    key = jax.random.PRNGKey(0)
    kx, kp = jax.random.split(key)
    x = jax.random.normal(kx, (B, T, input_dim), jnp.float32)
    params, raw = init_params(kp, input_dim, cfg)

    out = decoder1d_forward(x, params, cfg)
    jax.block_until_ready(out)
    assert out.shape == (B, T, input_dim), out.shape
    assert bool(jnp.all(jnp.isfinite(out)))

    ref = ref_forward(x, raw, cfg)
    err = float(jnp.max(jnp.abs(out - ref)))
    assert err < 1e-3, f"mismatch vs pure-JAX reference: max abs err = {err}"
    print("KERNEL_OK")
</pallas_src>

<mosaic_0001>
module attributes {stable_mosaic.version = 11 : i64} {
  func.func @_decoder_kernel(%arg0: i32, %arg1: memref<2x16x128xf32, #tpu.memory_space<vmem>>, %arg2: memref<5x128x128xf32, #tpu.memory_space<vmem>>, %arg3: memref<1x128xf32, #tpu.memory_space<vmem>>, %arg4: memref<5x128x128xf32, #tpu.memory_space<vmem>>, %arg5: memref<1x128xf32, #tpu.memory_space<vmem>>, %arg6: memref<128x128xf32, #tpu.memory_space<vmem>>, %arg7: memref<1x128xf32, #tpu.memory_space<vmem>>, %arg8: memref<2x16x16xf32, #tpu.memory_space<vmem>>) attributes {dimension_semantics = [#tpu.dimension_semantics<parallel>], iteration_bounds = array<i64: 1>, scalar_prefetch = 0 : i64, scratch_operands = 0 : i64, tpu.core_type = #tpu.core_type<tc>, window_params = [{transform_indices = @transform_0, window_bounds = array<i64: 2, 16, 128>}, {pipeline_mode = #tpu.pipeline_mode<synchronous>, transform_indices = @transform_1, window_bounds = array<i64: 5, 128, 128>}, {pipeline_mode = #tpu.pipeline_mode<synchronous>, transform_indices = @transform_2, window_bounds = array<i64: 1, 128>}, {pipeline_mode = #tpu.pipeline_mode<synchronous>, transform_indices = @transform_3, window_bounds = array<i64: 5, 128, 128>}, {pipeline_mode = #tpu.pipeline_mode<synchronous>, transform_indices = @transform_4, window_bounds = array<i64: 1, 128>}, {pipeline_mode = #tpu.pipeline_mode<synchronous>, transform_indices = @transform_5, window_bounds = array<i64: 128, 128>}, {pipeline_mode = #tpu.pipeline_mode<synchronous>, transform_indices = @transform_6, window_bounds = array<i64: 1, 128>}, {transform_indices = @transform_7, window_bounds = array<i64: 2, 16, 16>}]} {
    %c0 = arith.constant 0 : index
    %c0_0 = arith.constant 0 : index
    %c0_1 = arith.constant 0 : index
    %0 = vector.load %arg1[%c0, %c0_0, %c0_1] : memref<2x16x128xf32, #tpu.memory_space<vmem>>, vector<2x16x128xf32>
    %1 = vector.shape_cast %0 : vector<2x16x128xf32> to vector<32x128xf32>
    %c0_2 = arith.constant 0 : index
    %c0_3 = arith.constant 0 : index
    %2 = vector.load %arg3[%c0_2, %c0_3] : memref<1x128xf32, #tpu.memory_space<vmem>>, vector<1x128xf32>
    %3 = vector.shape_cast %1 : vector<32x128xf32> to vector<2x16x128xf32>
    %cst = arith.constant 0.000000e+00 : f32
    %4 = vector.broadcast %cst : f32 to vector<2x2x128xf32>
    %5 = tpu.concatenate %4, %3, %4 in 1 : vector<2x2x128xf32>, vector<2x16x128xf32>, vector<2x2x128xf32> -> vector<2x20x128xf32>
    %6 = vector.extract_strided_slice %5 {offsets = [0, 0, 0], sizes = [2, 16, 128], strides = [1, 1, 1]} : vector<2x20x128xf32> to vector<2x16x128xf32>
    %7 = vector.shape_cast %6 : vector<2x16x128xf32> to vector<32x128xf32>
    %c0_4 = arith.constant 0 : index
    %c0_5 = arith.constant 0 : index
    %c0_6 = arith.constant 0 : index
    %8 = vector.load %arg2[%c0_4, %c0_5, %c0_6] : memref<5x128x128xf32, #tpu.memory_space<vmem>>, vector<1x128x128xf32>
    %9 = vector.shape_cast %8 : vector<1x128x128xf32> to vector<128x128xf32>
    %cst_7 = arith.constant dense<0.000000e+00> : vector<32x128xf32>
    %10 = tpu.matmul %7, %9, %cst_7 {dimension_numbers = #tpu.dot_dimension_numbers<[1], [0], [0], [1], [0, 0, 1, 1], [], []>} : vector<32x128xf32>, vector<128x128xf32>, vector<32x128xf32> -> vector<32x128xf32>
    %11 = vector.extract_strided_slice %5 {offsets = [0, 1, 0], sizes = [2, 16, 128], strides = [1, 1, 1]} : vector<2x20x128xf32> to vector<2x16x128xf32>
    %12 = vector.shape_cast %11 : vector<2x16x128xf32> to vector<32x128xf32>
    %c1 = arith.constant 1 : index
    %c0_8 = arith.constant 0 : index
    %c0_9 = arith.constant 0 : index
    %13 = vector.load %arg2[%c1, %c0_8, %c0_9] : memref<5x128x128xf32, #tpu.memory_space<vmem>>, vector<1x128x128xf32>
    %14 = vector.shape_cast %13 : vector<1x128x128xf32> to vector<128x128xf32>
    %cst_10 = arith.constant dense<0.000000e+00> : vector<32x128xf32>
    %15 = tpu.matmul %12, %14, %cst_10 {dimension_numbers = #tpu.dot_dimension_numbers<[1], [0], [0], [1], [0, 0, 1, 1], [], []>} : vector<32x128xf32>, vector<128x128xf32>, vector<32x128xf32> -> vector<32x128xf32>
    %16 = arith.addf %10, %15 : vector<32x128xf32>
    %17 = vector.extract_strided_slice %5 {offsets = [0, 2, 0], sizes = [2, 16, 128], strides = [1, 1, 1]} : vector<2x20x128xf32> to vector<2x16x128xf32>
    %18 = vector.shape_cast %17 : vector<2x16x128xf32> to vector<32x128xf32>
    %c2 = arith.constant 2 : index
    %c0_11 = arith.constant 0 : index
    %c0_12 = arith.constant 0 : index
    %19 = vector.load %arg2[%c2, %c0_11, %c0_12] : memref<5x128x128xf32, #tpu.memory_space<vmem>>, vector<1x128x128xf32>
    %20 = vector.shape_cast %19 : vector<1x128x128xf32> to vector<128x128xf32>
    %cst_13 = arith.constant dense<0.000000e+00> : vector<32x128xf32>
    %21 = tpu.matmul %18, %20, %cst_13 {dimension_numbers = #tpu.dot_dimension_numbers<[1], [0], [0], [1], [0, 0, 1, 1], [], []>} : vector<32x128xf32>, vector<128x128xf32>, vector<32x128xf32> -> vector<32x128xf32>
    %22 = arith.addf %16, %21 : vector<32x128xf32>
    %23 = vector.extract_strided_slice %5 {offsets = [0, 3, 0], sizes = [2, 16, 128], strides = [1, 1, 1]} : vector<2x20x128xf32> to vector<2x16x128xf32>
    %24 = vector.shape_cast %23 : vector<2x16x128xf32> to vector<32x128xf32>
    %c3 = arith.constant 3 : index
    %c0_14 = arith.constant 0 : index
    %c0_15 = arith.constant 0 : index
    %25 = vector.load %arg2[%c3, %c0_14, %c0_15] : memref<5x128x128xf32, #tpu.memory_space<vmem>>, vector<1x128x128xf32>
    %26 = vector.shape_cast %25 : vector<1x128x128xf32> to vector<128x128xf32>
    %cst_16 = arith.constant dense<0.000000e+00> : vector<32x128xf32>
    %27 = tpu.matmul %24, %26, %cst_16 {dimension_numbers = #tpu.dot_dimension_numbers<[1], [0], [0], [1], [0, 0, 1, 1], [], []>} : vector<32x128xf32>, vector<128x128xf32>, vector<32x128xf32> -> vector<32x128xf32>
    %28 = arith.addf %22, %27 : vector<32x128xf32>
    %29 = vector.extract_strided_slice %5 {offsets = [0, 4, 0], sizes = [2, 16, 128], strides = [1, 1, 1]} : vector<2x20x128xf32> to vector<2x16x128xf32>
    %30 = vector.shape_cast %29 : vector<2x16x128xf32> to vector<32x128xf32>
    %c4 = arith.constant 4 : index
    %c0_17 = arith.constant 0 : index
    %c0_18 = arith.constant 0 : index
    %31 = vector.load %arg2[%c4, %c0_17, %c0_18] : memref<5x128x128xf32, #tpu.memory_space<vmem>>, vector<1x128x128xf32>
    %32 = vector.shape_cast %31 : vector<1x128x128xf32> to vector<128x128xf32>
    %cst_19 = arith.constant dense<0.000000e+00> : vector<32x128xf32>
    %33 = tpu.matmul %30, %32, %cst_19 {dimension_numbers = #tpu.dot_dimension_numbers<[1], [0], [0], [1], [0, 0, 1, 1], [], []>} : vector<32x128xf32>, vector<128x128xf32>, vector<32x128xf32> -> vector<32x128xf32>
    %34 = arith.addf %28, %33 : vector<32x128xf32>
    %35 = vector.broadcast %2 : vector<1x128xf32> to vector<32x128xf32>
    %36 = arith.addf %34, %35 : vector<32x128xf32>
    %cst_20 = arith.constant dense<0.000000e+00> : vector<32xf32>
    %37 = vector.multi_reduction <add>, %36, %cst_20 [1] : vector<32x128xf32> to vector<32xf32>
    %38 = vector.shape_cast %37 : vector<32xf32> to vector<32x1xf32>
    %cst_21 = arith.constant 3.125000e-02 : f32
    %39 = vector.broadcast %cst_21 : f32 to vector<32x1xf32>
    %40 = arith.mulf %38, %39 : vector<32x1xf32>
    %41 = arith.mulf %36, %36 : vector<32x128xf32>
    %cst_22 = arith.constant dense<0.000000e+00> : vector<32xf32>
    %42 = vector.multi_reduction <add>, %41, %cst_22 [1] : vector<32x128xf32> to vector<32xf32>
    %43 = vector.shape_cast %42 : vector<32xf32> to vector<32x1xf32>
    %cst_23 = arith.constant 3.125000e-02 : f32
    %44 = vector.broadcast %cst_23 : f32 to vector<32x1xf32>
    %45 = arith.mulf %43, %44 : vector<32x1xf32>
    %46 = arith.mulf %40, %40 : vector<32x1xf32>
    %47 = arith.subf %45, %46 : vector<32x1xf32>
    %48 = vector.broadcast %40 : vector<32x1xf32> to vector<32x128xf32>
    %49 = arith.subf %36, %48 : vector<32x128xf32>
    %cst_24 = arith.constant 9.99999974E-6 : f32
    %50 = vector.broadcast %cst_24 : f32 to vector<32x1xf32>
    %51 = arith.addf %47, %50 : vector<32x1xf32>
    %52 = math.rsqrt %51 : vector<32x1xf32>
    %53 = vector.broadcast %52 : vector<32x1xf32> to vector<32x128xf32>
    %54 = arith.mulf %49, %53 : vector<32x128xf32>
    %cst_25 = arith.constant 5.000000e-01 : f32
    %55 = vector.broadcast %cst_25 : f32 to vector<32x128xf32>
    %56 = arith.mulf %55, %54 : vector<32x128xf32>
    %cst_26 = arith.constant 0.707106769 : f32
    %57 = vector.broadcast %cst_26 : f32 to vector<32x128xf32>
    %58 = arith.mulf %54, %57 : vector<32x128xf32>
    %59 = math.erf %58 : vector<32x128xf32>
    %cst_27 = arith.constant 1.000000e+00 : f32
    %60 = vector.broadcast %cst_27 : f32 to vector<32x128xf32>
    %61 = arith.addf %60, %59 : vector<32x128xf32>
    %62 = arith.mulf %56, %61 : vector<32x128xf32>
    %c0_28 = arith.constant 0 : index
    %c0_29 = arith.constant 0 : index
    %63 = vector.load %arg5[%c0_28, %c0_29] : memref<1x128xf32, #tpu.memory_space<vmem>>, vector<1x128xf32>
    %64 = vector.shape_cast %62 : vector<32x128xf32> to vector<2x16x128xf32>
    %cst_30 = arith.constant 0.000000e+00 : f32
    %65 = vector.broadcast %cst_30 : f32 to vector<2x2x128xf32>
    %66 = tpu.concatenate %65, %64, %65 in 1 : vector<2x2x128xf32>, vector<2x16x128xf32>, vector<2x2x128xf32> -> vector<2x20x128xf32>
    %67 = vector.extract_strided_slice %66 {offsets = [0, 0, 0], sizes = [2, 16, 128], strides = [1, 1, 1]} : vector<2x20x128xf32> to vector<2x16x128xf32>
    %68 = vector.shape_cast %67 : vector<2x16x128xf32> to vector<32x128xf32>
    %c0_31 = arith.constant 0 : index
    %c0_32 = arith.constant 0 : index
    %c0_33 = arith.constant 0 : index
    %69 = vector.load %arg4[%c0_31, %c0_32, %c0_33] : memref<5x128x128xf32, #tpu.memory_space<vmem>>, vector<1x128x128xf32>
    %70 = vector.shape_cast %69 : vector<1x128x128xf32> to vector<128x128xf32>
    %cst_34 = arith.constant dense<0.000000e+00> : vector<32x128xf32>
    %71 = tpu.matmul %68, %70, %cst_34 {dimension_numbers = #tpu.dot_dimension_numbers<[1], [0], [0], [1], [0, 0, 1, 1], [], []>} : vector<32x128xf32>, vector<128x128xf32>, vector<32x128xf32> -> vector<32x128xf32>
    %72 = vector.extract_strided_slice %66 {offsets = [0, 1, 0], sizes = [2, 16, 128], strides = [1, 1, 1]} : vector<2x20x128xf32> to vector<2x16x128xf32>
    %73 = vector.shape_cast %72 : vector<2x16x128xf32> to vector<32x128xf32>
    %c1_35 = arith.constant 1 : index
    %c0_36 = arith.constant 0 : index
    %c0_37 = arith.constant 0 : index
    %74 = vector.load %arg4[%c1_35, %c0_36, %c0_37] : memref<5x128x128xf32, #tpu.memory_space<vmem>>, vector<1x128x128xf32>
    %75 = vector.shape_cast %74 : vector<1x128x128xf32> to vector<128x128xf32>
    %cst_38 = arith.constant dense<0.000000e+00> : vector<32x128xf32>
    %76 = tpu.matmul %73, %75, %cst_38 {dimension_numbers = #tpu.dot_dimension_numbers<[1], [0], [0], [1], [0, 0, 1, 1], [], []>} : vector<32x128xf32>, vector<128x128xf32>, vector<32x128xf32> -> vector<32x128xf32>
    %77 = arith.addf %71, %76 : vector<32x128xf32>
    %78 = vector.extract_strided_slice %66 {offsets = [0, 2, 0], sizes = [2, 16, 128], strides = [1, 1, 1]} : vector<2x20x128xf32> to vector<2x16x128xf32>
    %79 = vector.shape_cast %78 : vector<2x16x128xf32> to vector<32x128xf32>
    %c2_39 = arith.constant 2 : index
    %c0_40 = arith.constant 0 : index
    %c0_41 = arith.constant 0 : index
    %80 = vector.load %arg4[%c2_39, %c0_40, %c0_41] : memref<5x128x128xf32, #tpu.memory_space<vmem>>, vector<1x128x128xf32>
    %81 = vector.shape_cast %80 : vector<1x128x128xf32> to vector<128x128xf32>
    %cst_42 = arith.constant dense<0.000000e+00> : vector<32x128xf32>
    %82 = tpu.matmul %79, %81, %cst_42 {dimension_numbers = #tpu.dot_dimension_numbers<[1], [0], [0], [1], [0, 0, 1, 1], [], []>} : vector<32x128xf32>, vector<128x128xf32>, vector<32x128xf32> -> vector<32x128xf32>
    %83 = arith.addf %77, %82 : vector<32x128xf32>
    %84 = vector.extract_strided_slice %66 {offsets = [0, 3, 0], sizes = [2, 16, 128], strides = [1, 1, 1]} : vector<2x20x128xf32> to vector<2x16x128xf32>
    %85 = vector.shape_cast %84 : vector<2x16x128xf32> to vector<32x128xf32>
    %c3_43 = arith.constant 3 : index
    %c0_44 = arith.constant 0 : index
    %c0_45 = arith.constant 0 : index
    %86 = vector.load %arg4[%c3_43, %c0_44, %c0_45] : memref<5x128x128xf32, #tpu.memory_space<vmem>>, vector<1x128x128xf32>
    %87 = vector.shape_cast %86 : vector<1x128x128xf32> to vector<128x128xf32>
    %cst_46 = arith.constant dense<0.000000e+00> : vector<32x128xf32>
    %88 = tpu.matmul %85, %87, %cst_46 {dimension_numbers = #tpu.dot_dimension_numbers<[1], [0], [0], [1], [0, 0, 1, 1], [], []>} : vector<32x128xf32>, vector<128x128xf32>, vector<32x128xf32> -> vector<32x128xf32>
    %89 = arith.addf %83, %88 : vector<32x128xf32>
    %90 = vector.extract_strided_slice %66 {offsets = [0, 4, 0], sizes = [2, 16, 128], strides = [1, 1, 1]} : vector<2x20x128xf32> to vector<2x16x128xf32>
    %91 = vector.shape_cast %90 : vector<2x16x128xf32> to vector<32x128xf32>
    %c4_47 = arith.constant 4 : index
    %c0_48 = arith.constant 0 : index
    %c0_49 = arith.constant 0 : index
    %92 = vector.load %arg4[%c4_47, %c0_48, %c0_49] : memref<5x128x128xf32, #tpu.memory_space<vmem>>, vector<1x128x128xf32>
    %93 = vector.shape_cast %92 : vector<1x128x128xf32> to vector<128x128xf32>
    %cst_50 = arith.constant dense<0.000000e+00> : vector<32x128xf32>
    %94 = tpu.matmul %91, %93, %cst_50 {dimension_numbers = #tpu.dot_dimension_numbers<[1], [0], [0], [1], [0, 0, 1, 1], [], []>} : vector<32x128xf32>, vector<128x128xf32>, vector<32x128xf32> -> vector<32x128xf32>
    %95 = arith.addf %89, %94 : vector<32x128xf32>
    %96 = vector.broadcast %63 : vector<1x128xf32> to vector<32x128xf32>
    %97 = arith.addf %95, %96 : vector<32x128xf32>
    %cst_51 = arith.constant dense<0.000000e+00> : vector<32xf32>
    %98 = vector.multi_reduction <add>, %97, %cst_51 [1] : vector<32x128xf32> to vector<32xf32>
    %99 = vector.shape_cast %98 : vector<32xf32> to vector<32x1xf32>
    %cst_52 = arith.constant 3.125000e-02 : f32
    %100 = vector.broadcast %cst_52 : f32 to vector<32x1xf32>
    %101 = arith.mulf %99, %100 : vector<32x1xf32>
    %102 = arith.mulf %97, %97 : vector<32x128xf32>
    %cst_53 = arith.constant dense<0.000000e+00> : vector<32xf32>
    %103 = vector.multi_reduction <add>, %102, %cst_53 [1] : vector<32x128xf32> to vector<32xf32>
    %104 = vector.shape_cast %103 : vector<32xf32> to vector<32x1xf32>
    %cst_54 = arith.constant 3.125000e-02 : f32
    %105 = vector.broadcast %cst_54 : f32 to vector<32x1xf32>
    %106 = arith.mulf %104, %105 : vector<32x1xf32>
    %107 = arith.mulf %101, %101 : vector<32x1xf32>
    %108 = arith.subf %106, %107 : vector<32x1xf32>
    %109 = vector.broadcast %101 : vector<32x1xf32> to vector<32x128xf32>
    %110 = arith.subf %97, %109 : vector<32x128xf32>
    %cst_55 = arith.constant 9.99999974E-6 : f32
    %111 = vector.broadcast %cst_55 : f32 to vector<32x1xf32>
    %112 = arith.addf %108, %111 : vector<32x1xf32>
    %113 = math.rsqrt %112 : vector<32x1xf32>
    %114 = vector.broadcast %113 : vector<32x1xf32> to vector<32x128xf32>
    %115 = arith.mulf %110, %114 : vector<32x128xf32>
    %cst_56 = arith.constant 5.000000e-01 : f32
    %116 = vector.broadcast %cst_56 : f32 to vector<32x128xf32>
    %117 = arith.mulf %116, %115 : vector<32x128xf32>
    %cst_57 = arith.constant 0.707106769 : f32
    %118 = vector.broadcast %cst_57 : f32 to vector<32x128xf32>
    %119 = arith.mulf %115, %118 : vector<32x128xf32>
    %120 = math.erf %119 : vector<32x128xf32>
    %cst_58 = arith.constant 1.000000e+00 : f32
    %121 = vector.broadcast %cst_58 : f32 to vector<32x128xf32>
    %122 = arith.addf %121, %120 : vector<32x128xf32>
    %123 = arith.mulf %117, %122 : vector<32x128xf32>
    %124 = arith.addf %123, %62 : vector<32x128xf32>
    %c0_59 = arith.constant 0 : index
    %c0_60 = arith.constant 0 : index
    %125 = vector.load %arg7[%c0_59, %c0_60] : memref<1x128xf32, #tpu.memory_space<vmem>>, vector<1x128xf32>
    %c0_61 = arith.constant 0 : index
    %c0_62 = arith.constant 0 : index
    %126 = vector.load %arg6[%c0_61, %c0_62] : memref<128x128xf32, #tpu.memory_space<vmem>>, vector<128x128xf32>
    %cst_63 = arith.constant dense<0.000000e+00> : vector<32x128xf32>
    %127 = tpu.matmul %124, %126, %cst_63 {dimension_numbers = #tpu.dot_dimension_numbers<[1], [0], [0], [1], [0, 0, 1, 1], [], []>} : vector<32x128xf32>, vector<128x128xf32>, vector<32x128xf32> -> vector<32x128xf32>
    %128 = vector.broadcast %125 : vector<1x128xf32> to vector<32x128xf32>
    %129 = arith.addf %127, %128 : vector<32x128xf32>
    %130 = vector.shape_cast %129 : vector<32x128xf32> to vector<2x16x128xf32>
    %131 = vector.extract_strided_slice %130 {offsets = [0, 0, 0], sizes = [2, 16, 16], strides = [1, 1, 1]} : vector<2x16x128xf32> to vector<2x16x16xf32>
    %c0_64 = arith.constant 0 : index
    %c0_65 = arith.constant 0 : index
    %c0_66 = arith.constant 0 : index
    %132 = vector.load %arg8[%c0_64, %c0_65, %c0_66] : memref<2x16x16xf32, #tpu.memory_space<vmem>>, vector<2x16x16xf32>
    tpu.vector_store %arg8[%c0_64, %c0_65, %c0_66], %131 {strides = array<i32>} : memref<2x16x16xf32, #tpu.memory_space<vmem>>, vector<2x16x16xf32>,
    return
  }
  func.func @transform_0(%arg0: i32) -> (i32, i32, i32) {
    %c0_i32 = arith.constant 0 : i32
    %c0_i32_0 = arith.constant 0 : i32
    %c0_i32_1 = arith.constant 0 : i32
    return %arg0, %c0_i32, %c0_i32_0 : i32, i32, i32
  }
  func.func @transform_1(%arg0: i32) -> (i32, i32, i32) {
    %c0_i32 = arith.constant 0 : i32
    %c0_i32_0 = arith.constant 0 : i32
    %c0_i32_1 = arith.constant 0 : i32
    %c0_i32_2 = arith.constant 0 : i32
    return %c0_i32, %c0_i32_0, %c0_i32_1 : i32, i32, i32
  }
  func.func @transform_2(%arg0: i32) -> (i32, i32) {
    %c0_i32 = arith.constant 0 : i32
    %c0_i32_0 = arith.constant 0 : i32
    %c0_i32_1 = arith.constant 0 : i32
    return %c0_i32, %c0_i32_0 : i32, i32
  }
  func.func @transform_3(%arg0: i32) -> (i32, i32, i32) {
    %c0_i32 = arith.constant 0 : i32
    %c0_i32_0 = arith.constant 0 : i32
    %c0_i32_1 = arith.constant 0 : i32
    %c0_i32_2 = arith.constant 0 : i32
    return %c0_i32, %c0_i32_0, %c0_i32_1 : i32, i32, i32
  }
  func.func @transform_4(%arg0: i32) -> (i32, i32) {
    %c0_i32 = arith.constant 0 : i32
    %c0_i32_0 = arith.constant 0 : i32
    %c0_i32_1 = arith.constant 0 : i32
    return %c0_i32, %c0_i32_0 : i32, i32
  }
  func.func @transform_5(%arg0: i32) -> (i32, i32) {
    %c0_i32 = arith.constant 0 : i32
    %c0_i32_0 = arith.constant 0 : i32
    %c0_i32_1 = arith.constant 0 : i32
    return %c0_i32, %c0_i32_0 : i32, i32
  }
  func.func @transform_6(%arg0: i32) -> (i32, i32) {
    %c0_i32 = arith.constant 0 : i32
    %c0_i32_0 = arith.constant 0 : i32
    %c0_i32_1 = arith.constant 0 : i32
    return %c0_i32, %c0_i32_0 : i32, i32
  }
  func.func @transform_7(%arg0: i32) -> (i32, i32, i32) {
    %c0_i32 = arith.constant 0 : i32
    %c0_i32_0 = arith.constant 0 : i32
    %c0_i32_1 = arith.constant 0 : i32
    return %arg0, %c0_i32, %c0_i32_0 : i32, i32, i32
  }
}

module attributes {stable_mosaic.version = 11 : i64} {
  func.func @_decoder_kernel(%arg0: i32, %arg1: memref<2x16x128xf32, #tpu.memory_space<vmem>>, %arg2: memref<5x128x128xf32, #tpu.memory_space<vmem>>, %arg3: memref<1x128xf32, #tpu.memory_space<vmem>>, %arg4: memref<5x128x128xf32, #tpu.memory_space<vmem>>, %arg5: memref<1x128xf32, #tpu.memory_space<vmem>>, %arg6: memref<128x128xf32, #tpu.memory_space<vmem>>, %arg7: memref<1x128xf32, #tpu.memory_space<vmem>>, %arg8: memref<2x16x16xf32, #tpu.memory_space<vmem>>) attributes {dimension_semantics = [#tpu.dimension_semantics<parallel>], iteration_bounds = array<i64: 1>, scalar_prefetch = 0 : i64, scratch_operands = 0 : i64, tpu.core_type = #tpu.core_type<tc>, window_params = [{transform_indices = @transform_0, window_bounds = array<i64: 2, 16, 128>}, {pipeline_mode = #tpu.pipeline_mode<synchronous>, transform_indices = @transform_1, window_bounds = array<i64: 5, 128, 128>}, {pipeline_mode = #tpu.pipeline_mode<synchronous>, transform_indices = @transform_2, window_bounds = array<i64: 1, 128>}, {pipeline_mode = #tpu.pipeline_mode<synchronous>, transform_indices = @transform_3, window_bounds = array<i64: 5, 128, 128>}, {pipeline_mode = #tpu.pipeline_mode<synchronous>, transform_indices = @transform_4, window_bounds = array<i64: 1, 128>}, {pipeline_mode = #tpu.pipeline_mode<synchronous>, transform_indices = @transform_5, window_bounds = array<i64: 128, 128>}, {pipeline_mode = #tpu.pipeline_mode<synchronous>, transform_indices = @transform_6, window_bounds = array<i64: 1, 128>}, {transform_indices = @transform_7, window_bounds = array<i64: 2, 16, 16>}]} {
    %c0 = arith.constant 0 : index
    %c0_0 = arith.constant 0 : index
    %c0_1 = arith.constant 0 : index
    %0 = vector.load %arg1[%c0, %c0_0, %c0_1] : memref<2x16x128xf32, #tpu.memory_space<vmem>>, vector<2x16x128xf32>
    %1 = vector.shape_cast %0 : vector<2x16x128xf32> to vector<32x128xf32>
    %c0_2 = arith.constant 0 : index
    %c0_3 = arith.constant 0 : index
    %2 = vector.load %arg3[%c0_2, %c0_3] : memref<1x128xf32, #tpu.memory_space<vmem>>, vector<1x128xf32>
    %3 = vector.shape_cast %1 : vector<32x128xf32> to vector<2x16x128xf32>
    %cst = arith.constant 0.000000e+00 : f32
    %4 = vector.broadcast %cst : f32 to vector<2x2x128xf32>
    %5 = tpu.concatenate %4, %3, %4 in 1 : vector<2x2x128xf32>, vector<2x16x128xf32>, vector<2x2x128xf32> -> vector<2x20x128xf32>
    %6 = vector.extract_strided_slice %5 {offsets = [0, 0, 0], sizes = [2, 16, 128], strides = [1, 1, 1]} : vector<2x20x128xf32> to vector<2x16x128xf32>
    %7 = vector.shape_cast %6 : vector<2x16x128xf32> to vector<32x128xf32>
    %c0_4 = arith.constant 0 : index
    %c0_5 = arith.constant 0 : index
    %c0_6 = arith.constant 0 : index
    %8 = vector.load %arg2[%c0_4, %c0_5, %c0_6] : memref<5x128x128xf32, #tpu.memory_space<vmem>>, vector<1x128x128xf32>
    %9 = vector.shape_cast %8 : vector<1x128x128xf32> to vector<128x128xf32>
    %cst_7 = arith.constant dense<0.000000e+00> : vector<32x128xf32>
    %10 = tpu.matmul %7, %9, %cst_7 {dimension_numbers = #tpu.dot_dimension_numbers<[1], [0], [0], [1], [0, 0, 1, 1], [], []>} : vector<32x128xf32>, vector<128x128xf32>, vector<32x128xf32> -> vector<32x128xf32>
    %11 = vector.extract_strided_slice %5 {offsets = [0, 1, 0], sizes = [2, 16, 128], strides = [1, 1, 1]} : vector<2x20x128xf32> to vector<2x16x128xf32>
    %12 = vector.shape_cast %11 : vector<2x16x128xf32> to vector<32x128xf32>
    %c1 = arith.constant 1 : index
    %c0_8 = arith.constant 0 : index
    %c0_9 = arith.constant 0 : index
    %13 = vector.load %arg2[%c1, %c0_8, %c0_9] : memref<5x128x128xf32, #tpu.memory_space<vmem>>, vector<1x128x128xf32>
    %14 = vector.shape_cast %13 : vector<1x128x128xf32> to vector<128x128xf32>
    %cst_10 = arith.constant dense<0.000000e+00> : vector<32x128xf32>
    %15 = tpu.matmul %12, %14, %cst_10 {dimension_numbers = #tpu.dot_dimension_numbers<[1], [0], [0], [1], [0, 0, 1, 1], [], []>} : vector<32x128xf32>, vector<128x128xf32>, vector<32x128xf32> -> vector<32x128xf32>
    %16 = arith.addf %10, %15 : vector<32x128xf32>
    %17 = vector.extract_strided_slice %5 {offsets = [0, 2, 0], sizes = [2, 16, 128], strides = [1, 1, 1]} : vector<2x20x128xf32> to vector<2x16x128xf32>
    %18 = vector.shape_cast %17 : vector<2x16x128xf32> to vector<32x128xf32>
    %c2 = arith.constant 2 : index
    %c0_11 = arith.constant 0 : index
    %c0_12 = arith.constant 0 : index
    %19 = vector.load %arg2[%c2, %c0_11, %c0_12] : memref<5x128x128xf32, #tpu.memory_space<vmem>>, vector<1x128x128xf32>
    %20 = vector.shape_cast %19 : vector<1x128x128xf32> to vector<128x128xf32>
    %cst_13 = arith.constant dense<0.000000e+00> : vector<32x128xf32>
    %21 = tpu.matmul %18, %20, %cst_13 {dimension_numbers = #tpu.dot_dimension_numbers<[1], [0], [0], [1], [0, 0, 1, 1], [], []>} : vector<32x128xf32>, vector<128x128xf32>, vector<32x128xf32> -> vector<32x128xf32>
    %22 = arith.addf %16, %21 : vector<32x128xf32>
    %23 = vector.extract_strided_slice %5 {offsets = [0, 3, 0], sizes = [2, 16, 128], strides = [1, 1, 1]} : vector<2x20x128xf32> to vector<2x16x128xf32>
    %24 = vector.shape_cast %23 : vector<2x16x128xf32> to vector<32x128xf32>
    %c3 = arith.constant 3 : index
    %c0_14 = arith.constant 0 : index
    %c0_15 = arith.constant 0 : index
    %25 = vector.load %arg2[%c3, %c0_14, %c0_15] : memref<5x128x128xf32, #tpu.memory_space<vmem>>, vector<1x128x128xf32>
    %26 = vector.shape_cast %25 : vector<1x128x128xf32> to vector<128x128xf32>
    %cst_16 = arith.constant dense<0.000000e+00> : vector<32x128xf32>
    %27 = tpu.matmul %24, %26, %cst_16 {dimension_numbers = #tpu.dot_dimension_numbers<[1], [0], [0], [1], [0, 0, 1, 1], [], []>} : vector<32x128xf32>, vector<128x128xf32>, vector<32x128xf32> -> vector<32x128xf32>
    %28 = arith.addf %22, %27 : vector<32x128xf32>
    %29 = vector.extract_strided_slice %5 {offsets = [0, 4, 0], sizes = [2, 16, 128], strides = [1, 1, 1]} : vector<2x20x128xf32> to vector<2x16x128xf32>
    %30 = vector.shape_cast %29 : vector<2x16x128xf32> to vector<32x128xf32>
    %c4 = arith.constant 4 : index
    %c0_17 = arith.constant 0 : index
    %c0_18 = arith.constant 0 : index
    %31 = vector.load %arg2[%c4, %c0_17, %c0_18] : memref<5x128x128xf32, #tpu.memory_space<vmem>>, vector<1x128x128xf32>
    %32 = vector.shape_cast %31 : vector<1x128x128xf32> to vector<128x128xf32>
    %cst_19 = arith.constant dense<0.000000e+00> : vector<32x128xf32>
    %33 = tpu.matmul %30, %32, %cst_19 {dimension_numbers = #tpu.dot_dimension_numbers<[1], [0], [0], [1], [0, 0, 1, 1], [], []>} : vector<32x128xf32>, vector<128x128xf32>, vector<32x128xf32> -> vector<32x128xf32>
    %34 = arith.addf %28, %33 : vector<32x128xf32>
    %35 = vector.broadcast %2 : vector<1x128xf32> to vector<32x128xf32>
    %36 = arith.addf %34, %35 : vector<32x128xf32>
    %cst_20 = arith.constant dense<0.000000e+00> : vector<32xf32>
    %37 = vector.multi_reduction <add>, %36, %cst_20 [1] : vector<32x128xf32> to vector<32xf32>
    %38 = vector.shape_cast %37 : vector<32xf32> to vector<32x1xf32>
    %cst_21 = arith.constant 3.125000e-02 : f32
    %39 = vector.broadcast %cst_21 : f32 to vector<32x1xf32>
    %40 = arith.mulf %38, %39 : vector<32x1xf32>
    %41 = arith.mulf %36, %36 : vector<32x128xf32>
    %cst_22 = arith.constant dense<0.000000e+00> : vector<32xf32>
    %42 = vector.multi_reduction <add>, %41, %cst_22 [1] : vector<32x128xf32> to vector<32xf32>
    %43 = vector.shape_cast %42 : vector<32xf32> to vector<32x1xf32>
    %cst_23 = arith.constant 3.125000e-02 : f32
    %44 = vector.broadcast %cst_23 : f32 to vector<32x1xf32>
    %45 = arith.mulf %43, %44 : vector<32x1xf32>
    %46 = arith.mulf %40, %40 : vector<32x1xf32>
    %47 = arith.subf %45, %46 : vector<32x1xf32>
    %48 = vector.broadcast %40 : vector<32x1xf32> to vector<32x128xf32>
    %49 = arith.subf %36, %48 : vector<32x128xf32>
    %cst_24 = arith.constant 9.99999974E-6 : f32
    %50 = vector.broadcast %cst_24 : f32 to vector<32x1xf32>
    %51 = arith.addf %47, %50 : vector<32x1xf32>
    %52 = math.rsqrt %51 : vector<32x1xf32>
    %53 = vector.broadcast %52 : vector<32x1xf32> to vector<32x128xf32>
    %54 = arith.mulf %49, %53 : vector<32x128xf32>
    %cst_25 = arith.constant 5.000000e-01 : f32
    %55 = vector.broadcast %cst_25 : f32 to vector<32x128xf32>
    %56 = arith.mulf %55, %54 : vector<32x128xf32>
    %cst_26 = arith.constant 0.707106769 : f32
    %57 = vector.broadcast %cst_26 : f32 to vector<32x128xf32>
    %58 = arith.mulf %54, %57 : vector<32x128xf32>
    %59 = math.erf %58 : vector<32x128xf32>
    %cst_27 = arith.constant 1.000000e+00 : f32
    %60 = vector.broadcast %cst_27 : f32 to vector<32x128xf32>
    %61 = arith.addf %60, %59 : vector<32x128xf32>
    %62 = arith.mulf %56, %61 : vector<32x128xf32>
    %c0_28 = arith.constant 0 : index
    %c0_29 = arith.constant 0 : index
    %63 = vector.load %arg5[%c0_28, %c0_29] : memref<1x128xf32, #tpu.memory_space<vmem>>, vector<1x128xf32>
    %64 = vector.shape_cast %62 : vector<32x128xf32> to vector<2x16x128xf32>
    %cst_30 = arith.constant 0.000000e+00 : f32
    %65 = vector.broadcast %cst_30 : f32 to vector<2x2x128xf32>
    %66 = tpu.concatenate %65, %64, %65 in 1 : vector<2x2x128xf32>, vector<2x16x128xf32>, vector<2x2x128xf32> -> vector<2x20x128xf32>
    %67 = vector.extract_strided_slice %66 {offsets = [0, 0, 0], sizes = [2, 16, 128], strides = [1, 1, 1]} : vector<2x20x128xf32> to vector<2x16x128xf32>
    %68 = vector.shape_cast %67 : vector<2x16x128xf32> to vector<32x128xf32>
    %c0_31 = arith.constant 0 : index
    %c0_32 = arith.constant 0 : index
    %c0_33 = arith.constant 0 : index
    %69 = vector.load %arg4[%c0_31, %c0_32, %c0_33] : memref<5x128x128xf32, #tpu.memory_space<vmem>>, vector<1x128x128xf32>
    %70 = vector.shape_cast %69 : vector<1x128x128xf32> to vector<128x128xf32>
    %cst_34 = arith.constant dense<0.000000e+00> : vector<32x128xf32>
    %71 = tpu.matmul %68, %70, %cst_34 {dimension_numbers = #tpu.dot_dimension_numbers<[1], [0], [0], [1], [0, 0, 1, 1], [], []>} : vector<32x128xf32>, vector<128x128xf32>, vector<32x128xf32> -> vector<32x128xf32>
    %72 = vector.extract_strided_slice %66 {offsets = [0, 1, 0], sizes = [2, 16, 128], strides = [1, 1, 1]} : vector<2x20x128xf32> to vector<2x16x128xf32>
    %73 = vector.shape_cast %72 : vector<2x16x128xf32> to vector<32x128xf32>
    %c1_35 = arith.constant 1 : index
    %c0_36 = arith.constant 0 : index
    %c0_37 = arith.constant 0 : index
    %74 = vector.load %arg4[%c1_35, %c0_36, %c0_37] : memref<5x128x128xf32, #tpu.memory_space<vmem>>, vector<1x128x128xf32>
    %75 = vector.shape_cast %74 : vector<1x128x128xf32> to vector<128x128xf32>
    %cst_38 = arith.constant dense<0.000000e+00> : vector<32x128xf32>
    %76 = tpu.matmul %73, %75, %cst_38 {dimension_numbers = #tpu.dot_dimension_numbers<[1], [0], [0], [1], [0, 0, 1, 1], [], []>} : vector<32x128xf32>, vector<128x128xf32>, vector<32x128xf32> -> vector<32x128xf32>
    %77 = arith.addf %71, %76 : vector<32x128xf32>
    %78 = vector.extract_strided_slice %66 {offsets = [0, 2, 0], sizes = [2, 16, 128], strides = [1, 1, 1]} : vector<2x20x128xf32> to vector<2x16x128xf32>
    %79 = vector.shape_cast %78 : vector<2x16x128xf32> to vector<32x128xf32>
    %c2_39 = arith.constant 2 : index
    %c0_40 = arith.constant 0 : index
    %c0_41 = arith.constant 0 : index
    %80 = vector.load %arg4[%c2_39, %c0_40, %c0_41] : memref<5x128x128xf32, #tpu.memory_space<vmem>>, vector<1x128x128xf32>
    %81 = vector.shape_cast %80 : vector<1x128x128xf32> to vector<128x128xf32>
    %cst_42 = arith.constant dense<0.000000e+00> : vector<32x128xf32>
    %82 = tpu.matmul %79, %81, %cst_42 {dimension_numbers = #tpu.dot_dimension_numbers<[1], [0], [0], [1], [0, 0, 1, 1], [], []>} : vector<32x128xf32>, vector<128x128xf32>, vector<32x128xf32> -> vector<32x128xf32>
    %83 = arith.addf %77, %82 : vector<32x128xf32>
    %84 = vector.extract_strided_slice %66 {offsets = [0, 3, 0], sizes = [2, 16, 128], strides = [1, 1, 1]} : vector<2x20x128xf32> to vector<2x16x128xf32>
    %85 = vector.shape_cast %84 : vector<2x16x128xf32> to vector<32x128xf32>
    %c3_43 = arith.constant 3 : index
    %c0_44 = arith.constant 0 : index
    %c0_45 = arith.constant 0 : index
    %86 = vector.load %arg4[%c3_43, %c0_44, %c0_45] : memref<5x128x128xf32, #tpu.memory_space<vmem>>, vector<1x128x128xf32>
    %87 = vector.shape_cast %86 : vector<1x128x128xf32> to vector<128x128xf32>
    %cst_46 = arith.constant dense<0.000000e+00> : vector<32x128xf32>
    %88 = tpu.matmul %85, %87, %cst_46 {dimension_numbers = #tpu.dot_dimension_numbers<[1], [0], [0], [1], [0, 0, 1, 1], [], []>} : vector<32x128xf32>, vector<128x128xf32>, vector<32x128xf32> -> vector<32x128xf32>
    %89 = arith.addf %83, %88 : vector<32x128xf32>
    %90 = vector.extract_strided_slice %66 {offsets = [0, 4, 0], sizes = [2, 16, 128], strides = [1, 1, 1]} : vector<2x20x128xf32> to vector<2x16x128xf32>
    %91 = vector.shape_cast %90 : vector<2x16x128xf32> to vector<32x128xf32>
    %c4_47 = arith.constant 4 : index
    %c0_48 = arith.constant 0 : index
    %c0_49 = arith.constant 0 : index
    %92 = vector.load %arg4[%c4_47, %c0_48, %c0_49] : memref<5x128x128xf32, #tpu.memory_space<vmem>>, vector<1x128x128xf32>
    %93 = vector.shape_cast %92 : vector<1x128x128xf32> to vector<128x128xf32>
    %cst_50 = arith.constant dense<0.000000e+00> : vector<32x128xf32>
    %94 = tpu.matmul %91, %93, %cst_50 {dimension_numbers = #tpu.dot_dimension_numbers<[1], [0], [0], [1], [0, 0, 1, 1], [], []>} : vector<32x128xf32>, vector<128x128xf32>, vector<32x128xf32> -> vector<32x128xf32>
    %95 = arith.addf %89, %94 : vector<32x128xf32>
    %96 = vector.broadcast %63 : vector<1x128xf32> to vector<32x128xf32>
    %97 = arith.addf %95, %96 : vector<32x128xf32>
    %cst_51 = arith.constant dense<0.000000e+00> : vector<32xf32>
    %98 = vector.multi_reduction <add>, %97, %cst_51 [1] : vector<32x128xf32> to vector<32xf32>
    %99 = vector.shape_cast %98 : vector<32xf32> to vector<32x1xf32>
    %cst_52 = arith.constant 3.125000e-02 : f32
    %100 = vector.broadcast %cst_52 : f32 to vector<32x1xf32>
    %101 = arith.mulf %99, %100 : vector<32x1xf32>
    %102 = arith.mulf %97, %97 : vector<32x128xf32>
    %cst_53 = arith.constant dense<0.000000e+00> : vector<32xf32>
    %103 = vector.multi_reduction <add>, %102, %cst_53 [1] : vector<32x128xf32> to vector<32xf32>
    %104 = vector.shape_cast %103 : vector<32xf32> to vector<32x1xf32>
    %cst_54 = arith.constant 3.125000e-02 : f32
    %105 = vector.broadcast %cst_54 : f32 to vector<32x1xf32>
    %106 = arith.mulf %104, %105 : vector<32x1xf32>
    %107 = arith.mulf %101, %101 : vector<32x1xf32>
    %108 = arith.subf %106, %107 : vector<32x1xf32>
    %109 = vector.broadcast %101 : vector<32x1xf32> to vector<32x128xf32>
    %110 = arith.subf %97, %109 : vector<32x128xf32>
    %cst_55 = arith.constant 9.99999974E-6 : f32
    %111 = vector.broadcast %cst_55 : f32 to vector<32x1xf32>
    %112 = arith.addf %108, %111 : vector<32x1xf32>
    %113 = math.rsqrt %112 : vector<32x1xf32>
    %114 = vector.broadcast %113 : vector<32x1xf32> to vector<32x128xf32>
    %115 = arith.mulf %110, %114 : vector<32x128xf32>
    %cst_56 = arith.constant 5.000000e-01 : f32
    %116 = vector.broadcast %cst_56 : f32 to vector<32x128xf32>
    %117 = arith.mulf %116, %115 : vector<32x128xf32>
    %cst_57 = arith.constant 0.707106769 : f32
    %118 = vector.broadcast %cst_57 : f32 to vector<32x128xf32>
    %119 = arith.mulf %115, %118 : vector<32x128xf32>
    %120 = math.erf %119 : vector<32x128xf32>
    %cst_58 = arith.constant 1.000000e+00 : f32
    %121 = vector.broadcast %cst_58 : f32 to vector<32x128xf32>
    %122 = arith.addf %121, %120 : vector<32x128xf32>
    %123 = arith.mulf %117, %122 : vector<32x128xf32>
    %124 = arith.addf %123, %62 : vector<32x128xf32>
    %c0_59 = arith.constant 0 : index
    %c0_60 = arith.constant 0 : index
    %125 = vector.load %arg7[%c0_59, %c0_60] : memref<1x128xf32, #tpu.memory_space<vmem>>, vector<1x128xf32>
    %c0_61 = arith.constant 0 : index
    %c0_62 = arith.constant 0 : index
    %126 = vector.load %arg6[%c0_61, %c0_62] : memref<128x128xf32, #tpu.memory_space<vmem>>, vector<128x128xf32>
    %cst_63 = arith.constant dense<0.000000e+00> : vector<32x128xf32>
    %127 = tpu.matmul %124, %126, %cst_63 {dimension_numbers = #tpu.dot_dimension_numbers<[1], [0], [0], [1], [0, 0, 1, 1], [], []>} : vector<32x128xf32>, vector<128x128xf32>, vector<32x128xf32> -> vector<32x128xf32>
    %128 = vector.broadcast %125 : vector<1x128xf32> to vector<32x128xf32>
    %129 = arith.addf %127, %128 : vector<32x128xf32>
    %130 = vector.shape_cast %129 : vector<32x128xf32> to vector<2x16x128xf32>
    %131 = vector.extract_strided_slice %130 {offsets = [0, 0, 0], sizes = [2, 16, 16], strides = [1, 1, 1]} : vector<2x16x128xf32> to vector<2x16x16xf32>
    %c0_64 = arith.constant 0 : index
    %c0_65 = arith.constant 0 : index
    %c0_66 = arith.constant 0 : index
    %132 = vector.load %arg8[%c0_64, %c0_65, %c0_66] : memref<2x16x16xf32, #tpu.memory_space<vmem>>, vector<2x16x16xf32>
    tpu.vector_store %arg8[%c0_64, %c0_65, %c0_66], %131 {strides = array<i32>} : memref<2x16x16xf32, #tpu.memory_space<vmem>>, vector<2x16x16xf32>,
    return
  }
  func.func @transform_0(%arg0: i32) -> (i32, i32, i32) {
    %c0_i32 = arith.constant 0 : i32
    %c0_i32_0 = arith.constant 0 : i32
    %c0_i32_1 = arith.constant 0 : i32
    return %arg0, %c0_i32, %c0_i32_0 : i32, i32, i32
  }
  func.func @transform_1(%arg0: i32) -> (i32, i32, i32) {
    %c0_i32 = arith.constant 0 : i32
    %c0_i32_0 = arith.constant 0 : i32
    %c0_i32_1 = arith.constant 0 : i32
    %c0_i32_2 = arith.constant 0 : i32
    return %c0_i32, %c0_i32_0, %c0_i32_1 : i32, i32, i32
  }
  func.func @transform_2(%arg0: i32) -> (i32, i32) {
    %c0_i32 = arith.constant 0 : i32
    %c0_i32_0 = arith.constant 0 : i32
    %c0_i32_1 = arith.constant 0 : i32
    return %c0_i32, %c0_i32_0 : i32, i32
  }
  func.func @transform_3(%arg0: i32) -> (i32, i32, i32) {
    %c0_i32 = arith.constant 0 : i32
    %c0_i32_0 = arith.constant 0 : i32
    %c0_i32_1 = arith.constant 0 : i32
    %c0_i32_2 = arith.constant 0 : i32
    return %c0_i32, %c0_i32_0, %c0_i32_1 : i32, i32, i32
  }
  func.func @transform_4(%arg0: i32) -> (i32, i32) {
    %c0_i32 = arith.constant 0 : i32
    %c0_i32_0 = arith.constant 0 : i32
    %c0_i32_1 = arith.constant 0 : i32
    return %c0_i32, %c0_i32_0 : i32, i32
  }
  func.func @transform_5(%arg0: i32) -> (i32, i32) {
    %c0_i32 = arith.constant 0 : i32
    %c0_i32_0 = arith.constant 0 : i32
    %c0_i32_1 = arith.constant 0 : i32
    return %c0_i32, %c0_i32_0 : i32, i32
  }
  func.func @transform_6(%arg0: i32) -> (i32, i32) {
    %c0_i32 = arith.constant 0 : i32
    %c0_i32_0 = arith.constant 0 : i32
    %c0_i32_1 = arith.constant 0 : i32
    return %c0_i32, %c0_i32_0 : i32, i32
  }
  func.func @transform_7(%arg0: i32) -> (i32, i32, i32) {
    %c0_i32 = arith.constant 0 : i32
    %c0_i32_0 = arith.constant 0 : i32
    %c0_i32_1 = arith.constant 0 : i32
    return %arg0, %c0_i32, %c0_i32_0 : i32, i32, i32
  }
}

</mosaic_0001>

<bundles_post_ra>
// kernel: tpu_custom_call.1
= control target key start
LH: loop header
LB: loop body
LE: loop exit
PB: predicated region body
PF: predicated region fallthrough
CT: control target
= control target key end

     0   :  { %12 = vsyncpa [#allocation3], 0  ;;  %s2190_s0 = inlined_call_operand.hbm [shape: f32[2,16,128], index: 0, kind: input, shape index: {}]   ;;  %s2191_s1 = inlined_call_operand.hbm [shape: f32[5,128,128], index: 1, kind: input, shape index: {}]   ;;  %s2192_s2 = inlined_call_operand.vmem [shape: f32[1,128], index: 2, kind: input, shape index: {}]   ;;  %s2193_s3 = inlined_call_operand.hbm [shape: f32[5,128,128], index: 3, kind: input, shape index: {}]   ;;  %s2194_s4 = inlined_call_operand.vmem [shape: f32[1,128], index: 4, kind: input, shape index: {}]   ;;  %s2195_s5 = inlined_call_operand.hbm [shape: f32[128,128], index: 5, kind: input, shape index: {}]   ;;  %s2196_s6 = inlined_call_operand.vmem [shape: f32[1,128], index: 6, kind: input, shape index: {}]   ;;  %s2197_s7 = inlined_call_operand.hbm [shape: f32[2,16,16], index: 7, kind: output, shape index: {}]  }
   0x1   :  { %13 = vsyncpa [#allocation6], 0 }
   0x2   :  { %14 = vsyncpa [#allocation9], 0 }
   0x3   :  { %15 = vsyncpa [#allocation4], 0  ;;  %s33_s26 = sshll.u32 %s2191_s1, 4  ;;  %s1566_s27 = smov [#allocation5]   ;;  %s34_s26 = int_to_ptr.hbm [resolvable:$true] %s33_s26 }
   0x4   :  { %s35_s28 = sshll.u32 %s1566_s27, 4  ;;  %s20_s8 = sshll.u32 %s2190_s0, 4  ;;  %s36_s28 = int_to_ptr.vmem [resolvable:$true] %s35_s28  ;;  %s21_s8 = int_to_ptr.hbm [resolvable:$true] %s20_s8 }
   0x5   :  { %s1567_s9 = smov 128   ;;  %s1568_s10 = smov 8  }
   0x6   :  { %41 = dma.hbm_to_vmem [thread:$0]  %s34_s26, 10240, %s36_s28, [#allocation6], %s1567_s9, %s1567_s9, %s1568_s10  }
   0x7   :  { %s1569_s11 = smov [#allocation2]   ;;  %s48_s1 = sshll.u32 %s2193_s3, 4  ;;  %s49_s1 = int_to_ptr.hbm [resolvable:$true] %s48_s1 }
   0x8   :  { %s22_s12 = sshll.u32 %s1569_s11, 4  ;;  %s63_s16 = sshll.u32 %s2195_s5, 4  ;;  %s23_s12 = int_to_ptr.vmem [resolvable:$true] %s22_s12  ;;  %s64_s16 = int_to_ptr.hbm [resolvable:$true] %s63_s16 }
   0x9   :  { %28 = dma.hbm_to_vmem [thread:$0]  %s21_s8, 512, %s23_s12, [#allocation3], %s1567_s9, %s1567_s9, %s1568_s10  }
   0xa   :  { %s1570_s17 = smov [#allocation7]   ;;  %s1571_s19 = smov [#allocation8]  }
   0xb   :  { %s50_s18 = sshll.u32 %s1570_s17, 4  ;;  %s65_s3 = sshll.u32 %s1571_s19, 4  ;;  %s51_s18 = int_to_ptr.vmem [resolvable:$true] %s50_s18  ;;  %s66_s3 = int_to_ptr.vmem [resolvable:$true] %s65_s3 }
   0xc   :  { %56 = dma.hbm_to_vmem [thread:$0]  %s49_s1, 10240, %s51_s18, [#allocation6], %s1567_s9, %s1567_s9, %s1568_s10  }
   0xd   :  { %71 = dma.hbm_to_vmem [thread:$0]  %s64_s16, 2048, %s66_s3, [#allocation9], %s1567_s9, %s1567_s9, %s1568_s10  }
   0xe   :  { %1558 = dma.done.wait [#allocation3], 512  }
   0xf   :  { %1559 = vsyncadd [#allocation3], 4294966784 }
  0x10   :  { %1560 = dma.done.wait [#allocation6], 20480  }
  0x11   :  { %1561 = vsyncadd [#allocation6], 4294946816 }
  0x12   :  { %1562 = dma.done.wait [#allocation9], 2048  }
  0x13   :  { %1563 = vsyncadd [#allocation9], 4294965248  ;;  %v167_v0 = vld [vmem:[#allocation5 + $0xf8] sm:$0xff]  ;;  %v166_v3 = vld [vmem:[#allocation5 + $0xf0] sm:$0xff]  ;;  %vm99_vm0 = vcmask 1041408   ;;  %vm136_vm1 = vcmask 1046528  }
  0x14   :  { %v131_v1 = vld [vmem:[#allocation5 + $0x78] sm:$0xff]  ;;  %168 = vmatpush.msra.mxu0 %v167_v0  ;;  %v130_v4 = vld [vmem:[#allocation5 + $0x70] sm:$0xff]  ;;  %v165_v7 = vld [vmem:[#allocation5 + $0xe8] sm:$0xff]  ;;  %vm226_vm2 = vcmask 1045504   ;;  %vm291_vm4 = vcmask 1044480   ;;  %vm356_vm5 = vcmask 1043456  }
  0x15   :  { %v257_v2 = vld [vmem:[#allocation5 + $0x178] sm:$0xff]  ;;  %197 = vmatpush.msra.mxu1 %v131_v1  ;;  %v256_v5 = vld [vmem:[#allocation5 + $0x170] sm:$0xff]  ;;  %v129_v8 = vld [vmem:[#allocation5 + $0x68] sm:$0xff]  ;;  %s1572_s23 = smov [#allocation10]   ;;  %s1349_s27 = sshll.u32 %s2197_s7, 4  ;;  %s1350_s27 = int_to_ptr.hbm [resolvable:$true] %s1349_s27 }
  0x16   :  { %258 = vmatpush.msra.mxu2 %v257_v2  ;;  %v322_v6 = vld [vmem:[#allocation5 + $0x1f8] sm:$0xff]  ;;  %169 = vmatpush.msra.mxu0 %v166_v3  ;;  %v255_v9 = vld [vmem:[#allocation5 + $0x168] sm:$0xff]  ;;  %v321_v10 = vld [vmem:[#allocation5 + $0x1f0] sm:$0xff]  ;;  %s1347_s24 = sshll.u32 %s1572_s23, 4  ;;  %s1348_s24 = int_to_ptr.vmem [resolvable:$true] %s1347_s24 }
  0x17   :  { %198 = vmatpush.msra.mxu1 %v130_v4  ;;  %323 = vmatpush.msra.mxu3 %v322_v6  ;;  %v164_v11 = vld [vmem:[#allocation5 + $0xe0] sm:$0xff]  ;;  %v320_v14 = vld [vmem:[#allocation5 + $0x1e8] sm:$0xff]  ;;  %v163_v15 = vld [vmem:[#allocation5 + $0xd8] sm:$0xff] }
  0x18   :  { %259 = vmatpush.msra.mxu2 %v256_v5  ;;  %v128_v12 = vld [vmem:[#allocation5 + $0x60] sm:$0xff]  ;;  %170 = vmatpush.msra.mxu0 %v165_v7  ;;  %v127_v16 = vld [vmem:[#allocation5 + $0x58] sm:$0xff]  ;;  %v162_v19 = vld [vmem:[#allocation5 + $0xd0] sm:$0xff] }
  0x19   :  { %199 = vmatpush.msra.mxu1 %v129_v8  ;;  %v254_v13 = vld [vmem:[#allocation5 + $0x160] sm:$0xff]  ;;  %324 = vmatpush.msra.mxu3 %v321_v10  ;;  %v253_v17 = vld [vmem:[#allocation5 + $0x158] sm:$0xff]  ;;  %v126_v20 = vld [vmem:[#allocation5 + $0x50] sm:$0xff] }
  0x1a   :  { %260 = vmatpush.msra.mxu2 %v255_v9  ;;  %171 = vmatpush.msra.mxu0 %v164_v11  ;;  %v319_v18 = vld [vmem:[#allocation5 + $0x1e0] sm:$0xff]  ;;  %v252_v21 = vld [vmem:[#allocation5 + $0x150] sm:$0xff]  ;;  %v318_v22 = vld [vmem:[#allocation5 + $0x1d8] sm:$0xff] }
  0x1b   :  { %200 = vmatpush.msra.mxu1 %v128_v12  ;;  %325 = vmatpush.msra.mxu3 %v320_v14  ;;  %v161_v23 = vld [vmem:[#allocation5 + $0xc8] sm:$0xff]  ;;  %v317_v26 = vld [vmem:[#allocation5 + $0x1d0] sm:$0xff]  ;;  %v160_v27 = vld [vmem:[#allocation5 + $0xc0] sm:$0xff] }
  0x1c   :  { %261 = vmatpush.msra.mxu2 %v254_v13  ;;  %172 = vmatpush.msra.mxu0 %v163_v15  ;;  %v125_v24 = vld [vmem:[#allocation5 + $0x48] sm:$0xff]  ;;  %v124_v28 = vld [vmem:[#allocation5 + $0x40] sm:$0xff]  ;;  %v159_v31 = vld [vmem:[#allocation5 + $0xb8] sm:$0xff] }
  0x1d   :  { %201 = vmatpush.msra.mxu1 %v127_v16  ;;  %326 = vmatpush.msra.mxu3 %v319_v18  ;;  %v251_v25 = vld [vmem:[#allocation5 + $0x148] sm:$0xff]  ;;  %v250_v29 = vld [vmem:[#allocation5 + $0x140] sm:$0xff]  ;;  %v123_v32 = vld [vmem:[#allocation5 + $0x38] sm:$0xff] }
  0x1e   :  { %262 = vmatpush.msra.mxu2 %v253_v17  ;;  %173 = vmatpush.msra.mxu0 %v162_v19  ;;  %v316_v30 = vld [vmem:[#allocation5 + $0x1c8] sm:$0xff]  ;;  %v249_v33 = vld [vmem:[#allocation5 + $0x138] sm:$0xff]  ;;  %v315_v34 = vld [vmem:[#allocation5 + $0x1c0] sm:$0xff] }
  0x1f   :  { %202 = vmatpush.msra.mxu1 %v126_v20  ;;  %327 = vmatpush.msra.mxu3 %v318_v22  ;;  %v158_v35 = vld [vmem:[#allocation5 + $0xb0] sm:$0xff]  ;;  %v314_v38 = vld [vmem:[#allocation5 + $0x1b8] sm:$0xff]  ;;  %v157_v39 = vld [vmem:[#allocation5 + $0xa8] sm:$0xff] }
  0x20   :  { %263 = vmatpush.msra.mxu2 %v252_v21  ;;  %174 = vmatpush.msra.mxu0 %v161_v23  ;;  %v122_v36 = vld [vmem:[#allocation5 + $0x30] sm:$0xff]  ;;  %v121_v40 = vld [vmem:[#allocation5 + $0x28] sm:$0xff]  ;;  %v156_v43 = vld [vmem:[#allocation5 + $0xa0] sm:$0xff] }
  0x21   :  { %203 = vmatpush.msra.mxu1 %v125_v24  ;;  %328 = vmatpush.msra.mxu3 %v317_v26  ;;  %v248_v37 = vld [vmem:[#allocation5 + $0x130] sm:$0xff]  ;;  %v247_v41 = vld [vmem:[#allocation5 + $0x128] sm:$0xff]  ;;  %v120_v44 = vld [vmem:[#allocation5 + $0x20] sm:$0xff] }
  0x22   :  { %264 = vmatpush.msra.mxu2 %v251_v25  ;;  %175 = vmatpush.msra.mxu0 %v160_v27  ;;  %v313_v42 = vld [vmem:[#allocation5 + $0x1b0] sm:$0xff]  ;;  %v246_v45 = vld [vmem:[#allocation5 + $0x120] sm:$0xff]  ;;  %v312_v46 = vld [vmem:[#allocation5 + $0x1a8] sm:$0xff] }
  0x23   :  { %204 = vmatpush.msra.mxu1 %v124_v28  ;;  %329 = vmatpush.msra.mxu3 %v316_v30  ;;  %v90_v47 = vld [vmem:[#allocation2] sm:$0xff]  ;;  %v91_v48 = vld [vmem:[#allocation2 + $0x8] sm:$0xff]  ;;  %v155_v49 = vld [vmem:[#allocation5 + $0x98] sm:$0xff] }
  0x24   :  { %265 = vmatpush.msra.mxu2 %v250_v29  ;;  %176 = vmatpush.msra.mxu0 %v159_v31  ;;  %v119_v50 = vld [vmem:[#allocation5 + $0x18] sm:$0xff]  ;;  %v100_v51 = vrot.slane %v90_v47, 6  ;;  %v101_v52 = vrot.slane %v91_v48, 6  ;;  %v311_v54 = vld [vmem:[#allocation5 + $0x1a0] sm:$0xff]  ;;  %v154_v55 = vld [vmem:[#allocation5 + $0x90] sm:$0xff] }
  0x25   :  { %205 = vmatpush.msra.mxu1 %v123_v32  ;;  %330 = vmatpush.msra.mxu3 %v315_v34  ;;  %v245_v53 = vld [vmem:[#allocation5 + $0x118] sm:$0xff]  ;;  %v118_v56 = vld [vmem:[#allocation5 + $0x10] sm:$0xff]  ;;  %v153_v61 = vld [vmem:[#allocation5 + $0x88] sm:$0xff] }
  0x26   :  { %266 = vmatpush.msra.mxu2 %v249_v33  ;;  %177 = vmatpush.msra.mxu0 %v158_v35  ;;  %v1638_v57 = vsel %vm99_vm0, %v100_v51, %v101_v52  ;;  %v1641_v58 = vsel %vm99_vm0, 0.0, %v100_v51  ;;  %v244_v59 = vld [vmem:[#allocation5 + $0x110] sm:$0xff]  ;;  %v310_v60 = vld [vmem:[#allocation5 + $0x198] sm:$0xff]  ;;  %v117_v62 = vld [vmem:[#allocation5 + $0x8] sm:$0xff]  ;;  %v1657_v15 = vsel %vm99_vm0, %v101_v52, 0.0 }
  0x27   :  { %206 = vmatpush.msra.mxu1 %v122_v36  ;;  %331 = vmatpush.msra.mxu3 %v314_v38  ;;  %v243_v63 = vld [vmem:[#allocation5 + $0x108] sm:$0xff]  ;;  %v137_v0 = vrot.slane %v1641_v58, 1  ;;  %v138_v1 = vrot.slane %v1638_v57, 1  ;;  %v309_v2 = vld [vmem:[#allocation5 + $0x190] sm:$0xff]  ;;  %v152_v3 = vld [vmem:[#allocation5 + $0x80] sm:$0xff]  ;;  %v227_v5 = vrot.slane %v1641_v58, 2 }
  0x28   :  { %267 = vmatpush.msra.mxu2 %v248_v37  ;;  %178 = vmatpush.msra.mxu0 %v157_v39  ;;  %v116_v4 = vld [vmem:[#allocation5] sm:$0xff]  ;;  %v228_v6 = vrot.slane %v1638_v57, 2  ;;  %v308_v8 = vld [vmem:[#allocation5 + $0x188] sm:$0xff]  ;;  %v292_v9 = vrot.slane %v1641_v58, 3  ;;  %v293_v10 = vrot.slane %v1638_v57, 3  ;;  %vm1651_vm3 = vmneg %vm99_vm0  ;;  %v140_v21 = vrot.slane %v1657_v15, 1 }
  0x29   :  { %207 = vmatpush.msra.mxu1 %v121_v40  ;;  %332 = vmatpush.msra.mxu3 %v313_v42  ;;  %v242_v7 = vld [vmem:[#allocation5 + $0x100] sm:$0xff]  ;;  %v139_v11 = vsel %vm136_vm1, %v137_v0, %v138_v1  ;;  %v387_v14 = vld [vmem:[#allocation5 + $0x278] sm:$0xff]  ;;  %v92_v17 = vld [vmem:[#allocation2 + $0x10] sm:$0xff]  ;;  %v230_v23 = vrot.slane %v1657_v15, 2  ;;  %v295_v27 = vrot.slane %v1657_v15, 3 }
  0x2a   :  { %268 = vmatpush.msra.mxu2 %v247_v41  ;;  %179 = vmatpush.msra.mxu0 %v156_v43  ;;  %v229_v13 = vsel %vm226_vm2, %v227_v5, %v228_v6  ;;  %v307_v16 = vld [vmem:[#allocation5 + $0x180] sm:$0xff]  ;;  %v93_v18 = vld [vmem:[#allocation2 + $0x18] sm:$0xff]  ;;  %v294_v19 = vsel %vm291_vm4, %v292_v9, %v293_v10  ;;  %v386_v20 = vld [vmem:[#allocation5 + $0x270] sm:$0xff]  ;;  %v103_v24 = vrot.slane %v92_v17, 6  ;;  %v141_v28 = vsel %vm136_vm1, %v138_v1, %v140_v21 }
  0x2b   :  { %208 = vmatpush.msra.mxu1 %v120_v44  ;;  %333 = vmatpush.msra.mxu3 %v312_v46  ;;  %v385_v22 = vld [vmem:[#allocation5 + $0x268] sm:$0xff]  ;;  %v104_v25 = vrot.slane %v93_v18, 6  ;;  %v384_v26 = vld [vmem:[#allocation5 + $0x260] sm:$0xff]  ;;  %v231_v29 = vsel %vm226_vm2, %v228_v6, %v230_v23  ;;  %v383_v30 = vld [vmem:[#allocation5 + $0x258] sm:$0xff]  ;;  %v296_v33 = vsel %vm291_vm4, %v293_v10, %v295_v27 }
  0x2c   :  { %269 = vmatpush.msra.mxu2 %v246_v45  ;;  %180 = vmatpush.msra.mxu0 %v155_v49  ;;  %v1671_v32 = vsel %vm99_vm0, 0.0, %v103_v24  ;;  %v382_v34 = vld [vmem:[#allocation5 + $0x250] sm:$0xff]  ;;  %v381_v37 = vld [vmem:[#allocation5 + $0x248] sm:$0xff]  ;;  %v380_v40 = vld [vmem:[#allocation5 + $0x240] sm:$0xff] }
  0x2d   :  { %209 = vmatpush.msra.mxu1 %v119_v50  ;;  %334 = vmatpush.msra.mxu3 %v311_v54  ;;  %v1668_v31 = vsel %vm99_vm0, %v103_v24, %v104_v25  ;;  %v142_v35 = vrot.slane %v1671_v32, 1  ;;  %v232_v38 = vrot.slane %v1671_v32, 2  ;;  %v297_v41 = vrot.slane %v1671_v32, 3  ;;  %v379_v45 = vld [vmem:[#allocation5 + $0x238] sm:$0xff]  ;;  %v378_v48 = vld [vmem:[#allocation5 + $0x230] sm:$0xff]  ;;  %v377_v50 = vld [vmem:[#allocation5 + $0x228] sm:$0xff] }
  0x2e   :  { %270 = vmatpush.msra.mxu2 %v245_v53  ;;  %181 = vmatpush.msra.mxu0 %v154_v55  ;;  %v143_v36 = vrot.slane %v1668_v31, 1  ;;  %v233_v39 = vrot.slane %v1668_v31, 2  ;;  %v298_v42 = vrot.slane %v1668_v31, 3  ;;  %v115_v46 = vsel %vm99_vm0, %v104_v25, 0.0  ;;  %v376_v52 = vld [vmem:[#allocation5 + $0x220] sm:$0xff] }
  0x2f   :  { %210 = vmatpush.msra.mxu1 %v118_v56  ;;  %335 = vmatpush.msra.mxu3 %v310_v60  ;;  %v145_v49 = vrot.slane %v115_v46, 1  ;;  %v300_v53 = vrot.slane %v115_v46, 3  ;;  %v375_v56 = vld [vmem:[#allocation5 + $0x218] sm:$0xff]  ;;  %v374_v60 = vld [vmem:[#allocation5 + $0x210] sm:$0xff]  ;;  %v372_v0 = vld [vmem:[#allocation5 + $0x200] sm:$0xff]  ;;  %v365_v5 = vrot.slane %v115_v46, 4 }
  0x30   :  { %271 = vmatpush.msra.mxu2 %v244_v59  ;;  %182 = vmatpush.msra.mxu0 %v153_v61  ;;  %v144_v43 = vsel %vm136_vm1, %v142_v35, %v143_v36  ;;  %v234_v44 = vsel %vm226_vm2, %v232_v38, %v233_v39  ;;  %v299_v47 = vsel %vm291_vm4, %v297_v41, %v298_v42  ;;  %v357_v61 = vrot.slane %v1641_v58, 4 }
  0x31   :  { %211 = vmatpush.msra.mxu1 %v117_v62  ;;  %336 = vmatpush.msra.mxu3 %v309_v2  ;;  %v146_v54 = vsel %vm136_vm1, %v143_v36, %v145_v49  ;;  %v301_v59 = vsel %vm291_vm4, %v298_v42, %v300_v53  ;;  %v358_v62 = vrot.slane %v1638_v57, 4  ;;  %v360_v2 = vrot.slane %v1657_v15, 4 }
  0x32   :  { %272 = vmatpush.msra.mxu2 %v243_v63  ;;  %183 = vmatpush.msra.mxu0 %v152_v3  ;;  %v373_v63 = vld [vmem:[#allocation5 + $0x208] sm:$0xff]  ;;  %v363_v58 = vrot.slane %v1668_v31, 4 }
  0x33   :  { %212 = vmatpush.msra.mxu1 %v116_v4  ;;  %337 = vmatpush.msra.mxu3 %v308_v8  ;;  %v359_v1 = vsel %vm356_vm5, %v357_v61, %v358_v62  ;;  %v361_v3 = vsel %vm356_vm5, %v358_v62, %v360_v2  ;;  %v362_v4 = vrot.slane %v1671_v32, 4 }
  0x34   :  { %273 = vmatpush.msra.mxu2 %v242_v7  ;;  %184 = vmatmul.f32.vlgmr.msra.gmra.mxu0 %v139_v11  ;;  %v366_v6 = vsel %vm356_vm5, %v363_v58, %v365_v5 }
  0x35   :  { %1365 = vmatmul.msk.f32.vlgmr.msra.gmra.mxu1 %vm1651_vm3, %v100_v51  ;;  %274 = vmatmul.f32.vlgmr.msra.gmra.mxu2 %v229_v13  ;;  %v235_v51 = vrot.slane %v115_v46, 2 }
  0x36   :  { %388 = vmatpush.msrb.mxu0 %v387_v14  ;;  %338 = vmatpush.msra.mxu3 %v307_v16 }
  0x37   :  { %339 = vmatmul.f32.vlgmr.msra.gmra.mxu3 %v294_v19  ;;  %v236_v55 = vsel %vm226_vm2, %v233_v39, %v235_v51 }
  0x38   :  { %389 = vmatpush.msrb.mxu0 %v386_v20  ;;  %v1403_v20 = vld [vmem:[%s2192_s2] ss:$0 sm:$0xff] }
  0x3a   :  { %390 = vmatpush.msrb.mxu0 %v385_v22 }
  0x3c   :  { %391 = vmatpush.msrb.mxu0 %v384_v26 }
  0x3d   :  { %187 = vmatmul.f32.gmra.mxu0 %v141_v28  ;;  %216 = vmatmul.f32.gmra.mxu1 %v1638_v57  ;;  %v364_v57 = vsel %vm356_vm5, %v362_v4, %v363_v58 }
  0x3e   :  { %277 = vmatmul.f32.gmra.mxu2 %v231_v29  ;;  %392 = vmatpush.msrb.mxu0 %v383_v30 }
  0x3f   :  { %342 = vmatmul.f32.gmra.mxu3 %v296_v33 }
  0x40   :  { %393 = vmatpush.msrb.mxu0 %v382_v34 }
  0x42   :  { %394 = vmatpush.msrb.mxu0 %v381_v37 }
  0x44   :  { %395 = vmatpush.msrb.mxu0 %v380_v40 }
  0x45   :  { %190 = vmatmul.f32.gmra.mxu0 %v144_v43  ;;  %1367 = vmatmul.msk.f32.gmra.mxu1 %vm1651_vm3, %v103_v24 }
  0x46   :  { %280 = vmatmul.f32.gmra.mxu2 %v234_v44  ;;  %396 = vmatpush.msrb.mxu0 %v379_v45 }
  0x47   :  { %345 = vmatmul.f32.gmra.mxu3 %v299_v47 }
  0x48   :  { %397 = vmatpush.msrb.mxu0 %v378_v48 }
  0x4a   :  { %398 = vmatpush.msrb.mxu0 %v377_v50 }
  0x4c   :  { %399 = vmatpush.msrb.mxu0 %v376_v52 }
  0x4d   :  { %193 = vmatmul.f32.gmra.mxu0 %v146_v54  ;;  %222 = vmatmul.f32.gmra.mxu1 %v1668_v31 }
  0x4e   :  { %283 = vmatmul.f32.gmra.mxu2 %v236_v55  ;;  %400 = vmatpush.msrb.mxu0 %v375_v56 }
  0x4f   :  { %348 = vmatmul.f32.gmra.mxu3 %v301_v59 }
  0x50   :  { %401 = vmatpush.msrb.mxu0 %v374_v60 }
  0x52   :  { %402 = vmatpush.msrb.mxu0 %v373_v63 }
  0x54   :  { %403 = vmatpush.msrb.mxu0 %v372_v0 }
  0x55   :  { %404 = vmatmul.f32.vlgmr.msrb.gmra.mxu0 %v359_v1 }
  0x5d   :  { %407 = vmatmul.f32.gmra.mxu0 %v361_v3 }
  0x65   :  { %410 = vmatmul.f32.gmra.mxu0 %v364_v57 }
  0x6d   :  { %413 = vmatmul.f32.gmra.mxu0 %v366_v6 }
  0xb1   :  { %v185_v7 = vpop.f32.mrf.mxu0 }
  0xb2   :  { %v214_v9 = vpop.f32.mrf.mxu1 }
  0xb3   :  { %v215_v15 = vadd.f32 %v214_v9, %v185_v7 }
  0xb8   :  { %v275_v11 = vpop.f32.mrf.mxu2 }
  0xb9   :  { %v287_v17 = vadd.f32 %v275_v11, %v215_v15  ;;  %v728_v11 = vld [vmem:[#allocation7 + $0x78] sm:$0xff]  ;;  %v727_v15 = vld [vmem:[#allocation7 + $0x70] sm:$0xff] }
  0xba   :  { %v188_v8 = vpop.f32.mrf.mxu0  ;;  %v340_v13 = vpop.f32.mrf.mxu3  ;;  %793 = vmatpush.msrb.mxu2 %v728_v11 }
  0xbb   :  { %v217_v16 = vpop.f32.mrf.mxu1  ;;  %v352_v19 = vadd.f32 %v340_v13, %v287_v17 }
  0xbc   :  { %v218_v23 = vadd.f32 %v217_v16, %v188_v8  ;;  %794 = vmatpush.msrb.mxu2 %v727_v15  ;;  %v718_v15 = vld [vmem:[#allocation7 + $0x28] sm:$0xff] }
  0xc1   :  { %v278_v18 = vpop.f32.mrf.mxu2 }
  0xc2   :  { %v191_v10 = vpop.f32.mrf.mxu0  ;;  %v343_v21 = vpop.f32.mrf.mxu3  ;;  %v288_v25 = vadd.f32 %v278_v18, %v218_v23 }
  0xc3   :  { %v220_v27 = vpop.f32.mrf.mxu1 }
  0xc4   :  { %v353_v30 = vadd.f32 %v343_v21, %v288_v25  ;;  %v221_v32 = vadd.f32 %v220_v27, %v191_v10  ;;  %v725_v25 = vld [vmem:[#allocation7 + $0x60] sm:$0xff] }
  0xc9   :  { %v281_v29 = vpop.f32.mrf.mxu2 }
  0xca   :  { %v194_v14 = vpop.f32.mrf.mxu0  ;;  %v346_v34 = vpop.f32.mrf.mxu3  ;;  %v289_v35 = vadd.f32 %v281_v29, %v221_v32 }
  0xcb   :  { %v223_v38 = vpop.f32.mrf.mxu1 }
  0xcc   :  { %v354_v39 = vadd.f32 %v346_v34, %v289_v35  ;;  %v224_v42 = vadd.f32 %v223_v38, %v194_v14 }
  0xd1   :  { %v284_v40 = vpop.f32.mrf.mxu2 }
  0xd2   :  { %v405_v22 = vpop.f32.mrf.mxu0  ;;  %v290_v44 = vadd.f32 %v284_v40, %v224_v42  ;;  %v349_v46 = vpop.f32.mrf.mxu3  ;;  %v763_v42 = vld [vmem:[#allocation7 + $0xf8] sm:$0xff] }
  0xd3   :  { %v417_v24 = vadd.f32 %v405_v22, %v352_v19  ;;  %v726_v19 = vld [vmem:[#allocation7 + $0x68] sm:$0xff]  ;;  %764 = vmatpush.msrb.mxu1 %v763_v42 }
  0xd4   :  { %v355_v48 = vadd.f32 %v349_v46, %v290_v44  ;;  %795 = vmatpush.msrb.mxu2 %v726_v19  ;;  %v722_v44 = vld [vmem:[#allocation7 + $0x48] sm:$0xff]  ;;  %v1787_v19 = vld [vmem:[#allocation7 + $0x1d8] sm:$0xff] }
  0xd5   :  { %v1703_v26 = vadd.f32 %v1403_v20, %v417_v24 }
  0xd6   :  { %796 = vmatpush.msrb.mxu2 %v725_v25  ;;  %v847_v25 = vld [vmem:[#allocation7 + $0x150] sm:$0xff] }
  0xd7   :  { %428 = vadd.xlane.f32.xlu0 %v1703_v26  ;;  %v440_v28 = vmul.f32 %v1703_v26, %v1703_v26 }
  0xd9   :  { %444 = vadd.xlane.f32.xlu1 %v440_v28 }
  0xda   :  { %v408_v31 = vpop.f32.mrf.mxu0 }
  0xdb   :  { %v418_v33 = vadd.f32 %v408_v31, %v353_v30 }
  0xdd   :  { %v1708_v36 = vadd.f32 %v1403_v20, %v418_v33  ;;  %v724_v33 = vld [vmem:[#allocation7 + $0x58] sm:$0xff] }
  0xde   :  { %797 = vmatpush.msrb.mxu2 %v724_v33  ;;  %v757_v33 = vld [vmem:[#allocation7 + $0xc8] sm:$0xff] }
  0xdf   :  { %430 = vadd.xlane.f32.xlu0 %v1708_v36  ;;  %v441_v37 = vmul.f32 %v1708_v36, %v1708_v36 }
  0xe1   :  { %446 = vadd.xlane.f32.xlu1 %v441_v37  ;;  %v723_v37 = vld [vmem:[#allocation7 + $0x50] sm:$0xff] }
  0xe2   :  { %v411_v41 = vpop.f32.mrf.mxu0  ;;  %798 = vmatpush.msrb.mxu2 %v723_v37 }
  0xe3   :  { %v419_v43 = vadd.f32 %v411_v41, %v354_v39 }
  0xe4   :  { %799 = vmatpush.msrb.mxu2 %v722_v44  ;;  %v756_v44 = vld [vmem:[#allocation7 + $0xc0] sm:$0xff] }
  0xe5   :  { %v1713_v45 = vadd.f32 %v1403_v20, %v419_v43  ;;  %v852_v43 = vld [vmem:[#allocation7 + $0x178] sm:$0xff] }
  0xe6   :  { %853 = vmatpush.msrb.mxu3 %v852_v43 }
  0xe7   :  { %432 = vadd.xlane.f32.xlu2 %v1713_v45  ;;  %v442_v47 = vmul.f32 %v1713_v45, %v1713_v45 }
  0xe9   :  { %448 = vadd.xlane.f32.xlu0 %v442_v47 }
  0xea   :  { %v414_v49 = vpop.f32.mrf.mxu0 }
  0xeb   :  { %v420_v50 = vadd.f32 %v414_v49, %v355_v48  ;;  %v1752_v48 = vld [vmem:[#allocation7 + $0x1f8] sm:$0xff] }
  0xec   :  { %917 = vmatpush.msra.mxu0 %v1752_v48 }
  0xed   :  { %v1718_v51 = vadd.f32 %v1403_v20, %v420_v50 }
  0xef   :  { %434 = vadd.xlane.f32.xlu2 %v1718_v51  ;;  %v443_v52 = vmul.f32 %v1718_v51, %v1718_v51 }
  0xf1   :  { %450 = vadd.xlane.f32.xlu1 %v443_v52  ;;  %v762_v52 = vld [vmem:[#allocation7 + $0xf0] sm:$0xff] }
  0xf2   :  { %765 = vmatpush.msrb.mxu1 %v762_v52 }
 0x14a   :  { %v429_v53 = vpop.xlane.xlu0 %428 }
 0x14b   :  { %v436_v54 = vmul.f32 0.03125, %v429_v53  ;;  %v851_v53 = vld [vmem:[#allocation7 + $0x170] sm:$0xff] }
 0x14c   :  { %v445_v55 = vpop.xlane.xlu1 %444  ;;  %854 = vmatpush.msrb.mxu3 %v851_v53 }
 0x14d   :  { %v456_v56 = vmul.f32 %v436_v54, %v436_v54  ;;  %v452_v59 = vmul.f32 0.03125, %v445_v55  ;;  %v464_v23 = vsub.f32 %v1703_v26, %v436_v54 }
 0x14f   :  { %v460_v60 = vsub.f32 %v452_v59, %v456_v56  ;;  %v721_v56 = vld [vmem:[#allocation7 + $0x40] sm:$0xff]  ;;  %v1762_v59 = vld [vmem:[#allocation7 + $0x1f0] sm:$0xff] }
 0x150   :  { %800 = vmatpush.msrb.mxu2 %v721_v56  ;;  %918 = vmatpush.msra.mxu0 %v1762_v59 }
 0x151   :  { %v468_v61 = vadd.f32 1e-05, %v460_v60 }
 0x152   :  { %v431_v62 = vpop.xlane.xlu0 %430 }
 0x153   :  { %1406 = vrsqrt.f32 %v468_v61  ;;  %v1723_v63 = vmul.f32 0.03125, %v431_v62  ;;  %vm478_vm7 = vweird.f32 %v468_v61  ;;  %v720_v62 = vld [vmem:[#allocation7 + $0x38] sm:$0xff] }
 0x154   :  { %v447_v0 = vpop.xlane.xlu1 %446  ;;  %801 = vmatpush.msrb.mxu2 %v720_v62  ;;  %v714_v62 = vld [vmem:[#allocation7 + $0x8] sm:$0xff] }
 0x155   :  { %v457_v1 = vmul.f32 %v1723_v63, %v1723_v63  ;;  %v453_v2 = vmul.f32 0.03125, %v447_v0  ;;  %v465_v50 = vsub.f32 %v1708_v36, %v1723_v63  ;;  %v761_v36 = vld [vmem:[#allocation7 + $0xe8] sm:$0xff] }
 0x156   :  { %766 = vmatpush.msrb.mxu1 %v761_v36  ;;  %v755_v36 = vld [vmem:[#allocation7 + $0xb8] sm:$0xff] }
 0x157   :  { %v461_v3 = vsub.f32 %v453_v2, %v457_v1  ;;  %v1768_v1 = vld [vmem:[#allocation7 + $0x1e8] sm:$0xff] }
 0x158   :  { %919 = vmatpush.msra.mxu0 %v1768_v1 }
 0x159   :  { %v1407_v4 = vpop.eup %1406  ;;  %v469_v58 = vadd.f32 1e-05, %v461_v3 }
 0x15a   :  { %v473_v57 = vmul.f32 %v1407_v4, %v468_v61  ;;  %v433_v5 = vpop.xlane.xlu2 %432  ;;  %vm479_vm6 = vweird.f32 %v1407_v4  ;;  %v850_v61 = vld [vmem:[#allocation7 + $0x168] sm:$0xff] }
 0x15b   :  { %1408 = vrsqrt.f32 %v469_v58  ;;  %v1727_v6 = vmul.f32 0.03125, %v433_v5  ;;  %vm480_vm8 = vmor %vm478_vm7, %vm479_vm6  ;;  %vm488_vm10 = vweird.f32 %v469_v58  ;;  %855 = vmatpush.msrb.mxu3 %v850_v61  ;;  %v844_v61 = vld [vmem:[#allocation7 + $0x138] sm:$0xff] }
 0x15c   :  { %v474_v7 = vmul.f32 %v1407_v4, %v473_v57  ;;  %v449_v8 = vpop.xlane.xlu0 %448  ;;  %v719_v57 = vld [vmem:[#allocation7 + $0x30] sm:$0xff] }
 0x15d   :  { %v458_v9 = vmul.f32 %v1727_v6, %v1727_v6  ;;  %v454_v10 = vmul.f32 0.03125, %v449_v8  ;;  %802 = vmatpush.msrb.mxu2 %v719_v57 }
 0x15e   :  { %v475_v13 = vmul.f32 0.5, %v474_v7  ;;  %v1776_v7 = vld [vmem:[#allocation7 + $0x1e0] sm:$0xff] }
 0x15f   :  { %v462_v14 = vsub.f32 %v454_v10, %v458_v9  ;;  %920 = vmatpush.msra.mxu0 %v1776_v7  ;;  %803 = vmatpush.msrb.mxu2 %v718_v15 }
 0x160   :  { %v476_v16 = vsub.f32 1.5, %v475_v13  ;;  %v759_v13 = vld [vmem:[#allocation7 + $0xd8] sm:$0xff] }
 0x161   :  { %v1409_v17 = vpop.eup %1408  ;;  %v1731_v18 = vadd.f32 1e-05, %v462_v14  ;;  %v848_v14 = vld [vmem:[#allocation7 + $0x158] sm:$0xff]  ;;  %921 = vmatpush.msra.mxu0 %v1787_v19 }
 0x162   :  { %v477_v20 = vmul.f32 %v1407_v4, %v476_v16  ;;  %v483_v21 = vmul.f32 %v1409_v17, %v469_v58  ;;  %v435_v22 = vpop.xlane.xlu2 %434  ;;  %vm489_vm9 = vweird.f32 %v1409_v17  ;;  %v849_v58 = vld [vmem:[#allocation7 + $0x160] sm:$0xff] }
 0x163   :  { %1410 = vrsqrt.f32 %v1731_v18  ;;  %v1735_v24 = vmul.f32 0.03125, %v435_v22  ;;  %vm490_vm11 = vmor %vm488_vm10, %vm489_vm9  ;;  %856 = vmatpush.msrb.mxu3 %v849_v58  ;;  %vm498_vm13 = vweird.f32 %v1731_v18  ;;  %v466_v22 = vsub.f32 %v1713_v45, %v1727_v6  ;;  %v717_v45 = vld [vmem:[#allocation7 + $0x20] sm:$0xff]  ;;  %v1806_v6 = vld [vmem:[#allocation7 + $0x1d0] sm:$0xff] }
 0x164   :  { %v481_v27 = vsel %vm480_vm8, %v1407_v4, %v477_v20  ;;  %v484_v28 = vmul.f32 %v1409_v17, %v483_v21  ;;  %v451_v29 = vpop.xlane.xlu1 %450  ;;  %v760_v4 = vld [vmem:[#allocation7 + $0xe0] sm:$0xff]  ;;  %804 = vmatpush.msrb.mxu2 %v717_v45  ;;  %922 = vmatpush.msra.mxu0 %v1806_v6  ;;  %v843_v58 = vld [vmem:[#allocation7 + $0x130] sm:$0xff]  ;;  %v1860_v45 = vld [vmem:[#allocation7 + $0x1a8] sm:$0xff] }
 0x165   :  { %v1737_v30 = vmul.f32 %v481_v27, %v464_v23  ;;  %v459_v31 = vmul.f32 %v1735_v24, %v1735_v24  ;;  %v455_v32 = vmul.f32 0.03125, %v451_v29  ;;  %767 = vmatpush.msrb.mxu1 %v760_v4  ;;  %857 = vmatpush.msrb.mxu3 %v848_v14  ;;  %v754_v4 = vld [vmem:[#allocation7 + $0xb0] sm:$0xff] }
 0x166   :  { %v485_v34 = vmul.f32 0.5, %v484_v28 }
 0x167   :  { %v1742_v26 = vmul.f32 0.70710677, %v1737_v30  ;;  %v463_v35 = vsub.f32 %v455_v32, %v459_v31  ;;  %768 = vmatpush.msrb.mxu1 %v759_v13  ;;  %858 = vmatpush.msrb.mxu3 %v847_v25  ;;  %v753_v13 = vld [vmem:[#allocation7 + $0xa8] sm:$0xff] }
 0x168   :  { %v486_v38 = vsub.f32 1.5, %v485_v34  ;;  %v846_v34 = vld [vmem:[#allocation7 + $0x148] sm:$0xff] }
 0x169   :  { %v1744_v39 = vpop.eup %1410  ;;  %v524_v40 = vmul.f32 %v1742_v26, %v1742_v26  ;;  %v1748_v41 = vadd.f32 1e-05, %v463_v35  ;;  %v716_v35 = vld [vmem:[#allocation7 + $0x18] sm:$0xff]  ;;  %859 = vmatpush.msrb.mxu3 %v846_v34  ;;  %v1865_v34 = vld [vmem:[#allocation7 + $0x1a0] sm:$0xff] }
 0x16a   :  { %v487_v46 = vmul.f32 %v1409_v17, %v486_v38  ;;  %v493_v47 = vmul.f32 %v1744_v39, %v1731_v18  ;;  %vm499_vm12 = vweird.f32 %v1744_v39  ;;  %v758_v18 = vld [vmem:[#allocation7 + $0xd0] sm:$0xff]  ;;  %805 = vmatpush.msrb.mxu2 %v716_v35  ;;  %v751_v35 = vld [vmem:[#allocation7 + $0x98] sm:$0xff] }
 0x16b   :  { %v1754_v49 = vmin.f32 %v524_v40, 16.0  ;;  %1412 = vrsqrt.f32 %v1748_v41  ;;  %vm1796_vm14 = vmor %vm498_vm13, %vm499_vm12  ;;  %769 = vmatpush.msrb.mxu1 %v758_v18  ;;  %vm508_vm6 = vweird.f32 %v1748_v41 }
 0x16c   :  { %v491_v54 = vsel %vm490_vm11, %v1409_v17, %v487_v46  ;;  %v494_v55 = vmul.f32 %v1744_v39, %v493_v47  ;;  %v845_v46 = vld [vmem:[#allocation7 + $0x140] sm:$0xff]  ;;  %v715_v47 = vld [vmem:[#allocation7 + $0x10] sm:$0xff] }
 0x16d   :  { %v1764_v60 = vmul.f32 %v491_v54, %v465_v50  ;;  %v526_v63 = vmul.f32 2.1237322e-06, %v1754_v49  ;;  %v537_v2 = vmul.f32 3.8918573e-05, %v1754_v49  ;;  %770 = vmatpush.msrb.mxu1 %v757_v33  ;;  %860 = vmatpush.msrb.mxu3 %v845_v46  ;;  %v1825_v54 = vld [vmem:[#allocation7 + $0x1c0] sm:$0xff] }
 0x16e   :  { %v495_v0 = vmul.f32 0.5, %v494_v55  ;;  %806 = vmatpush.msrb.mxu2 %v715_v47 }
 0x16f   :  { %v1772_v3 = vmul.f32 0.70710677, %v1764_v60  ;;  %v527_v8 = vadd.f32 0.00028619796, %v526_v63  ;;  %v538_v9 = vadd.f32 0.001143296, %v537_v2  ;;  %771 = vmatpush.msrb.mxu1 %v756_v44  ;;  %861 = vmatpush.msrb.mxu3 %v844_v61 }
 0x170   :  { %v496_v5 = vsub.f32 1.5, %v495_v0  ;;  %v1834_v2 = vld [vmem:[#allocation7 + $0x1b8] sm:$0xff]  ;;  %807 = vmatpush.msrb.mxu2 %v714_v62  ;;  %v750_v44 = vld [vmem:[#allocation7 + $0x90] sm:$0xff] }
 0x171   :  { %v1778_v10 = vpop.eup %1412  ;;  %v564_v11 = vmul.f32 %v1772_v3, %v1772_v3  ;;  %v528_v20 = vmul.f32 %v527_v8, %v1754_v49  ;;  %v539_v27 = vmul.f32 %v538_v9, %v1754_v49  ;;  %772 = vmatpush.msrb.mxu1 %v755_v36  ;;  %v467_v8 = vsub.f32 %v1718_v51, %v1735_v24  ;;  %v713_v9 = vld [vmem:[#allocation7] sm:$0xff]  ;;  %v838_v36 = vld [vmem:[#allocation7 + $0x108] sm:$0xff] }
 0x172   :  { %v497_v16 = vmul.f32 %v1744_v39, %v496_v5  ;;  %v503_v17 = vmul.f32 %v1778_v10, %v1748_v41  ;;  %vm509_vm15 = vweird.f32 %v1778_v10  ;;  %862 = vmatpush.msrb.mxu3 %v843_v58  ;;  %808 = vmatpush.msrb.mxu2 %v713_v9  ;;  %v748_v9 = vld [vmem:[#allocation7 + $0x80] sm:$0xff] }
 0x173   :  { %v1790_v21 = vmin.f32 %v564_v11, 16.0  ;;  %v529_v31 = vadd.f32 0.0036580483, %v528_v20  ;;  %v540_v40 = vadd.f32 0.014752088, %v539_v27  ;;  %vm1821_vm7 = vmor %vm508_vm6, %vm509_vm15  ;;  %v1840_v11 = vld [vmem:[#allocation7 + $0x1b0] sm:$0xff]  ;;  %773 = vmatpush.msrb.mxu1 %v754_v4 }
 0x174   :  { %v501_v28 = vsel %vm1796_vm14, %v1744_v39, %v497_v16  ;;  %v504_v29 = vmul.f32 %v1778_v10, %v503_v17  ;;  %v1813_v39 = vld [vmem:[#allocation7 + $0x1c8] sm:$0xff] }
 0x175   :  { %v566_v32 = vmul.f32 2.1237322e-06, %v1790_v21  ;;  %v1811_v37 = vmul.f32 %v501_v28, %v466_v22  ;;  %v577_v42 = vmul.f32 3.8918573e-05, %v1790_v21  ;;  %923 = vmatpush.msra.mxu0 %v1813_v39  ;;  %v530_v50 = vmul.f32 %v529_v31, %v1754_v49  ;;  %774 = vmatpush.msrb.mxu1 %v753_v13  ;;  %v842_v27 = vld [vmem:[#allocation7 + $0x128] sm:$0xff]  ;;  %v752_v31 = vld [vmem:[#allocation7 + $0xa0] sm:$0xff] }
 0x176   :  { %v505_v38 = vmul.f32 0.5, %v504_v29  ;;  %v541_v41 = vmul.f32 %v540_v40, %v1754_v49  ;;  %863 = vmatpush.msrb.mxu3 %v842_v27 }
 0x177   :  { %v567_v43 = vadd.f32 0.00028619796, %v566_v32  ;;  %v578_v55 = vadd.f32 0.001143296, %v577_v42  ;;  %924 = vmatpush.msra.mxu0 %v1825_v54  ;;  %v1831_v63 = vmul.f32 0.70710677, %v1811_v37  ;;  %775 = vmatpush.msrb.mxu1 %v752_v31 }
 0x178   :  { %v506_v52 = vsub.f32 1.5, %v505_v38  ;;  %v542_v57 = vadd.f32 0.112945676, %v541_v41  ;;  %v531_v14 = vadd.f32 0.05243302, %v530_v50  ;;  %v841_v32 = vld [vmem:[#allocation7 + $0x120] sm:$0xff] }
 0x179   :  { %v568_v56 = vmul.f32 %v567_v43, %v1790_v21  ;;  %v579_v5 = vmul.f32 %v578_v55, %v1790_v21  ;;  %925 = vmatpush.msra.mxu0 %v1834_v2  ;;  %v604_v15 = vmul.f32 %v1831_v63, %v1831_v63  ;;  %v840_v38 = vld [vmem:[#allocation7 + $0x118] sm:$0xff]  ;;  %864 = vmatpush.msrb.mxu3 %v841_v32  ;;  %v1877_v55 = vld [vmem:[#allocation7 + $0x190] sm:$0xff] }
 0x17a   :  { %v507_v0 = vmul.f32 %v1778_v10, %v506_v52  ;;  %v543_v51 = vmul.f32 %v542_v57, %v1754_v49  ;;  %v1869_v43 = vld [vmem:[#allocation7 + $0x198] sm:$0xff]  ;;  %776 = vmatpush.msrb.mxu1 %v751_v35  ;;  %v839_v52 = vld [vmem:[#allocation7 + $0x110] sm:$0xff] }
 0x17b   :  { %v569_v16 = vadd.f32 0.0036580483, %v568_v56  ;;  %v580_v24 = vadd.f32 0.014752088, %v579_v5  ;;  %926 = vmatpush.msra.mxu0 %v1840_v11  ;;  %v1852_v18 = vmin.f32 %v604_v15, 16.0  ;;  %865 = vmatpush.msrb.mxu3 %v840_v38  ;;  %v749_v56 = vld [vmem:[#allocation7 + $0x88] sm:$0xff] }
 0x17c   :  { %v511_v17 = vsel %vm1821_vm7, %v1778_v10, %v507_v0  ;;  %v544_v22 = vadd.f32 0.4994258, %v543_v51  ;;  %v532_v10 = vmul.f32 %v531_v14, %v1754_v49  ;;  %777 = vmatpush.msrb.mxu1 %v750_v44  ;;  %v980_v32 = vld [vmem:[#allocation7 + $0x278] sm:$0xff] }
 0x17d   :  { %v1848_v20 = vmul.f32 %v511_v17, %v467_v8  ;;  %v581_v23 = vmul.f32 %v580_v24, %v1790_v21  ;;  %v570_v28 = vmul.f32 %v569_v16, %v1790_v21  ;;  %927 = vmatpush.msra.mxu0 %v1860_v45  ;;  %v606_v46 = vmul.f32 2.1237322e-06, %v1852_v18  ;;  %866 = vmatpush.msrb.mxu3 %v839_v52  ;;  %v1885_v8 = vld [vmem:[#allocation7 + $0x188] sm:$0xff]  ;;  %v837_v16 = vld [vmem:[#allocation7 + $0x100] sm:$0xff] }
 0x17e   :  { %v545_v29 = vmul.f32 %v544_v22, %v1754_v49  ;;  %v533_v50 = vadd.f32 0.18741608, %v532_v10  ;;  %v617_v4 = vmul.f32 3.8918573e-05, %v1852_v18  ;;  %778 = vmatpush.msrb.mxu1 %v749_v56  ;;  %v1890_v17 = vld [vmem:[#allocation7 + $0x180] sm:$0xff] }
 0x17f   :  { %v1855_v25 = vmul.f32 0.70710677, %v1848_v20  ;;  %v582_v40 = vadd.f32 0.112945676, %v581_v23  ;;  %928 = vmatpush.msra.mxu0 %v1865_v34  ;;  %v571_v41 = vadd.f32 0.05243302, %v570_v28  ;;  %867 = vmatpush.msrb.mxu3 %v838_v36 }
 0x180   :  { %v1867_v42 = vadd.f32 1.0, %v545_v29  ;;  %v607_v0 = vadd.f32 0.00028619796, %v606_v46  ;;  %v534_v15 = vmul.f32 %v533_v50, %v1754_v49  ;;  %v618_v51 = vadd.f32 0.001143296, %v617_v4  ;;  %779 = vmatpush.msrb.mxu1 %v748_v9  ;;  %v978_v46 = vld [vmem:[#allocation7 + $0x268] sm:$0xff] }
 0x181   :  { %v644_v33 = vmul.f32 %v1855_v25, %v1855_v25  ;;  %v583_v53 = vmul.f32 %v582_v40, %v1790_v21  ;;  %929 = vmatpush.msra.mxu0 %v1869_v43  ;;  %v572_v14 = vmul.f32 %v571_v41, %v1790_v21  ;;  %868 = vmatpush.msrb.mxu3 %v837_v16 }
 0x182   :  { %1414 = vrcp.f32 %v1867_v42  ;;  %v608_v13 = vmul.f32 %v607_v0, %v1852_v18  ;;  %v619_v28 = vmul.f32 %v618_v51, %v1852_v18  ;;  %v535_v38 = vadd.f32 1.1283791, %v534_v15  ;;  %981 = vmatpush.msra.mxu1 %v980_v32 }
 0x183   :  { %v1872_v47 = vmin.f32 %v644_v33, 16.0  ;;  %v584_v62 = vadd.f32 0.4994258, %v583_v53  ;;  %930 = vmatpush.msra.mxu0 %v1877_v55  ;;  %1380 = vmatpush.msra.mxu3 %v1752_v48  ;;  %v979_v33 = vld [vmem:[#allocation7 + $0x270] sm:$0xff]  ;;  %v573_v35 = vadd.f32 0.18741608, %v572_v14  ;;  %vm552_vm9 = vweird.f32 %v1867_v42 }
 0x184   :  { %v609_v10 = vadd.f32 0.0036580483, %v608_v13  ;;  %v620_v50 = vadd.f32 0.014752088, %v619_v28  ;;  %v556_v41 = vand.u32 2147483647, %v1867_v42  ;;  %982 = vmatpush.msra.mxu1 %v979_v33  ;;  %v536_v0 = vmul.f32 %v535_v38, %v1742_v26 }
 0x185   :  { %v646_v61 = vmul.f32 2.1237322e-06, %v1872_v47  ;;  %v657_v58 = vmul.f32 3.8918573e-05, %v1872_v47  ;;  %v585_v5 = vmul.f32 %v584_v62, %v1790_v21  ;;  %931 = vmatpush.msra.mxu0 %v1885_v8  ;;  %1381 = vmatpush.msra.mxu3 %v1762_v59  ;;  %v558_v48 = vand.u32 2147483648, %v1867_v42 }
 0x186   :  { %v610_v40 = vmul.f32 %v609_v10, %v1852_v18  ;;  %v574_v59 = vmul.f32 %v573_v35, %v1790_v21  ;;  %983 = vmatpush.msra.mxu1 %v978_v46  ;;  %vm557_vm11 = vcmp.eq.f32.partialorder %v556_v41, 8.507059e+37 }
 0x187   :  { %v647_v57 = vadd.f32 0.00028619796, %v646_v61  ;;  %v658_v24 = vadd.f32 0.001143296, %v657_v58  ;;  %v1893_v23 = vadd.f32 1.0, %v585_v5  ;;  %932 = vmatpush.msra.mxu0 %v1890_v17  ;;  %1382 = vmatpush.msra.mxu3 %v1768_v1  ;;  %v621_v61 = vmul.f32 %v620_v50, %v1852_v18 }
 0x188   :  { %v1415_v27 = vpop.eup %1414  ;;  %v611_v36 = vadd.f32 0.05243302, %v610_v40  ;;  %v559_v1 = vor.u32 1.1754944e-38, %v558_v48  ;;  %v575_v15 = vadd.f32 1.1283791, %v574_v59  ;;  %v975_v40 = vld [vmem:[#allocation7 + $0x250] sm:$0xff] }
 0x189   :  { %v648_v22 = vmul.f32 %v647_v57, %v1872_v47  ;;  %v659_v49 = vmul.f32 %v658_v24, %v1872_v47  ;;  %v548_v31 = vmul.f32 %v1415_v27, %v1867_v42  ;;  %1416 = vrcp.f32 %v1893_v23  ;;  %1383 = vmatpush.msra.mxu3 %v1776_v7 }
 0x18a   :  { %vm553_vm8 = vweird.f32 %v1415_v27  ;;  %v622_v57 = vadd.f32 0.112945676, %v621_v61  ;;  %v612_v21 = vmul.f32 %v611_v36, %v1852_v18  ;;  %v598_v24 = vand.u32 2147483648, %v1893_v23  ;;  %v973_v61 = vld [vmem:[#allocation7 + $0x240] sm:$0xff] }
 0x18b   :  { %v649_v29 = vadd.f32 0.0036580483, %v648_v22  ;;  %v549_v44 = vsub.f32 1.0, %v548_v31  ;;  %v660_v52 = vadd.f32 0.014752088, %v659_v49  ;;  %vm554_vm10 = vmor %vm552_vm9, %vm553_vm8  ;;  %1384 = vmatpush.msra.mxu3 %v1787_v19  ;;  %v976_v19 = vld [vmem:[#allocation7 + $0x258] sm:$0xff]  ;;  %vm592_vm13 = vweird.f32 %v1893_v23 }
 0x18c   :  { %v623_v26 = vmul.f32 %v622_v57, %v1852_v18  ;;  %v596_v49 = vand.u32 2147483647, %v1893_v23  ;;  %v613_v32 = vadd.f32 0.18741608, %v612_v21  ;;  %v599_v46 = vor.u32 1.1754944e-38, %v598_v24  ;;  %v968_v24 = vld [vmem:[#allocation7 + $0x218] sm:$0xff] }
 0x18d   :  { %v650_v53 = vmul.f32 %v649_v29, %v1872_v47  ;;  %v550_v56 = vmul.f32 %v1415_v27, %v549_v44  ;;  %v661_v62 = vmul.f32 %v660_v52, %v1872_v47  ;;  %1385 = vmatpush.msra.mxu3 %v1806_v6  ;;  %v977_v29 = vld [vmem:[#allocation7 + $0x260] sm:$0xff]  ;;  %v516_v6 = vmul.f32 0.5, %v1737_v30  ;;  %v974_v30 = vld [vmem:[#allocation7 + $0x248] sm:$0xff] }
 0x18e   :  { %v624_v22 = vadd.f32 0.4994258, %v623_v26  ;;  %984 = vmatpush.msra.mxu1 %v977_v29  ;;  %vm597_vm15 = vcmp.eq.f32.partialorder %v596_v49, 8.507059e+37 }
 0x18f   :  { %v1417_v4 = vpop.eup %1416  ;;  %v551_v58 = vadd.f32 %v1415_v27, %v550_v56  ;;  %v662_v5 = vadd.f32 0.112945676, %v661_v62  ;;  %v651_v9 = vadd.f32 0.05243302, %v650_v53  ;;  %1386 = vmatpush.msra.mxu3 %v1813_v39  ;;  %v576_v39 = vmul.f32 %v575_v15, %v1772_v3  ;;  %v972_v62 = vld [vmem:[#allocation7 + $0x238] sm:$0xff] }
 0x190   :  { %v588_v13 = vmul.f32 %v1417_v4, %v1893_v23  ;;  %vm593_vm12 = vweird.f32 %v1417_v4  ;;  %v625_v33 = vmul.f32 %v624_v22, %v1852_v18  ;;  %985 = vmatpush.msra.mxu1 %v976_v19  ;;  %v614_v56 = vmul.f32 %v613_v32, %v1852_v18  ;;  %v967_v19 = vld [vmem:[#allocation7 + $0x210] sm:$0xff] }
 0x191   :  { %v555_v14 = vsel %vm554_vm10, %v1415_v27, %v551_v58  ;;  %v663_v42 = vmul.f32 %v662_v5, %v1872_v47  ;;  %v652_v27 = vmul.f32 %v651_v9, %v1872_v47  ;;  %vm594_vm14 = vmor %vm592_vm13, %vm593_vm12  ;;  %1387 = vmatpush.msra.mxu3 %v1825_v54  ;;  %v970_v9 = vld [vmem:[#allocation7 + $0x228] sm:$0xff] }
 0x192   :  { %v560_v16 = vsel %vm557_vm11, %v559_v1, %v555_v14  ;;  %v589_v7 = vsub.f32 1.0, %v588_v13  ;;  %v1930_v50 = vadd.f32 1.0, %v625_v33  ;;  %986 = vmatpush.msra.mxu1 %v975_v40  ;;  %v615_v18 = vadd.f32 1.1283791, %v614_v56 }
 0x193   :  { %v561_v51 = vmul.f32 %v560_v16, %v536_v0  ;;  %v664_v10 = vadd.f32 0.4994258, %v663_v42  ;;  %v653_v53 = vadd.f32 0.18741608, %v652_v27  ;;  %1388 = vmatpush.msra.mxu3 %v1834_v2  ;;  %v517_v2 = vmul.f32 0.5, %v1764_v60  ;;  %v969_v42 = vld [vmem:[#allocation7 + $0x220] sm:$0xff] }
 0x194   :  { %v590_v28 = vmul.f32 %v1417_v4, %v589_v7  ;;  %1418 = vrcp.f32 %v1930_v50  ;;  %987 = vmatpush.msra.mxu1 %v974_v30  ;;  %v616_v60 = vmul.f32 %v615_v18, %v1831_v63  ;;  %vm632_vm6 = vweird.f32 %v1930_v50 }
 0x195   :  { %v1368_v31 = vclamps-f32 %v561_v51, 1.0  ;;  %v665_v35 = vmul.f32 %v664_v10, %v1872_v47  ;;  %1389 = vmatpush.msra.mxu3 %v1840_v11  ;;  %v654_v59 = vmul.f32 %v653_v53, %v1872_v47  ;;  %v636_v21 = vand.u32 2147483647, %v1930_v50  ;;  %v965_v53 = vld [vmem:[#allocation7 + $0x200] sm:$0xff] }
 0x196   :  { %v591_v38 = vadd.f32 %v1417_v4, %v590_v28  ;;  %988 = vmatpush.msra.mxu1 %v973_v61  ;;  %v638_v26 = vand.u32 2147483648, %v1930_v50 }
 0x197   :  { %v684_v44 = vadd.f32 1.0, %v1368_v31  ;;  %v1932_v52 = vadd.f32 1.0, %v665_v35  ;;  %1390 = vmatpush.msra.mxu3 %v1860_v45  ;;  %v655_v1 = vadd.f32 1.1283791, %v654_v59  ;;  %vm637_vm11 = vcmp.eq.f32.partialorder %v636_v21, 8.507059e+37 }
 0x198   :  { %v595_v41 = vsel %vm594_vm14, %v1417_v4, %v591_v38  ;;  %v971_v4 = vld [vmem:[#allocation7 + $0x230] sm:$0xff]  ;;  %989 = vmatpush.msra.mxu1 %v972_v62  ;;  %v639_v33 = vor.u32 1.1754944e-38, %v638_v26  ;;  %v966_v38 = vld [vmem:[#allocation7 + $0x208] sm:$0xff] }
 0x199   :  { %v1936_v48 = vmul.f32 %v684_v44, %v516_v6  ;;  %v600_v23 = vsel %vm597_vm15, %v599_v46, %v595_v41  ;;  %1420 = vrcp.f32 %v1932_v52  ;;  %1391 = vmatpush.msra.mxu3 %v1865_v34  ;;  %vm672_vm7 = vweird.f32 %v1932_v52 }
 0x19a   :  { %v601_v36 = vmul.f32 %v600_v23, %v576_v39  ;;  %v1419_v58 = vpop.eup %1418  ;;  %990 = vmatpush.msra.mxu1 %v971_v4  ;;  %v678_v63 = vand.u32 2147483648, %v1932_v52  ;;  %v676_v29 = vand.u32 2147483647, %v1932_v52  ;;  %v656_v46 = vmul.f32 %v655_v1, %v1855_v25 }
 0x19b   :  { %v697_v54 = vrot.slane %v1936_v48, 6  ;;  %v628_v47 = vmul.f32 %v1419_v58, %v1930_v50  ;;  %1392 = vmatpush.msra.mxu3 %v1869_v43  ;;  %vm633_vm8 = vweird.f32 %v1419_v58 }
 0x19c   :  { %v1369_v3 = vclamps-f32 %v601_v36, 1.0  ;;  %991 = vmatpush.msra.mxu1 %v970_v9  ;;  %vm634_vm10 = vmor %vm632_vm6, %vm633_vm8  ;;  %v679_v44 = vor.u32 1.1754944e-38, %v678_v63  ;;  %vm677_vm13 = vcmp.eq.f32.partialorder %v676_v29, 8.507059e+37  ;;  %v518_v36 = vmul.f32 0.5, %v1811_v37 }
 0x19d   :  { %1373 = vmatmul.msk.f32.vlgmr.msrb.gmra.mxu2 %vm1651_vm3, %v697_v54  ;;  %v1954_v5 = vsel %vm99_vm0, 0.0, %v697_v54  ;;  %v629_v14 = vsub.f32 1.0, %v628_v47  ;;  %1393 = vmatpush.msra.mxu3 %v1877_v55 }
 0x19e   :  { %v685_v0 = vadd.f32 1.0, %v1369_v3  ;;  %v733_v34 = vrot.slane %v1954_v5, 1  ;;  %v822_v7 = vrot.slane %v1954_v5, 2  ;;  %v886_v10 = vrot.slane %v1954_v5, 3  ;;  %992 = vmatpush.msra.mxu1 %v969_v42 }
 0x19f   :  { %v1949_v57 = vpop.eup %1420  ;;  %v630_v51 = vmul.f32 %v1419_v58, %v629_v14  ;;  %1394 = vmatpush.msra.mxu3 %v1885_v8  ;;  %v950_v42 = vrot.slane %v1954_v5, 4 }
 0x1a0   :  { %v1951_v11 = vmul.f32 %v685_v0, %v517_v2  ;;  %v668_v45 = vmul.f32 %v1949_v57, %v1932_v52  ;;  %vm673_vm9 = vweird.f32 %v1949_v57  ;;  %993 = vmatpush.msra.mxu1 %v968_v24 }
 0x1a1   :  { %v631_v28 = vadd.f32 %v1419_v58, %v630_v51  ;;  %vm674_vm12 = vmor %vm672_vm7, %vm673_vm9  ;;  %1395 = vmatpush.msra.mxu3 %v1890_v17  ;;  %v519_v17 = vmul.f32 0.5, %v1848_v20 }
 0x1a2   :  { %v698_v13 = vrot.slane %v1951_v11, 6  ;;  %v669_v15 = vsub.f32 1.0, %v668_v45  ;;  %994 = vmatpush.msra.mxu1 %v967_v19 }
 0x1a3   :  { %v635_v35 = vsel %vm634_vm10, %v1419_v58, %v631_v28 }
 0x1a4   :  { %v1970_v16 = vsel %vm99_vm0, %v697_v54, %v698_v13  ;;  %v670_v49 = vmul.f32 %v1949_v57, %v669_v15  ;;  %v1992_v8 = vsel %vm99_vm0, %v698_v13, 0.0  ;;  %v640_v40 = vsel %vm637_vm11, %v639_v33, %v635_v35  ;;  %995 = vmatpush.msra.mxu1 %v966_v38 }
 0x1a5   :  { %812 = vmatmul.f32.gmra.mxu2 %v1970_v16  ;;  %v734_v43 = vrot.slane %v1970_v16, 1  ;;  %v823_v22 = vrot.slane %v1970_v16, 2  ;;  %v887_v27 = vrot.slane %v1970_v16, 3  ;;  %v641_v50 = vmul.f32 %v640_v40, %v616_v60 }
 0x1a6   :  { %v671_v6 = vadd.f32 %v1949_v57, %v670_v49  ;;  %v736_v41 = vrot.slane %v1992_v8, 1  ;;  %v825_v30 = vrot.slane %v1992_v8, 2  ;;  %996 = vmatpush.msra.mxu1 %v965_v53  ;;  %v889_v21 = vrot.slane %v1992_v8, 3 }
 0x1a7   :  { %v735_v55 = vsel %vm136_vm1, %v733_v34, %v734_v43  ;;  %v824_v31 = vsel %vm226_vm2, %v822_v7, %v823_v22  ;;  %v888_v32 = vsel %vm291_vm4, %v886_v10, %v887_v27  ;;  %v1370_v56 = vclamps-f32 %v641_v50, 1.0 }
 0x1a8   :  { %780 = vmatmul.f32.vlgmr.msrb.gmra.mxu1 %v735_v55  ;;  %869 = vmatmul.f32.vlgmr.msrb.gmra.mxu3 %v824_v31  ;;  %v675_v39 = vsel %vm674_vm12, %v1949_v57, %v671_v6  ;;  %v737_v3 = vsel %vm136_vm1, %v734_v43, %v736_v41  ;;  %v826_v61 = vsel %vm226_vm2, %v823_v22, %v825_v30  ;;  %v951_v26 = vrot.slane %v1970_v16, 4 }
 0x1a9   :  { %933 = vmatmul.f32.vlgmr.msra.gmra.mxu0 %v888_v32  ;;  %v680_v23 = vsel %vm677_vm13, %v679_v44, %v675_v39  ;;  %v686_v54 = vadd.f32 1.0, %v1370_v56  ;;  %v890_v34 = vsel %vm291_vm4, %v887_v27, %v889_v21  ;;  %v953_v7 = vrot.slane %v1992_v8, 4  ;;  %v1404_v39 = vld [vmem:[%s2194_s4] ss:$0 sm:$0xff] }
 0x1aa   :  { %v681_v52 = vmul.f32 %v680_v23, %v656_v46  ;;  %v952_v15 = vsel %vm356_vm5, %v950_v42, %v951_v26 }
 0x1ab   :  { %v2008_v62 = vmul.f32 %v686_v54, %v518_v36  ;;  %v954_v43 = vsel %vm356_vm5, %v951_v26, %v953_v7 }
 0x1ac   :  { %v1371_v25 = vclamps-f32 %v681_v52, 1.0 }
 0x1ad   :  { %v700_v18 = vrot.slane %v2008_v62, 6 }
 0x1ae   :  { %v687_v59 = vadd.f32 1.0, %v1371_v25 }
 0x1af   :  { %v710_v0 = vsel %vm99_vm0, 0.0, %v700_v18  ;;  %1375 = vmatmul.msk.f32.gmra.mxu2 %vm1651_vm3, %v700_v18 }
 0x1b0   :  { %783 = vmatmul.f32.gmra.mxu1 %v737_v3  ;;  %872 = vmatmul.f32.gmra.mxu3 %v826_v61  ;;  %v2011_v2 = vmul.f32 %v687_v59, %v519_v17  ;;  %v738_v58 = vrot.slane %v710_v0, 1  ;;  %v827_v57 = vrot.slane %v710_v0, 2  ;;  %v891_v51 = vrot.slane %v710_v0, 3 }
 0x1b1   :  { %v955_v10 = vrot.slane %v710_v0, 4 }
 0x1b2   :  { %v701_v37 = vrot.slane %v2011_v2, 6 }
 0x1b4   :  { %v702_v4 = vsel %vm99_vm0, %v700_v18, %v701_v37  ;;  %v712_v60 = vsel %vm99_vm0, %v701_v37, 0.0 }
 0x1b5   :  { %v739_v20 = vrot.slane %v702_v4, 1  ;;  %v828_v47 = vrot.slane %v702_v4, 2  ;;  %v741_v45 = vrot.slane %v712_v60, 1  ;;  %v830_v12 = vrot.slane %v712_v60, 2 }
 0x1b6   :  { %v892_v63 = vrot.slane %v702_v4, 3  ;;  %v894_v22 = vrot.slane %v712_v60, 3  ;;  %v956_v5 = vrot.slane %v702_v4, 4  ;;  %v958_v28 = vrot.slane %v712_v60, 4 }
 0x1b7   :  { %v740_v9 = vsel %vm136_vm1, %v738_v58, %v739_v20  ;;  %v829_v1 = vsel %vm226_vm2, %v827_v57, %v828_v47  ;;  %818 = vmatmul.f32.gmra.mxu2 %v702_v4  ;;  %v742_v13 = vsel %vm136_vm1, %v739_v20, %v741_v45  ;;  %v831_v14 = vsel %vm226_vm2, %v828_v47, %v830_v12 }
 0x1b8   :  { %786 = vmatmul.f32.gmra.mxu1 %v740_v9  ;;  %875 = vmatmul.f32.gmra.mxu3 %v829_v1  ;;  %v893_v24 = vsel %vm291_vm4, %v891_v51, %v892_v63  ;;  %v895_v16 = vsel %vm291_vm4, %v892_v63, %v894_v22  ;;  %v957_v27 = vsel %vm356_vm5, %v955_v10, %v956_v5 }
 0x1b9   :  { %v959_v49 = vsel %vm356_vm5, %v956_v5, %v958_v28 }
 0x1c0   :  { %789 = vmatmul.f32.gmra.mxu1 %v742_v13  ;;  %878 = vmatmul.f32.gmra.mxu3 %v831_v14 }
 0x1c8   :  { %936 = vmatmul.f32.vlgmr.msra.gmra.mxu3 %v890_v34  ;;  %997 = vmatmul.f32.vlgmr.msra.gmra.mxu1 %v952_v15 }
 0x1d0   :  { %939 = vmatmul.f32.gmra.mxu3 %v893_v24  ;;  %1000 = vmatmul.f32.gmra.mxu1 %v954_v43 }
 0x1d8   :  { %942 = vmatmul.f32.gmra.mxu3 %v895_v16  ;;  %1003 = vmatmul.f32.gmra.mxu1 %v957_v27 }
 0x1e0   :  { %1006 = vmatmul.f32.gmra.mxu1 %v959_v49 }
 0x220   :  { %v810_v33 = vpop.f32.mrf.mxu2 }
 0x225   :  { %v781_v29 = vpop.f32.mrf.mxu1 }
 0x226   :  { %v811_v6 = vadd.f32 %v810_v33, %v781_v29  ;;  %v934_v40 = vpop.f32.mrf.mxu0 }
 0x228   :  { %v813_v44 = vpop.f32.mrf.mxu2 }
 0x22b   :  { %v870_v19 = vpop.f32.mrf.mxu3 }
 0x22c   :  { %v882_v38 = vadd.f32 %v870_v19, %v811_v6 }
 0x22d   :  { %v784_v55 = vpop.f32.mrf.mxu1 }
 0x22e   :  { %v946_v50 = vadd.f32 %v934_v40, %v882_v38  ;;  %v814_v30 = vadd.f32 %v813_v44, %v784_v55  ;;  %v1305_v55 = vld [vmem:[#allocation8 + $0x78] sm:$0xff]  ;;  %v1302_v44 = vld [vmem:[#allocation8 + $0x60] sm:$0xff] }
 0x22f   :  { %1309 = vmatpush.msra.mxu2 %v1305_v55 }
 0x232   :  { %v816_v25 = vpop.f32.mrf.mxu2 }
 0x233   :  { %v873_v31 = vpop.f32.mrf.mxu3 }
 0x234   :  { %v883_v56 = vadd.f32 %v873_v31, %v814_v30  ;;  %v1304_v31 = vld [vmem:[#allocation8 + $0x70] sm:$0xff] }
 0x235   :  { %v787_v32 = vpop.f32.mrf.mxu1  ;;  %1310 = vmatpush.msra.mxu2 %v1304_v31 }
 0x236   :  { %v817_v17 = vadd.f32 %v816_v25, %v787_v32 }
 0x23a   :  { %v819_v57 = vpop.f32.mrf.mxu2 }
 0x23b   :  { %v876_v35 = vpop.f32.mrf.mxu3 }
 0x23c   :  { %v884_v18 = vadd.f32 %v876_v35, %v817_v17 }
 0x23d   :  { %v790_v8 = vpop.f32.mrf.mxu1 }
 0x23e   :  { %v820_v47 = vadd.f32 %v819_v57, %v790_v8  ;;  %v1303_v8 = vld [vmem:[#allocation8 + $0x68] sm:$0xff] }
 0x23f   :  { %1311 = vmatpush.msra.mxu2 %v1303_v8 }
 0x241   :  { %1312 = vmatpush.msra.mxu2 %v1302_v44  ;;  %v1291_v44 = vld [vmem:[#allocation8 + $0x8] sm:$0xff] }
 0x243   :  { %v879_v46 = vpop.f32.mrf.mxu3 }
 0x244   :  { %v885_v1 = vadd.f32 %v879_v46, %v820_v47 }
 0x245   :  { %v998_v53 = vpop.f32.mrf.mxu1 }
 0x246   :  { %v1010_v41 = vadd.f32 %v998_v53, %v946_v50 }
 0x248   :  { %v2039_v23 = vadd.f32 %v1404_v39, %v1010_v41 }
 0x24a   :  { %1021 = vadd.xlane.f32.xlu2 %v2039_v23  ;;  %v1033_v52 = vmul.f32 %v2039_v23, %v2039_v23 }
 0x24b   :  { %v937_v36 = vpop.f32.mrf.mxu3 }
 0x24c   :  { %v947_v54 = vadd.f32 %v937_v36, %v883_v56  ;;  %1037 = vadd.xlane.f32.xlu0 %v1033_v52  ;;  %v1300_v36 = vld [vmem:[#allocation8 + $0x50] sm:$0xff] }
 0x24d   :  { %v1001_v3 = vpop.f32.mrf.mxu1 }
 0x24e   :  { %v1011_v61 = vadd.f32 %v1001_v3, %v947_v54 }
 0x250   :  { %v2044_v59 = vadd.f32 %v1404_v39, %v1011_v61 }
 0x252   :  { %1023 = vadd.xlane.f32.xlu1 %v2044_v59  ;;  %v1034_v0 = vmul.f32 %v2044_v59, %v2044_v59 }
 0x253   :  { %v940_v37 = vpop.f32.mrf.mxu3 }
 0x254   :  { %v948_v4 = vadd.f32 %v940_v37, %v884_v18  ;;  %1039 = vadd.xlane.f32.xlu2 %v1034_v0  ;;  %v1299_v18 = vld [vmem:[#allocation8 + $0x48] sm:$0xff] }
 0x255   :  { %v1004_v58 = vpop.f32.mrf.mxu1 }
 0x256   :  { %v1012_v20 = vadd.f32 %v1004_v58, %v948_v4 }
 0x258   :  { %v2049_v9 = vadd.f32 %v1404_v39, %v1012_v20  ;;  %v1298_v20 = vld [vmem:[#allocation8 + $0x40] sm:$0xff] }
 0x25a   :  { %1025 = vadd.xlane.f32.xlu0 %v2049_v9  ;;  %v1035_v60 = vmul.f32 %v2049_v9, %v2049_v9 }
 0x25b   :  { %v943_v45 = vpop.f32.mrf.mxu3 }
 0x25c   :  { %v949_v12 = vadd.f32 %v943_v45, %v885_v1  ;;  %1041 = vadd.xlane.f32.xlu1 %v1035_v60  ;;  %v1297_v1 = vld [vmem:[#allocation8 + $0x38] sm:$0xff] }
 0x25d   :  { %v1007_v13 = vpop.f32.mrf.mxu1 }
 0x25e   :  { %v1013_v14 = vadd.f32 %v1007_v13, %v949_v12 }
 0x260   :  { %v2054_v21 = vadd.f32 %v1404_v39, %v1013_v14  ;;  %v1301_v39 = vld [vmem:[#allocation8 + $0x58] sm:$0xff] }
 0x261   :  { %1313 = vmatpush.msra.mxu2 %v1301_v39 }
 0x262   :  { %1027 = vadd.xlane.f32.xlu2 %v2054_v21  ;;  %v1036_v26 = vmul.f32 %v2054_v21, %v2054_v21 }
 0x263   :  { %1314 = vmatpush.msra.mxu2 %v1300_v36 }
 0x264   :  { %1043 = vadd.xlane.f32.xlu0 %v1036_v26  ;;  %v1296_v26 = vld [vmem:[#allocation8 + $0x30] sm:$0xff] }
 0x265   :  { %1315 = vmatpush.msra.mxu2 %v1299_v18 }
 0x267   :  { %1316 = vmatpush.msra.mxu2 %v1298_v20 }
 0x269   :  { %1317 = vmatpush.msra.mxu2 %v1297_v1 }
 0x26b   :  { %1318 = vmatpush.msra.mxu2 %v1296_v26 }
 0x2bd   :  { %v1022_v42 = vpop.xlane.xlu2 %1021 }
 0x2be   :  { %v1029_v34 = vmul.f32 0.03125, %v1022_v42 }
 0x2bf   :  { %v1038_v15 = vpop.xlane.xlu0 %1037 }
 0x2c0   :  { %v1049_v63 = vmul.f32 %v1029_v34, %v1029_v34  ;;  %v1045_v7 = vmul.f32 0.03125, %v1038_v15  ;;  %v1057_v54 = vsub.f32 %v2039_v23, %v1029_v34 }
 0x2c2   :  { %v1053_v51 = vsub.f32 %v1045_v7, %v1049_v63  ;;  %v1295_v63 = vld [vmem:[#allocation8 + $0x28] sm:$0xff] }
 0x2c3   :  { %1319 = vmatpush.msra.mxu2 %v1295_v63 }
 0x2c4   :  { %v1061_v24 = vadd.f32 1e-05, %v1053_v51 }
 0x2c5   :  { %v1024_v43 = vpop.xlane.xlu1 %1023 }
 0x2c6   :  { %1422 = vrsqrt.f32 %v1061_v24  ;;  %v2059_v22 = vmul.f32 0.03125, %v1024_v43  ;;  %vm1071_vm1 = vweird.f32 %v1061_v24 }
 0x2c7   :  { %v1040_v5 = vpop.xlane.xlu2 %1039 }
 0x2c8   :  { %v1050_v10 = vmul.f32 %v2059_v22, %v2059_v22  ;;  %v1046_v16 = vmul.f32 0.03125, %v1040_v5  ;;  %v1058_v34 = vsub.f32 %v2044_v59, %v2059_v22  ;;  %v1293_v22 = vld [vmem:[#allocation8 + $0x18] sm:$0xff] }
 0x2ca   :  { %v1054_v27 = vsub.f32 %v1046_v16, %v1050_v10  ;;  %v1294_v10 = vld [vmem:[#allocation8 + $0x20] sm:$0xff] }
 0x2cb   :  { %1320 = vmatpush.msra.mxu2 %v1294_v10 }
 0x2cc   :  { %v1423_v28 = vpop.eup %1422  ;;  %v1062_v49 = vadd.f32 1e-05, %v1054_v27 }
 0x2cd   :  { %v1066_v29 = vmul.f32 %v1423_v28, %v1061_v24  ;;  %v1026_v19 = vpop.xlane.xlu0 %1025  ;;  %vm1072_vm0 = vweird.f32 %v1423_v28  ;;  %1321 = vmatpush.msra.mxu2 %v1293_v22 }
 0x2ce   :  { %1424 = vrsqrt.f32 %v1062_v49  ;;  %v2063_v32 = vmul.f32 0.03125, %v1026_v19  ;;  %vm1073_vm2 = vmor %vm1071_vm1, %vm1072_vm0  ;;  %vm1081_vm4 = vweird.f32 %v1062_v49 }
 0x2cf   :  { %v1067_v33 = vmul.f32 %v1423_v28, %v1066_v29  ;;  %v1042_v35 = vpop.xlane.xlu1 %1041 }
 0x2d0   :  { %v1051_v6 = vmul.f32 %v2063_v32, %v2063_v32  ;;  %v1047_v38 = vmul.f32 0.03125, %v1042_v35  ;;  %v1059_v8 = vsub.f32 %v2049_v9, %v2063_v32 }
 0x2d1   :  { %v1068_v40 = vmul.f32 0.5, %v1067_v33  ;;  %v1292_v33 = vld [vmem:[#allocation8 + $0x10] sm:$0xff] }
 0x2d2   :  { %v1055_v46 = vsub.f32 %v1047_v38, %v1051_v6  ;;  %1322 = vmatpush.msra.mxu2 %v1292_v33 }
 0x2d3   :  { %v1069_v50 = vsub.f32 1.5, %v1068_v40 }
 0x2d4   :  { %v1425_v53 = vpop.eup %1424  ;;  %v2067_v41 = vadd.f32 1e-05, %v1055_v46  ;;  %1323 = vmatpush.msra.mxu2 %v1291_v44 }
 0x2d5   :  { %v1070_v30 = vmul.f32 %v1423_v28, %v1069_v50  ;;  %v1076_v56 = vmul.f32 %v1425_v53, %v1062_v49  ;;  %v1028_v52 = vpop.xlane.xlu2 %1027  ;;  %vm1082_vm3 = vweird.f32 %v1425_v53 }
 0x2d6   :  { %1426 = vrsqrt.f32 %v2067_v41  ;;  %v2071_v25 = vmul.f32 0.03125, %v1028_v52  ;;  %vm1083_vm5 = vmor %vm1081_vm4, %vm1082_vm3  ;;  %vm1091_vm15 = vweird.f32 %v2067_v41 }
 0x2d7   :  { %v1074_v3 = vsel %vm1073_vm2, %v1423_v28, %v1070_v30  ;;  %v1077_v61 = vmul.f32 %v1425_v53, %v1076_v56  ;;  %v1044_v17 = vpop.xlane.xlu0 %1043  ;;  %v1290_v30 = vld [vmem:[#allocation8] sm:$0xff] }
 0x2d8   :  { %v2073_v0 = vmul.f32 %v1074_v3, %v1057_v54  ;;  %v1052_v37 = vmul.f32 %v2071_v25, %v2071_v25  ;;  %v1048_v4 = vmul.f32 0.03125, %v1044_v17  ;;  %1324 = vmatpush.msra.mxu2 %v1290_v30 }
 0x2d9   :  { %v1078_v58 = vmul.f32 0.5, %v1077_v61 }
 0x2da   :  { %v2078_v23 = vmul.f32 0.70710677, %v2073_v0  ;;  %v1056_v57 = vsub.f32 %v1048_v4, %v1052_v37 }
 0x2db   :  { %v1079_v47 = vsub.f32 1.5, %v1078_v58 }
 0x2dc   :  { %v1427_v60 = vpop.eup %1426  ;;  %v1117_v45 = vmul.f32 %v2078_v23, %v2078_v23  ;;  %v2082_v12 = vadd.f32 1e-05, %v1056_v57 }
 0x2dd   :  { %v1080_v13 = vmul.f32 %v1425_v53, %v1079_v47  ;;  %v1086_v14 = vmul.f32 %v1427_v60, %v2067_v41  ;;  %vm1092_vm14 = vweird.f32 %v1427_v60 }
 0x2de   :  { %v2085_v42 = vmin.f32 %v1117_v45, 16.0  ;;  %1428 = vrsqrt.f32 %v2082_v12  ;;  %vm1093_vm6 = vmor %vm1091_vm15, %vm1092_vm14  ;;  %vm1101_vm8 = vweird.f32 %v2082_v12 }
 0x2df   :  { %v1087_v15 = vmul.f32 %v1427_v60, %v1086_v14  ;;  %v1084_v7 = vsel %vm1083_vm5, %v1425_v53, %v1080_v13 }
 0x2e0   :  { %v1119_v51 = vmul.f32 2.1237322e-06, %v2085_v42  ;;  %v1130_v24 = vmul.f32 3.8918573e-05, %v2085_v42  ;;  %v2092_v43 = vmul.f32 %v1084_v7, %v1058_v34 }
 0x2e1   :  { %v1088_v5 = vmul.f32 0.5, %v1087_v15 }
 0x2e2   :  { %v1120_v16 = vadd.f32 0.00028619796, %v1119_v51  ;;  %v1131_v27 = vadd.f32 0.001143296, %v1130_v24  ;;  %v2095_v28 = vmul.f32 0.70710677, %v2092_v43 }
 0x2e3   :  { %v1089_v59 = vsub.f32 1.5, %v1088_v5 }
 0x2e4   :  { %v1429_v49 = vpop.eup %1428  ;;  %v1121_v29 = vmul.f32 %v1120_v16, %v2085_v42  ;;  %v1132_v19 = vmul.f32 %v1131_v27, %v2085_v42  ;;  %v1157_v35 = vmul.f32 %v2095_v28, %v2095_v28 }
 0x2e5   :  { %v1090_v55 = vmul.f32 %v1427_v60, %v1089_v59  ;;  %v1096_v31 = vmul.f32 %v1429_v49, %v2082_v12  ;;  %vm1102_vm7 = vweird.f32 %v1429_v49 }
 0x2e6   :  { %v1122_v6 = vadd.f32 0.0036580483, %v1121_v29  ;;  %v1133_v38 = vadd.f32 0.014752088, %v1132_v19  ;;  %v2105_v46 = vmin.f32 %v1157_v35, 16.0  ;;  %vm1103_vm9 = vmor %vm1101_vm8, %vm1102_vm7 }
 0x2e7   :  { %v1097_v40 = vmul.f32 %v1429_v49, %v1096_v31  ;;  %v1094_v50 = vsel %vm1093_vm6, %v1427_v60, %v1090_v55  ;;  %v1060_v60 = vsub.f32 %v2054_v21, %v2071_v25 }
 0x2e8   :  { %v1134_v39 = vmul.f32 %v1133_v38, %v2085_v42  ;;  %v2108_v53 = vmul.f32 %v1094_v50, %v1059_v8  ;;  %v1123_v56 = vmul.f32 %v1122_v6, %v2085_v42  ;;  %v1159_v9 = vmul.f32 2.1237322e-06, %v2105_v46 }
 0x2e9   :  { %v1098_v41 = vmul.f32 0.5, %v1097_v40  ;;  %v1170_v32 = vmul.f32 3.8918573e-05, %v2105_v46 }
 0x2ea   :  { %v1135_v52 = vadd.f32 0.112945676, %v1134_v39  ;;  %v1160_v54 = vadd.f32 0.00028619796, %v1159_v9  ;;  %v2116_v17 = vmul.f32 0.70710677, %v2108_v53 }
 0x2eb   :  { %v1099_v36 = vsub.f32 1.5, %v1098_v41  ;;  %v1171_v3 = vadd.f32 0.001143296, %v1170_v32  ;;  %v1124_v37 = vadd.f32 0.05243302, %v1123_v56 }
 0x2ec   :  { %v1136_v61 = vmul.f32 %v1135_v52, %v2085_v42  ;;  %v1161_v4 = vmul.f32 %v1160_v54, %v2105_v46  ;;  %v1197_v57 = vmul.f32 %v2116_v17, %v2116_v17 }
 0x2ed   :  { %v1100_v18 = vmul.f32 %v1429_v49, %v1099_v36  ;;  %v1172_v58 = vmul.f32 %v1171_v3, %v2105_v46  ;;  %v1125_v14 = vmul.f32 %v1124_v37, %v2085_v42 }
 0x2ee   :  { %v1137_v20 = vadd.f32 0.4994258, %v1136_v61  ;;  %v1162_v12 = vadd.f32 0.0036580483, %v1161_v4  ;;  %v2125_v13 = vmin.f32 %v1197_v57, 16.0 }
 0x2ef   :  { %v1173_v47 = vadd.f32 0.014752088, %v1172_v58  ;;  %v1104_v1 = vsel %vm1103_vm9, %v1429_v49, %v1100_v18  ;;  %v1126_v25 = vadd.f32 0.18741608, %v1125_v14 }
 0x2f0   :  { %v1138_v45 = vmul.f32 %v1137_v20, %v2085_v42  ;;  %v1199_v15 = vmul.f32 2.1237322e-06, %v2125_v13  ;;  %v2130_v63 = vmul.f32 %v1104_v1, %v1060_v60  ;;  %v1210_v51 = vmul.f32 3.8918573e-05, %v2125_v13 }
 0x2f1   :  { %v1174_v26 = vmul.f32 %v1173_v47, %v2105_v46  ;;  %v1163_v21 = vmul.f32 %v1162_v12, %v2105_v46  ;;  %v1127_v19 = vmul.f32 %v1126_v25, %v2085_v42 }
 0x2f2   :  { %v1139_v34 = vadd.f32 1.0, %v1138_v45  ;;  %v1200_v5 = vadd.f32 0.00028619796, %v1199_v15  ;;  %v1211_v10 = vadd.f32 0.001143296, %v1210_v51 }
 0x2f3   :  { %v1175_v7 = vadd.f32 0.112945676, %v1174_v26  ;;  %v2136_v16 = vmul.f32 0.70710677, %v2130_v63  ;;  %v1164_v22 = vadd.f32 0.05243302, %v1163_v21 }
 0x2f4   :  { %1430 = vrcp.f32 %v1139_v34  ;;  %v1201_v59 = vmul.f32 %v1200_v5, %v2125_v13  ;;  %v1212_v49 = vmul.f32 %v1211_v10, %v2125_v13  ;;  %v1128_v41 = vadd.f32 1.1283791, %v1127_v19 }
 0x2f5   :  { %v1176_v24 = vmul.f32 %v1175_v7, %v2105_v46  ;;  %v1237_v29 = vmul.f32 %v2136_v16, %v2136_v16  ;;  %v1165_v40 = vmul.f32 %v1164_v22, %v2105_v46  ;;  %v1149_v42 = vand.u32 2147483647, %v1139_v34 }
 0x2f6   :  { %v1202_v33 = vadd.f32 0.0036580483, %v1201_v59  ;;  %v1213_v35 = vadd.f32 0.014752088, %v1212_v49  ;;  %v1151_v56 = vand.u32 2147483648, %v1139_v34  ;;  %vm1145_vm11 = vweird.f32 %v1139_v34 }
 0x2f7   :  { %v1177_v27 = vadd.f32 0.4994258, %v1176_v24  ;;  %v2144_v8 = vmin.f32 %v1237_v29, 16.0  ;;  %v1166_v3 = vadd.f32 0.18741608, %v1165_v40  ;;  %v1129_v58 = vmul.f32 %v1128_v41, %v2078_v23 }
 0x2f8   :  { %v1214_v44 = vmul.f32 %v1213_v35, %v2125_v13  ;;  %v1203_v9 = vmul.f32 %v1202_v33, %v2125_v13  ;;  %vm1150_vm13 = vcmp.eq.f32.partialorder %v1149_v42, 8.507059e+37  ;;  %v1152_v20 = vor.u32 1.1754944e-38, %v1151_v56 }
 0x2f9   :  { %v1178_v55 = vmul.f32 %v1177_v27, %v2105_v46  ;;  %v1239_v50 = vmul.f32 2.1237322e-06, %v2144_v8  ;;  %v1250_v39 = vmul.f32 3.8918573e-05, %v2144_v8  ;;  %v1167_v14 = vmul.f32 %v1166_v3, %v2105_v46 }
 0x2fa   :  { %v1431_v31 = vpop.eup %1430  ;;  %v1215_v52 = vadd.f32 0.112945676, %v1214_v44  ;;  %v1204_v1 = vadd.f32 0.05243302, %v1203_v9  ;;  %v1109_v46 = vmul.f32 0.5, %v2073_v0 }
 0x2fb   :  { %v1141_v6 = vmul.f32 %v1431_v31, %v1139_v34  ;;  %v1179_v38 = vadd.f32 1.0, %v1178_v55  ;;  %vm1146_vm10 = vweird.f32 %v1431_v31  ;;  %v1240_v36 = vadd.f32 0.00028619796, %v1239_v50 }
 0x2fc   :  { %v1251_v54 = vadd.f32 0.001143296, %v1250_v39  ;;  %v1216_v18 = vmul.f32 %v1215_v52, %v2125_v13  ;;  %vm1147_vm12 = vmor %vm1145_vm11, %vm1146_vm10  ;;  %v1205_v24 = vmul.f32 %v1204_v1, %v2125_v13  ;;  %v1168_v27 = vadd.f32 1.1283791, %v1167_v14 }
 0x2fd   :  { %v1142_v30 = vsub.f32 1.0, %v1141_v6  ;;  %1432 = vrcp.f32 %v1179_v38  ;;  %v1241_v37 = vmul.f32 %v1240_v36, %v2144_v8  ;;  %v1191_v21 = vand.u32 2147483648, %v1179_v38 }
 0x2fe   :  { %v1252_v4 = vmul.f32 %v1251_v54, %v2144_v8  ;;  %v1217_v60 = vadd.f32 0.4994258, %v1216_v18  ;;  %v1189_v22 = vand.u32 2147483647, %v1179_v38  ;;  %vm1185_vm1 = vweird.f32 %v1179_v38 }
 0x2ff   :  { %v1143_v32 = vmul.f32 %v1431_v31, %v1142_v30  ;;  %v1242_v7 = vadd.f32 0.0036580483, %v1241_v37  ;;  %v1192_v33 = vor.u32 1.1754944e-38, %v1191_v21  ;;  %v1206_v35 = vadd.f32 0.18741608, %v1205_v24 }
 0x300   :  { %v1253_v45 = vadd.f32 0.014752088, %v1252_v4  ;;  %v1218_v15 = vmul.f32 %v1217_v60, %v2125_v13  ;;  %v1169_v6 = vmul.f32 %v1168_v27, %v2095_v28  ;;  %vm1190_vm3 = vcmp.eq.f32.partialorder %v1189_v22, 8.507059e+37 }
 0x301   :  { %v1144_v61 = vadd.f32 %v1431_v31, %v1143_v32  ;;  %v1243_v29 = vmul.f32 %v1242_v7, %v2144_v8  ;;  %v1110_v28 = vmul.f32 0.5, %v2092_v43  ;;  %vm1338_vm10 = vcmask 130048  }
 0x302   :  { %v1254_v51 = vmul.f32 %v1253_v45, %v2144_v8  ;;  %v1219_v5 = vadd.f32 1.0, %v1218_v15 }
 0x303   :  { %v1433_v57 = vpop.eup %1432  ;;  %v1148_v47 = vsel %vm1147_vm12, %v1431_v31, %v1144_v61  ;;  %v1244_v39 = vadd.f32 0.05243302, %v1243_v29  ;;  %v1405_v29 = vld [vmem:[%s2196_s6] ss:$0 sm:$0xff] }
 0x304   :  { %v1153_v12 = vsel %vm1150_vm13, %v1152_v20, %v1148_v47  ;;  %v1181_v26 = vmul.f32 %v1433_v57, %v1179_v38  ;;  %v1255_v10 = vadd.f32 0.112945676, %v1254_v51  ;;  %vm1186_vm0 = vweird.f32 %v1433_v57 }
 0x305   :  { %v1154_v34 = vmul.f32 %v1153_v12, %v1129_v58  ;;  %1434 = vrcp.f32 %v1219_v5  ;;  %vm1187_vm2 = vmor %vm1185_vm1, %vm1186_vm0  ;;  %v1207_v38 = vmul.f32 %v1206_v35, %v2125_v13  ;;  %v1245_v32 = vmul.f32 %v1244_v39, %v2144_v8 }
 0x306   :  { %v1182_v23 = vsub.f32 1.0, %v1181_v26  ;;  %v1256_v55 = vmul.f32 %v1255_v10, %v2144_v8  ;;  %v1229_v37 = vand.u32 2147483647, %v1219_v5  ;;  %vm1225_vm5 = vweird.f32 %v1219_v5 }
 0x307   :  { %v1376_v25 = vclamps-f32 %v1154_v34, 1.0  ;;  %v1208_v3 = vadd.f32 1.1283791, %v1207_v38  ;;  %v1246_v4 = vadd.f32 0.18741608, %v1245_v32  ;;  %v1111_v34 = vmul.f32 0.5, %v2108_v53 }
 0x308   :  { %v1183_v59 = vmul.f32 %v1433_v57, %v1182_v23  ;;  %v1257_v44 = vadd.f32 0.4994258, %v1256_v55  ;;  %vm1230_vm15 = vcmp.eq.f32.partialorder %v1229_v37, 8.507059e+37 }
 0x309   :  { %v1277_v49 = vadd.f32 1.0, %v1376_v25  ;;  %v1247_v60 = vmul.f32 %v1246_v4, %v2144_v8 }
 0x30a   :  { %v1184_v19 = vadd.f32 %v1433_v57, %v1183_v59  ;;  %v1258_v30 = vmul.f32 %v1257_v44, %v2144_v8  ;;  %v1112_v59 = vmul.f32 0.5, %v2130_v63 }
 0x30b   :  { %v1281_v31 = vmul.f32 %v1277_v49, %v1109_v46  ;;  %v1435_v42 = vpop.eup %1434 }
 0x30c   :  { %v1188_v40 = vsel %vm1187_vm2, %v1433_v57, %v1184_v19  ;;  %v1221_v9 = vmul.f32 %v1435_v42, %v1219_v5  ;;  %v1259_v52 = vadd.f32 1.0, %v1258_v30  ;;  %vm1226_vm4 = vweird.f32 %v1435_v42 }
 0x30d   :  { %v1285_v50 = vadd.f32 %v1281_v31, %v1936_v48  ;;  %v1193_v0 = vsel %vm1190_vm3, %v1192_v33, %v1188_v40  ;;  %v1231_v48 = vand.u32 2147483648, %v1219_v5  ;;  %vm1227_vm14 = vmor %vm1225_vm5, %vm1226_vm4  ;;  %v1209_v57 = vmul.f32 %v1208_v3, %v2116_v17 }
 0x30e   :  { %v1194_v41 = vmul.f32 %v1193_v0, %v1169_v6  ;;  %v1222_v54 = vsub.f32 1.0, %v1221_v9  ;;  %1436 = vrcp.f32 %v1259_v52  ;;  %v1271_v15 = vand.u32 2147483648, %v1259_v52 }
 0x30f   :  { %1325 = vmatmul.f32.vlgmr.msra.gmra.mxu2 %v1285_v50  ;;  %v1232_v20 = vor.u32 1.1754944e-38, %v1231_v48  ;;  %v1269_v23 = vand.u32 2147483647, %v1259_v52  ;;  %vm1265_vm7 = vweird.f32 %v1259_v52 }
 0x310   :  { %v1377_v56 = vclamps-f32 %v1194_v41, 1.0  ;;  %v1223_v18 = vmul.f32 %v1435_v42, %v1222_v54  ;;  %v1272_v25 = vor.u32 1.1754944e-38, %v1271_v15 }
 0x311   :  { %vm1270_vm9 = vcmp.eq.f32.partialorder %v1269_v23, 8.507059e+37 }
 0x312   :  { %v1278_v36 = vadd.f32 1.0, %v1377_v56  ;;  %v1224_v13 = vadd.f32 %v1435_v42, %v1223_v18 }
 0x314   :  { %v1282_v61 = vmul.f32 %v1278_v36, %v1110_v28  ;;  %v1228_v43 = vsel %vm1227_vm14, %v1435_v42, %v1224_v13  ;;  %v1437_v47 = vpop.eup %1436 }
 0x315   :  { %v1233_v1 = vsel %vm1230_vm15, %v1232_v20, %v1228_v43  ;;  %v1261_v12 = vmul.f32 %v1437_v47, %v1259_v52  ;;  %vm1266_vm6 = vweird.f32 %v1437_v47 }
 0x316   :  { %v1286_v58 = vadd.f32 %v1282_v61, %v1951_v11  ;;  %v1234_v45 = vmul.f32 %v1233_v1, %v1209_v57  ;;  %v1248_v11 = vadd.f32 1.1283791, %v1247_v60  ;;  %vm1267_vm8 = vmor %vm1265_vm7, %vm1266_vm6 }
 0x317   :  { %v1262_v26 = vsub.f32 1.0, %v1261_v12 }
 0x318   :  { %1328 = vmatmul.f32.gmra.mxu2 %v1286_v58  ;;  %v1378_v14 = vclamps-f32 %v1234_v45, 1.0  ;;  %v1249_v8 = vmul.f32 %v1248_v11, %v2136_v16 }
 0x319   :  { %v1263_v51 = vmul.f32 %v1437_v47, %v1262_v26 }
 0x31a   :  { %v1279_v7 = vadd.f32 1.0, %v1378_v14 }
 0x31b   :  { %v1264_v17 = vadd.f32 %v1437_v47, %v1263_v51 }
 0x31c   :  { %v1283_v21 = vmul.f32 %v1279_v7, %v1111_v34 }
 0x31d   :  { %v1268_v5 = vsel %vm1267_vm8, %v1437_v47, %v1264_v17 }
 0x31e   :  { %v1287_v24 = vadd.f32 %v1283_v21, %v2008_v62  ;;  %v1273_v10 = vsel %vm1270_vm9, %v1272_v25, %v1268_v5 }
 0x31f   :  { %v1274_v53 = vmul.f32 %v1273_v10, %v1249_v8 }
 0x320   :  { %1331 = vmatmul.f32.gmra.mxu2 %v1287_v24 }
 0x321   :  { %v1379_v27 = vclamps-f32 %v1274_v53, 1.0 }
 0x323   :  { %v1280_v22 = vadd.f32 1.0, %v1379_v27 }
 0x325   :  { %v1284_v46 = vmul.f32 %v1280_v22, %v1112_v59 }
 0x327   :  { %v1288_v49 = vadd.f32 %v1284_v46, %v2011_v2 }
 0x329   :  { %1334 = vmatmul.f32.gmra.mxu2 %v1288_v49 }
 0x392   :  { %v1326_v62 = vpop.f32.mrf.mxu2 }
 0x393   :  { %v1327_v16 = vadd.f32 %v1405_v29, %v1326_v62 }
 0x395   :  { %1339 = vst.msk [vmem:[#allocation10] sm:$0xff] %vm1338_vm10, %v1327_v16 }
 0x39b   :  { %v1329_v19 = vpop.f32.mrf.mxu2 }
 0x39c   :  { %v1330_v55 = vadd.f32 %v1405_v29, %v1329_v19 }
 0x39e   :  { %1340 = vst.msk [vmem:[#allocation10 + $0x8] sm:$0xff] %vm1338_vm10, %v1330_v55 }
 0x3a3   :  { %v1332_v31 = vpop.f32.mrf.mxu2 }
 0x3a4   :  { %v1333_v63 = vadd.f32 %v1405_v29, %v1332_v31 }
 0x3a6   :  { %1341 = vst.msk [vmem:[#allocation10 + $0x10] sm:$0xff] %vm1338_vm10, %v1333_v63 }
 0x3ac   :  { %v1335_v2 = vpop.f32.mrf.mxu2 }
 0x3ad   :  { %v1336_v33 = vadd.f32 %v1405_v29, %v1335_v2 }
 0x3af   :  { %1342 = vst.msk [vmem:[#allocation10 + $0x18] sm:$0xff] %vm1338_vm10, %v1336_v33 }
 0x3b0   :  { %1355 = dma.vmem_to_hbm [thread:$0]  %s1348_s24, 512, %s1350_s27, [#allocation4], %s1567_s9, %s1567_s9, %s1568_s10  }
 0x3b1   :  { %1564 = dma.done.wait [#allocation4], 512  }
 0x3b2   :  { %1565 = vsyncadd [#allocation4], 4294966784 }
 0x3b3   :  { %1360 = vsyncpa [#allocation3], 1 }
 0x3b4   :  { %1361 = vsyncpa [#allocation6], 1 }
 0x3b5   :  { %1362 = vsyncpa [#allocation9], 1 }
 0x3b6   :  { %1363 = vsyncpa [#allocation4], 1 }

// kernel: tpu_custom_call.1
= control target key start
LH: loop header
LB: loop body
LE: loop exit
PB: predicated region body
PF: predicated region fallthrough
CT: control target
= control target key end

     0   :  { %12 = vsyncpa [#allocation3], 0  ;;  %s2190_s0 = inlined_call_operand.hbm [shape: f32[2,16,128], index: 0, kind: input, shape index: {}]   ;;  %s2191_s1 = inlined_call_operand.hbm [shape: f32[5,128,128], index: 1, kind: input, shape index: {}]   ;;  %s2192_s2 = inlined_call_operand.vmem [shape: f32[1,128], index: 2, kind: input, shape index: {}]   ;;  %s2193_s3 = inlined_call_operand.hbm [shape: f32[5,128,128], index: 3, kind: input, shape index: {}]   ;;  %s2194_s4 = inlined_call_operand.vmem [shape: f32[1,128], index: 4, kind: input, shape index: {}]   ;;  %s2195_s5 = inlined_call_operand.hbm [shape: f32[128,128], index: 5, kind: input, shape index: {}]   ;;  %s2196_s6 = inlined_call_operand.vmem [shape: f32[1,128], index: 6, kind: input, shape index: {}]   ;;  %s2197_s7 = inlined_call_operand.hbm [shape: f32[2,16,16], index: 7, kind: output, shape index: {}]  }
   0x1   :  { %13 = vsyncpa [#allocation6], 0 }
   0x2   :  { %14 = vsyncpa [#allocation9], 0 }
   0x3   :  { %15 = vsyncpa [#allocation4], 0  ;;  %s33_s26 = sshll.u32 %s2191_s1, 4  ;;  %s1566_s27 = smov [#allocation5]   ;;  %s34_s26 = int_to_ptr.hbm [resolvable:$true] %s33_s26 }
   0x4   :  { %s35_s28 = sshll.u32 %s1566_s27, 4  ;;  %s20_s8 = sshll.u32 %s2190_s0, 4  ;;  %s36_s28 = int_to_ptr.vmem [resolvable:$true] %s35_s28  ;;  %s21_s8 = int_to_ptr.hbm [resolvable:$true] %s20_s8 }
   0x5   :  { %s1567_s9 = smov 128   ;;  %s1568_s10 = smov 8  }
   0x6   :  { %41 = dma.hbm_to_vmem [thread:$0]  %s34_s26, 10240, %s36_s28, [#allocation6], %s1567_s9, %s1567_s9, %s1568_s10  }
   0x7   :  { %s1569_s11 = smov [#allocation2]   ;;  %s48_s1 = sshll.u32 %s2193_s3, 4  ;;  %s49_s1 = int_to_ptr.hbm [resolvable:$true] %s48_s1 }
   0x8   :  { %s22_s12 = sshll.u32 %s1569_s11, 4  ;;  %s63_s16 = sshll.u32 %s2195_s5, 4  ;;  %s23_s12 = int_to_ptr.vmem [resolvable:$true] %s22_s12  ;;  %s64_s16 = int_to_ptr.hbm [resolvable:$true] %s63_s16 }
   0x9   :  { %28 = dma.hbm_to_vmem [thread:$0]  %s21_s8, 512, %s23_s12, [#allocation3], %s1567_s9, %s1567_s9, %s1568_s10  }
   0xa   :  { %s1570_s17 = smov [#allocation7]   ;;  %s1571_s19 = smov [#allocation8]  }
   0xb   :  { %s50_s18 = sshll.u32 %s1570_s17, 4  ;;  %s65_s3 = sshll.u32 %s1571_s19, 4  ;;  %s51_s18 = int_to_ptr.vmem [resolvable:$true] %s50_s18  ;;  %s66_s3 = int_to_ptr.vmem [resolvable:$true] %s65_s3 }
   0xc   :  { %56 = dma.hbm_to_vmem [thread:$0]  %s49_s1, 10240, %s51_s18, [#allocation6], %s1567_s9, %s1567_s9, %s1568_s10  }
   0xd   :  { %71 = dma.hbm_to_vmem [thread:$0]  %s64_s16, 2048, %s66_s3, [#allocation9], %s1567_s9, %s1567_s9, %s1568_s10  }
   0xe   :  { %1558 = dma.done.wait [#allocation3], 512  }
   0xf   :  { %1559 = vsyncadd [#allocation3], 4294966784 }
  0x10   :  { %1560 = dma.done.wait [#allocation6], 20480  }
  0x11   :  { %1561 = vsyncadd [#allocation6], 4294946816 }
  0x12   :  { %1562 = dma.done.wait [#allocation9], 2048  }
  0x13   :  { %1563 = vsyncadd [#allocation9], 4294965248  ;;  %v167_v0 = vld [vmem:[#allocation5 + $0xf8] sm:$0xff]  ;;  %v166_v3 = vld [vmem:[#allocation5 + $0xf0] sm:$0xff]  ;;  %vm99_vm0 = vcmask 1041408   ;;  %vm136_vm1 = vcmask 1046528  }
  0x14   :  { %v131_v1 = vld [vmem:[#allocation5 + $0x78] sm:$0xff]  ;;  %168 = vmatpush.msra.mxu0 %v167_v0  ;;  %v130_v4 = vld [vmem:[#allocation5 + $0x70] sm:$0xff]  ;;  %v165_v7 = vld [vmem:[#allocation5 + $0xe8] sm:$0xff]  ;;  %vm226_vm2 = vcmask 1045504   ;;  %vm291_vm4 = vcmask 1044480   ;;  %vm356_vm5 = vcmask 1043456  }
  0x15   :  { %v257_v2 = vld [vmem:[#allocation5 + $0x178] sm:$0xff]  ;;  %197 = vmatpush.msra.mxu1 %v131_v1  ;;  %v256_v5 = vld [vmem:[#allocation5 + $0x170] sm:$0xff]  ;;  %v129_v8 = vld [vmem:[#allocation5 + $0x68] sm:$0xff]  ;;  %s1572_s23 = smov [#allocation10]   ;;  %s1349_s27 = sshll.u32 %s2197_s7, 4  ;;  %s1350_s27 = int_to_ptr.hbm [resolvable:$true] %s1349_s27 }
  0x16   :  { %258 = vmatpush.msra.mxu2 %v257_v2  ;;  %v322_v6 = vld [vmem:[#allocation5 + $0x1f8] sm:$0xff]  ;;  %169 = vmatpush.msra.mxu0 %v166_v3  ;;  %v255_v9 = vld [vmem:[#allocation5 + $0x168] sm:$0xff]  ;;  %v321_v10 = vld [vmem:[#allocation5 + $0x1f0] sm:$0xff]  ;;  %s1347_s24 = sshll.u32 %s1572_s23, 4  ;;  %s1348_s24 = int_to_ptr.vmem [resolvable:$true] %s1347_s24 }
  0x17   :  { %198 = vmatpush.msra.mxu1 %v130_v4  ;;  %323 = vmatpush.msra.mxu3 %v322_v6  ;;  %v164_v11 = vld [vmem:[#allocation5 + $0xe0] sm:$0xff]  ;;  %v320_v14 = vld [vmem:[#allocation5 + $0x1e8] sm:$0xff]  ;;  %v163_v15 = vld [vmem:[#allocation5 + $0xd8] sm:$0xff] }
  0x18   :  { %259 = vmatpush.msra.mxu2 %v256_v5  ;;  %v128_v12 = vld [vmem:[#allocation5 + $0x60] sm:$0xff]  ;;  %170 = vmatpush.msra.mxu0 %v165_v7  ;;  %v127_v16 = vld [vmem:[#allocation5 + $0x58] sm:$0xff]  ;;  %v162_v19 = vld [vmem:[#allocation5 + $0xd0] sm:$0xff] }
  0x19   :  { %199 = vmatpush.msra.mxu1 %v129_v8  ;;  %v254_v13 = vld [vmem:[#allocation5 + $0x160] sm:$0xff]  ;;  %324 = vmatpush.msra.mxu3 %v321_v10  ;;  %v253_v17 = vld [vmem:[#allocation5 + $0x158] sm:$0xff]  ;;  %v126_v20 = vld [vmem:[#allocation5 + $0x50] sm:$0xff] }
  0x1a   :  { %260 = vmatpush.msra.mxu2 %v255_v9  ;;  %171 = vmatpush.msra.mxu0 %v164_v11  ;;  %v319_v18 = vld [vmem:[#allocation5 + $0x1e0] sm:$0xff]  ;;  %v252_v21 = vld [vmem:[#allocation5 + $0x150] sm:$0xff]  ;;  %v318_v22 = vld [vmem:[#allocation5 + $0x1d8] sm:$0xff] }
  0x1b   :  { %200 = vmatpush.msra.mxu1 %v128_v12  ;;  %325 = vmatpush.msra.mxu3 %v320_v14  ;;  %v161_v23 = vld [vmem:[#allocation5 + $0xc8] sm:$0xff]  ;;  %v317_v26 = vld [vmem:[#allocation5 + $0x1d0] sm:$0xff]  ;;  %v160_v27 = vld [vmem:[#allocation5 + $0xc0] sm:$0xff] }
  0x1c   :  { %261 = vmatpush.msra.mxu2 %v254_v13  ;;  %172 = vmatpush.msra.mxu0 %v163_v15  ;;  %v125_v24 = vld [vmem:[#allocation5 + $0x48] sm:$0xff]  ;;  %v124_v28 = vld [vmem:[#allocation5 + $0x40] sm:$0xff]  ;;  %v159_v31 = vld [vmem:[#allocation5 + $0xb8] sm:$0xff] }
  0x1d   :  { %201 = vmatpush.msra.mxu1 %v127_v16  ;;  %326 = vmatpush.msra.mxu3 %v319_v18  ;;  %v251_v25 = vld [vmem:[#allocation5 + $0x148] sm:$0xff]  ;;  %v250_v29 = vld [vmem:[#allocation5 + $0x140] sm:$0xff]  ;;  %v123_v32 = vld [vmem:[#allocation5 + $0x38] sm:$0xff] }
  0x1e   :  { %262 = vmatpush.msra.mxu2 %v253_v17  ;;  %173 = vmatpush.msra.mxu0 %v162_v19  ;;  %v316_v30 = vld [vmem:[#allocation5 + $0x1c8] sm:$0xff]  ;;  %v249_v33 = vld [vmem:[#allocation5 + $0x138] sm:$0xff]  ;;  %v315_v34 = vld [vmem:[#allocation5 + $0x1c0] sm:$0xff] }
  0x1f   :  { %202 = vmatpush.msra.mxu1 %v126_v20  ;;  %327 = vmatpush.msra.mxu3 %v318_v22  ;;  %v158_v35 = vld [vmem:[#allocation5 + $0xb0] sm:$0xff]  ;;  %v314_v38 = vld [vmem:[#allocation5 + $0x1b8] sm:$0xff]  ;;  %v157_v39 = vld [vmem:[#allocation5 + $0xa8] sm:$0xff] }
  0x20   :  { %263 = vmatpush.msra.mxu2 %v252_v21  ;;  %174 = vmatpush.msra.mxu0 %v161_v23  ;;  %v122_v36 = vld [vmem:[#allocation5 + $0x30] sm:$0xff]  ;;  %v121_v40 = vld [vmem:[#allocation5 + $0x28] sm:$0xff]  ;;  %v156_v43 = vld [vmem:[#allocation5 + $0xa0] sm:$0xff] }
  0x21   :  { %203 = vmatpush.msra.mxu1 %v125_v24  ;;  %328 = vmatpush.msra.mxu3 %v317_v26  ;;  %v248_v37 = vld [vmem:[#allocation5 + $0x130] sm:$0xff]  ;;  %v247_v41 = vld [vmem:[#allocation5 + $0x128] sm:$0xff]  ;;  %v120_v44 = vld [vmem:[#allocation5 + $0x20] sm:$0xff] }
  0x22   :  { %264 = vmatpush.msra.mxu2 %v251_v25  ;;  %175 = vmatpush.msra.mxu0 %v160_v27  ;;  %v313_v42 = vld [vmem:[#allocation5 + $0x1b0] sm:$0xff]  ;;  %v246_v45 = vld [vmem:[#allocation5 + $0x120] sm:$0xff]  ;;  %v312_v46 = vld [vmem:[#allocation5 + $0x1a8] sm:$0xff] }
  0x23   :  { %204 = vmatpush.msra.mxu1 %v124_v28  ;;  %329 = vmatpush.msra.mxu3 %v316_v30  ;;  %v90_v47 = vld [vmem:[#allocation2] sm:$0xff]  ;;  %v91_v48 = vld [vmem:[#allocation2 + $0x8] sm:$0xff]  ;;  %v155_v49 = vld [vmem:[#allocation5 + $0x98] sm:$0xff] }
  0x24   :  { %265 = vmatpush.msra.mxu2 %v250_v29  ;;  %176 = vmatpush.msra.mxu0 %v159_v31  ;;  %v119_v50 = vld [vmem:[#allocation5 + $0x18] sm:$0xff]  ;;  %v100_v51 = vrot.slane %v90_v47, 6  ;;  %v101_v52 = vrot.slane %v91_v48, 6  ;;  %v311_v54 = vld [vmem:[#allocation5 + $0x1a0] sm:$0xff]  ;;  %v154_v55 = vld [vmem:[#allocation5 + $0x90] sm:$0xff] }
  0x25   :  { %205 = vmatpush.msra.mxu1 %v123_v32  ;;  %330 = vmatpush.msra.mxu3 %v315_v34  ;;  %v245_v53 = vld [vmem:[#allocation5 + $0x118] sm:$0xff]  ;;  %v118_v56 = vld [vmem:[#allocation5 + $0x10] sm:$0xff]  ;;  %v153_v61 = vld [vmem:[#allocation5 + $0x88] sm:$0xff] }
  0x26   :  { %266 = vmatpush.msra.mxu2 %v249_v33  ;;  %177 = vmatpush.msra.mxu0 %v158_v35  ;;  %v1638_v57 = vsel %vm99_vm0, %v100_v51, %v101_v52  ;;  %v1641_v58 = vsel %vm99_vm0, 0.0, %v100_v51  ;;  %v244_v59 = vld [vmem:[#allocation5 + $0x110] sm:$0xff]  ;;  %v310_v60 = vld [vmem:[#allocation5 + $0x198] sm:$0xff]  ;;  %v117_v62 = vld [vmem:[#allocation5 + $0x8] sm:$0xff]  ;;  %v1657_v15 = vsel %vm99_vm0, %v101_v52, 0.0 }
  0x27   :  { %206 = vmatpush.msra.mxu1 %v122_v36  ;;  %331 = vmatpush.msra.mxu3 %v314_v38  ;;  %v243_v63 = vld [vmem:[#allocation5 + $0x108] sm:$0xff]  ;;  %v137_v0 = vrot.slane %v1641_v58, 1  ;;  %v138_v1 = vrot.slane %v1638_v57, 1  ;;  %v309_v2 = vld [vmem:[#allocation5 + $0x190] sm:$0xff]  ;;  %v152_v3 = vld [vmem:[#allocation5 + $0x80] sm:$0xff]  ;;  %v227_v5 = vrot.slane %v1641_v58, 2 }
  0x28   :  { %267 = vmatpush.msra.mxu2 %v248_v37  ;;  %178 = vmatpush.msra.mxu0 %v157_v39  ;;  %v116_v4 = vld [vmem:[#allocation5] sm:$0xff]  ;;  %v228_v6 = vrot.slane %v1638_v57, 2  ;;  %v308_v8 = vld [vmem:[#allocation5 + $0x188] sm:$0xff]  ;;  %v292_v9 = vrot.slane %v1641_v58, 3  ;;  %v293_v10 = vrot.slane %v1638_v57, 3  ;;  %vm1651_vm3 = vmneg %vm99_vm0  ;;  %v140_v21 = vrot.slane %v1657_v15, 1 }
  0x29   :  { %207 = vmatpush.msra.mxu1 %v121_v40  ;;  %332 = vmatpush.msra.mxu3 %v313_v42  ;;  %v242_v7 = vld [vmem:[#allocation5 + $0x100] sm:$0xff]  ;;  %v139_v11 = vsel %vm136_vm1, %v137_v0, %v138_v1  ;;  %v387_v14 = vld [vmem:[#allocation5 + $0x278] sm:$0xff]  ;;  %v92_v17 = vld [vmem:[#allocation2 + $0x10] sm:$0xff]  ;;  %v230_v23 = vrot.slane %v1657_v15, 2  ;;  %v295_v27 = vrot.slane %v1657_v15, 3 }
  0x2a   :  { %268 = vmatpush.msra.mxu2 %v247_v41  ;;  %179 = vmatpush.msra.mxu0 %v156_v43  ;;  %v229_v13 = vsel %vm226_vm2, %v227_v5, %v228_v6  ;;  %v307_v16 = vld [vmem:[#allocation5 + $0x180] sm:$0xff]  ;;  %v93_v18 = vld [vmem:[#allocation2 + $0x18] sm:$0xff]  ;;  %v294_v19 = vsel %vm291_vm4, %v292_v9, %v293_v10  ;;  %v386_v20 = vld [vmem:[#allocation5 + $0x270] sm:$0xff]  ;;  %v103_v24 = vrot.slane %v92_v17, 6  ;;  %v141_v28 = vsel %vm136_vm1, %v138_v1, %v140_v21 }
  0x2b   :  { %208 = vmatpush.msra.mxu1 %v120_v44  ;;  %333 = vmatpush.msra.mxu3 %v312_v46  ;;  %v385_v22 = vld [vmem:[#allocation5 + $0x268] sm:$0xff]  ;;  %v104_v25 = vrot.slane %v93_v18, 6  ;;  %v384_v26 = vld [vmem:[#allocation5 + $0x260] sm:$0xff]  ;;  %v231_v29 = vsel %vm226_vm2, %v228_v6, %v230_v23  ;;  %v383_v30 = vld [vmem:[#allocation5 + $0x258] sm:$0xff]  ;;  %v296_v33 = vsel %vm291_vm4, %v293_v10, %v295_v27 }
  0x2c   :  { %269 = vmatpush.msra.mxu2 %v246_v45  ;;  %180 = vmatpush.msra.mxu0 %v155_v49  ;;  %v1671_v32 = vsel %vm99_vm0, 0.0, %v103_v24  ;;  %v382_v34 = vld [vmem:[#allocation5 + $0x250] sm:$0xff]  ;;  %v381_v37 = vld [vmem:[#allocation5 + $0x248] sm:$0xff]  ;;  %v380_v40 = vld [vmem:[#allocation5 + $0x240] sm:$0xff] }
  0x2d   :  { %209 = vmatpush.msra.mxu1 %v119_v50  ;;  %334 = vmatpush.msra.mxu3 %v311_v54  ;;  %v1668_v31 = vsel %vm99_vm0, %v103_v24, %v104_v25  ;;  %v142_v35 = vrot.slane %v1671_v32, 1  ;;  %v232_v38 = vrot.slane %v1671_v32, 2  ;;  %v297_v41 = vrot.slane %v1671_v32, 3  ;;  %v379_v45 = vld [vmem:[#allocation5 + $0x238] sm:$0xff]  ;;  %v378_v48 = vld [vmem:[#allocation5 + $0x230] sm:$0xff]  ;;  %v377_v50 = vld [vmem:[#allocation5 + $0x228] sm:$0xff] }
  0x2e   :  { %270 = vmatpush.msra.mxu2 %v245_v53  ;;  %181 = vmatpush.msra.mxu0 %v154_v55  ;;  %v143_v36 = vrot.slane %v1668_v31, 1  ;;  %v233_v39 = vrot.slane %v1668_v31, 2  ;;  %v298_v42 = vrot.slane %v1668_v31, 3  ;;  %v115_v46 = vsel %vm99_vm0, %v104_v25, 0.0  ;;  %v376_v52 = vld [vmem:[#allocation5 + $0x220] sm:$0xff] }
  0x2f   :  { %210 = vmatpush.msra.mxu1 %v118_v56  ;;  %335 = vmatpush.msra.mxu3 %v310_v60  ;;  %v145_v49 = vrot.slane %v115_v46, 1  ;;  %v300_v53 = vrot.slane %v115_v46, 3  ;;  %v375_v56 = vld [vmem:[#allocation5 + $0x218] sm:$0xff]  ;;  %v374_v60 = vld [vmem:[#allocation5 + $0x210] sm:$0xff]  ;;  %v372_v0 = vld [vmem:[#allocation5 + $0x200] sm:$0xff]  ;;  %v365_v5 = vrot.slane %v115_v46, 4 }
  0x30   :  { %271 = vmatpush.msra.mxu2 %v244_v59  ;;  %182 = vmatpush.msra.mxu0 %v153_v61  ;;  %v144_v43 = vsel %vm136_vm1, %v142_v35, %v143_v36  ;;  %v234_v44 = vsel %vm226_vm2, %v232_v38, %v233_v39  ;;  %v299_v47 = vsel %vm291_vm4, %v297_v41, %v298_v42  ;;  %v357_v61 = vrot.slane %v1641_v58, 4 }
  0x31   :  { %211 = vmatpush.msra.mxu1 %v117_v62  ;;  %336 = vmatpush.msra.mxu3 %v309_v2  ;;  %v146_v54 = vsel %vm136_vm1, %v143_v36, %v145_v49  ;;  %v301_v59 = vsel %vm291_vm4, %v298_v42, %v300_v53  ;;  %v358_v62 = vrot.slane %v1638_v57, 4  ;;  %v360_v2 = vrot.slane %v1657_v15, 4 }
  0x32   :  { %272 = vmatpush.msra.mxu2 %v243_v63  ;;  %183 = vmatpush.msra.mxu0 %v152_v3  ;;  %v373_v63 = vld [vmem:[#allocation5 + $0x208] sm:$0xff]  ;;  %v363_v58 = vrot.slane %v1668_v31, 4 }
  0x33   :  { %212 = vmatpush.msra.mxu1 %v116_v4  ;;  %337 = vmatpush.msra.mxu3 %v308_v8  ;;  %v359_v1 = vsel %vm356_vm5, %v357_v61, %v358_v62  ;;  %v361_v3 = vsel %vm356_vm5, %v358_v62, %v360_v2  ;;  %v362_v4 = vrot.slane %v1671_v32, 4 }
  0x34   :  { %273 = vmatpush.msra.mxu2 %v242_v7  ;;  %184 = vmatmul.f32.vlgmr.msra.gmra.mxu0 %v139_v11  ;;  %v366_v6 = vsel %vm356_vm5, %v363_v58, %v365_v5 }
  0x35   :  { %1365 = vmatmul.msk.f32.vlgmr.msra.gmra.mxu1 %vm1651_vm3, %v100_v51  ;;  %274 = vmatmul.f32.vlgmr.msra.gmra.mxu2 %v229_v13  ;;  %v235_v51 = vrot.slane %v115_v46, 2 }
  0x36   :  { %388 = vmatpush.msrb.mxu0 %v387_v14  ;;  %338 = vmatpush.msra.mxu3 %v307_v16 }
  0x37   :  { %339 = vmatmul.f32.vlgmr.msra.gmra.mxu3 %v294_v19  ;;  %v236_v55 = vsel %vm226_vm2, %v233_v39, %v235_v51 }
  0x38   :  { %389 = vmatpush.msrb.mxu0 %v386_v20  ;;  %v1403_v20 = vld [vmem:[%s2192_s2] ss:$0 sm:$0xff] }
  0x3a   :  { %390 = vmatpush.msrb.mxu0 %v385_v22 }
  0x3c   :  { %391 = vmatpush.msrb.mxu0 %v384_v26 }
  0x3d   :  { %187 = vmatmul.f32.gmra.mxu0 %v141_v28  ;;  %216 = vmatmul.f32.gmra.mxu1 %v1638_v57  ;;  %v364_v57 = vsel %vm356_vm5, %v362_v4, %v363_v58 }
  0x3e   :  { %277 = vmatmul.f32.gmra.mxu2 %v231_v29  ;;  %392 = vmatpush.msrb.mxu0 %v383_v30 }
  0x3f   :  { %342 = vmatmul.f32.gmra.mxu3 %v296_v33 }
  0x40   :  { %393 = vmatpush.msrb.mxu0 %v382_v34 }
  0x42   :  { %394 = vmatpush.msrb.mxu0 %v381_v37 }
  0x44   :  { %395 = vmatpush.msrb.mxu0 %v380_v40 }
  0x45   :  { %190 = vmatmul.f32.gmra.mxu0 %v144_v43  ;;  %1367 = vmatmul.msk.f32.gmra.mxu1 %vm1651_vm3, %v103_v24 }
  0x46   :  { %280 = vmatmul.f32.gmra.mxu2 %v234_v44  ;;  %396 = vmatpush.msrb.mxu0 %v379_v45 }
  0x47   :  { %345 = vmatmul.f32.gmra.mxu3 %v299_v47 }
  0x48   :  { %397 = vmatpush.msrb.mxu0 %v378_v48 }
  0x4a   :  { %398 = vmatpush.msrb.mxu0 %v377_v50 }
  0x4c   :  { %399 = vmatpush.msrb.mxu0 %v376_v52 }
  0x4d   :  { %193 = vmatmul.f32.gmra.mxu0 %v146_v54  ;;  %222 = vmatmul.f32.gmra.mxu1 %v1668_v31 }
  0x4e   :  { %283 = vmatmul.f32.gmra.mxu2 %v236_v55  ;;  %400 = vmatpush.msrb.mxu0 %v375_v56 }
  0x4f   :  { %348 = vmatmul.f32.gmra.mxu3 %v301_v59 }
  0x50   :  { %401 = vmatpush.msrb.mxu0 %v374_v60 }
  0x52   :  { %402 = vmatpush.msrb.mxu0 %v373_v63 }
  0x54   :  { %403 = vmatpush.msrb.mxu0 %v372_v0 }
  0x55   :  { %404 = vmatmul.f32.vlgmr.msrb.gmra.mxu0 %v359_v1 }
  0x5d   :  { %407 = vmatmul.f32.gmra.mxu0 %v361_v3 }
  0x65   :  { %410 = vmatmul.f32.gmra.mxu0 %v364_v57 }
  0x6d   :  { %413 = vmatmul.f32.gmra.mxu0 %v366_v6 }
  0xb1   :  { %v185_v7 = vpop.f32.mrf.mxu0 }
  0xb2   :  { %v214_v9 = vpop.f32.mrf.mxu1 }
  0xb3   :  { %v215_v15 = vadd.f32 %v214_v9, %v185_v7 }
  0xb8   :  { %v275_v11 = vpop.f32.mrf.mxu2 }
  0xb9   :  { %v287_v17 = vadd.f32 %v275_v11, %v215_v15  ;;  %v728_v11 = vld [vmem:[#allocation7 + $0x78] sm:$0xff]  ;;  %v727_v15 = vld [vmem:[#allocation7 + $0x70] sm:$0xff] }
  0xba   :  { %v188_v8 = vpop.f32.mrf.mxu0  ;;  %v340_v13 = vpop.f32.mrf.mxu3  ;;  %793 = vmatpush.msrb.mxu2 %v728_v11 }
  0xbb   :  { %v217_v16 = vpop.f32.mrf.mxu1  ;;  %v352_v19 = vadd.f32 %v340_v13, %v287_v17 }
  0xbc   :  { %v218_v23 = vadd.f32 %v217_v16, %v188_v8  ;;  %794 = vmatpush.msrb.mxu2 %v727_v15  ;;  %v718_v15 = vld [vmem:[#allocation7 + $0x28] sm:$0xff] }
  0xc1   :  { %v278_v18 = vpop.f32.mrf.mxu2 }
  0xc2   :  { %v191_v10 = vpop.f32.mrf.mxu0  ;;  %v343_v21 = vpop.f32.mrf.mxu3  ;;  %v288_v25 = vadd.f32 %v278_v18, %v218_v23 }
  0xc3   :  { %v220_v27 = vpop.f32.mrf.mxu1 }
  0xc4   :  { %v353_v30 = vadd.f32 %v343_v21, %v288_v25  ;;  %v221_v32 = vadd.f32 %v220_v27, %v191_v10  ;;  %v725_v25 = vld [vmem:[#allocation7 + $0x60] sm:$0xff] }
  0xc9   :  { %v281_v29 = vpop.f32.mrf.mxu2 }
  0xca   :  { %v194_v14 = vpop.f32.mrf.mxu0  ;;  %v346_v34 = vpop.f32.mrf.mxu3  ;;  %v289_v35 = vadd.f32 %v281_v29, %v221_v32 }
  0xcb   :  { %v223_v38 = vpop.f32.mrf.mxu1 }
  0xcc   :  { %v354_v39 = vadd.f32 %v346_v34, %v289_v35  ;;  %v224_v42 = vadd.f32 %v223_v38, %v194_v14 }
  0xd1   :  { %v284_v40 = vpop.f32.mrf.mxu2 }
  0xd2   :  { %v405_v22 = vpop.f32.mrf.mxu0  ;;  %v290_v44 = vadd.f32 %v284_v40, %v224_v42  ;;  %v349_v46 = vpop.f32.mrf.mxu3  ;;  %v763_v42 = vld [vmem:[#allocation7 + $0xf8] sm:$0xff] }
  0xd3   :  { %v417_v24 = vadd.f32 %v405_v22, %v352_v19  ;;  %v726_v19 = vld [vmem:[#allocation7 + $0x68] sm:$0xff]  ;;  %764 = vmatpush.msrb.mxu1 %v763_v42 }
  0xd4   :  { %v355_v48 = vadd.f32 %v349_v46, %v290_v44  ;;  %795 = vmatpush.msrb.mxu2 %v726_v19  ;;  %v722_v44 = vld [vmem:[#allocation7 + $0x48] sm:$0xff]  ;;  %v1787_v19 = vld [vmem:[#allocation7 + $0x1d8] sm:$0xff] }
  0xd5   :  { %v1703_v26 = vadd.f32 %v1403_v20, %v417_v24 }
  0xd6   :  { %796 = vmatpush.msrb.mxu2 %v725_v25  ;;  %v847_v25 = vld [vmem:[#allocation7 + $0x150] sm:$0xff] }
  0xd7   :  { %428 = vadd.xlane.f32.xlu0 %v1703_v26  ;;  %v440_v28 = vmul.f32 %v1703_v26, %v1703_v26 }
  0xd9   :  { %444 = vadd.xlane.f32.xlu1 %v440_v28 }
  0xda   :  { %v408_v31 = vpop.f32.mrf.mxu0 }
  0xdb   :  { %v418_v33 = vadd.f32 %v408_v31, %v353_v30 }
  0xdd   :  { %v1708_v36 = vadd.f32 %v1403_v20, %v418_v33  ;;  %v724_v33 = vld [vmem:[#allocation7 + $0x58] sm:$0xff] }
  0xde   :  { %797 = vmatpush.msrb.mxu2 %v724_v33  ;;  %v757_v33 = vld [vmem:[#allocation7 + $0xc8] sm:$0xff] }
  0xdf   :  { %430 = vadd.xlane.f32.xlu0 %v1708_v36  ;;  %v441_v37 = vmul.f32 %v1708_v36, %v1708_v36 }
  0xe1   :  { %446 = vadd.xlane.f32.xlu1 %v441_v37  ;;  %v723_v37 = vld [vmem:[#allocation7 + $0x50] sm:$0xff] }
  0xe2   :  { %v411_v41 = vpop.f32.mrf.mxu0  ;;  %798 = vmatpush.msrb.mxu2 %v723_v37 }
  0xe3   :  { %v419_v43 = vadd.f32 %v411_v41, %v354_v39 }
  0xe4   :  { %799 = vmatpush.msrb.mxu2 %v722_v44  ;;  %v756_v44 = vld [vmem:[#allocation7 + $0xc0] sm:$0xff] }
  0xe5   :  { %v1713_v45 = vadd.f32 %v1403_v20, %v419_v43  ;;  %v852_v43 = vld [vmem:[#allocation7 + $0x178] sm:$0xff] }
  0xe6   :  { %853 = vmatpush.msrb.mxu3 %v852_v43 }
  0xe7   :  { %432 = vadd.xlane.f32.xlu2 %v1713_v45  ;;  %v442_v47 = vmul.f32 %v1713_v45, %v1713_v45 }
  0xe9   :  { %448 = vadd.xlane.f32.xlu0 %v442_v47 }
  0xea   :  { %v414_v49 = vpop.f32.mrf.mxu0 }
  0xeb   :  { %v420_v50 = vadd.f32 %v414_v49, %v355_v48  ;;  %v1752_v48 = vld [vmem:[#allocation7 + $0x1f8] sm:$0xff] }
  0xec   :  { %917 = vmatpush.msra.mxu0 %v1752_v48 }
  0xed   :  { %v1718_v51 = vadd.f32 %v1403_v20, %v420_v50 }
  0xef   :  { %434 = vadd.xlane.f32.xlu2 %v1718_v51  ;;  %v443_v52 = vmul.f32 %v1718_v51, %v1718_v51 }
  0xf1   :  { %450 = vadd.xlane.f32.xlu1 %v443_v52  ;;  %v762_v52 = vld [vmem:[#allocation7 + $0xf0] sm:$0xff] }
  0xf2   :  { %765 = vmatpush.msrb.mxu1 %v762_v52 }
 0x14a   :  { %v429_v53 = vpop.xlane.xlu0 %428 }
 0x14b   :  { %v436_v54 = vmul.f32 0.03125, %v429_v53  ;;  %v851_v53 = vld [vmem:[#allocation7 + $0x170] sm:$0xff] }
 0x14c   :  { %v445_v55 = vpop.xlane.xlu1 %444  ;;  %854 = vmatpush.msrb.mxu3 %v851_v53 }
 0x14d   :  { %v456_v56 = vmul.f32 %v436_v54, %v436_v54  ;;  %v452_v59 = vmul.f32 0.03125, %v445_v55  ;;  %v464_v23 = vsub.f32 %v1703_v26, %v436_v54 }
 0x14f   :  { %v460_v60 = vsub.f32 %v452_v59, %v456_v56  ;;  %v721_v56 = vld [vmem:[#allocation7 + $0x40] sm:$0xff]  ;;  %v1762_v59 = vld [vmem:[#allocation7 + $0x1f0] sm:$0xff] }
 0x150   :  { %800 = vmatpush.msrb.mxu2 %v721_v56  ;;  %918 = vmatpush.msra.mxu0 %v1762_v59 }
 0x151   :  { %v468_v61 = vadd.f32 1e-05, %v460_v60 }
 0x152   :  { %v431_v62 = vpop.xlane.xlu0 %430 }
 0x153   :  { %1406 = vrsqrt.f32 %v468_v61  ;;  %v1723_v63 = vmul.f32 0.03125, %v431_v62  ;;  %vm478_vm7 = vweird.f32 %v468_v61  ;;  %v720_v62 = vld [vmem:[#allocation7 + $0x38] sm:$0xff] }
 0x154   :  { %v447_v0 = vpop.xlane.xlu1 %446  ;;  %801 = vmatpush.msrb.mxu2 %v720_v62  ;;  %v714_v62 = vld [vmem:[#allocation7 + $0x8] sm:$0xff] }
 0x155   :  { %v457_v1 = vmul.f32 %v1723_v63, %v1723_v63  ;;  %v453_v2 = vmul.f32 0.03125, %v447_v0  ;;  %v465_v50 = vsub.f32 %v1708_v36, %v1723_v63  ;;  %v761_v36 = vld [vmem:[#allocation7 + $0xe8] sm:$0xff] }
 0x156   :  { %766 = vmatpush.msrb.mxu1 %v761_v36  ;;  %v755_v36 = vld [vmem:[#allocation7 + $0xb8] sm:$0xff] }
 0x157   :  { %v461_v3 = vsub.f32 %v453_v2, %v457_v1  ;;  %v1768_v1 = vld [vmem:[#allocation7 + $0x1e8] sm:$0xff] }
 0x158   :  { %919 = vmatpush.msra.mxu0 %v1768_v1 }
 0x159   :  { %v1407_v4 = vpop.eup %1406  ;;  %v469_v58 = vadd.f32 1e-05, %v461_v3 }
 0x15a   :  { %v473_v57 = vmul.f32 %v1407_v4, %v468_v61  ;;  %v433_v5 = vpop.xlane.xlu2 %432  ;;  %vm479_vm6 = vweird.f32 %v1407_v4  ;;  %v850_v61 = vld [vmem:[#allocation7 + $0x168] sm:$0xff] }
 0x15b   :  { %1408 = vrsqrt.f32 %v469_v58  ;;  %v1727_v6 = vmul.f32 0.03125, %v433_v5  ;;  %vm480_vm8 = vmor %vm478_vm7, %vm479_vm6  ;;  %vm488_vm10 = vweird.f32 %v469_v58  ;;  %855 = vmatpush.msrb.mxu3 %v850_v61  ;;  %v844_v61 = vld [vmem:[#allocation7 + $0x138] sm:$0xff] }
 0x15c   :  { %v474_v7 = vmul.f32 %v1407_v4, %v473_v57  ;;  %v449_v8 = vpop.xlane.xlu0 %448  ;;  %v719_v57 = vld [vmem:[#allocation7 + $0x30] sm:$0xff] }
 0x15d   :  { %v458_v9 = vmul.f32 %v1727_v6, %v1727_v6  ;;  %v454_v10 = vmul.f32 0.03125, %v449_v8  ;;  %802 = vmatpush.msrb.mxu2 %v719_v57 }
 0x15e   :  { %v475_v13 = vmul.f32 0.5, %v474_v7  ;;  %v1776_v7 = vld [vmem:[#allocation7 + $0x1e0] sm:$0xff] }
 0x15f   :  { %v462_v14 = vsub.f32 %v454_v10, %v458_v9  ;;  %920 = vmatpush.msra.mxu0 %v1776_v7  ;;  %803 = vmatpush.msrb.mxu2 %v718_v15 }
 0x160   :  { %v476_v16 = vsub.f32 1.5, %v475_v13  ;;  %v759_v13 = vld [vmem:[#allocation7 + $0xd8] sm:$0xff] }
 0x161   :  { %v1409_v17 = vpop.eup %1408  ;;  %v1731_v18 = vadd.f32 1e-05, %v462_v14  ;;  %v848_v14 = vld [vmem:[#allocation7 + $0x158] sm:$0xff]  ;;  %921 = vmatpush.msra.mxu0 %v1787_v19 }
 0x162   :  { %v477_v20 = vmul.f32 %v1407_v4, %v476_v16  ;;  %v483_v21 = vmul.f32 %v1409_v17, %v469_v58  ;;  %v435_v22 = vpop.xlane.xlu2 %434  ;;  %vm489_vm9 = vweird.f32 %v1409_v17  ;;  %v849_v58 = vld [vmem:[#allocation7 + $0x160] sm:$0xff] }
 0x163   :  { %1410 = vrsqrt.f32 %v1731_v18  ;;  %v1735_v24 = vmul.f32 0.03125, %v435_v22  ;;  %vm490_vm11 = vmor %vm488_vm10, %vm489_vm9  ;;  %856 = vmatpush.msrb.mxu3 %v849_v58  ;;  %vm498_vm13 = vweird.f32 %v1731_v18  ;;  %v466_v22 = vsub.f32 %v1713_v45, %v1727_v6  ;;  %v717_v45 = vld [vmem:[#allocation7 + $0x20] sm:$0xff]  ;;  %v1806_v6 = vld [vmem:[#allocation7 + $0x1d0] sm:$0xff] }
 0x164   :  { %v481_v27 = vsel %vm480_vm8, %v1407_v4, %v477_v20  ;;  %v484_v28 = vmul.f32 %v1409_v17, %v483_v21  ;;  %v451_v29 = vpop.xlane.xlu1 %450  ;;  %v760_v4 = vld [vmem:[#allocation7 + $0xe0] sm:$0xff]  ;;  %804 = vmatpush.msrb.mxu2 %v717_v45  ;;  %922 = vmatpush.msra.mxu0 %v1806_v6  ;;  %v843_v58 = vld [vmem:[#allocation7 + $0x130] sm:$0xff]  ;;  %v1860_v45 = vld [vmem:[#allocation7 + $0x1a8] sm:$0xff] }
 0x165   :  { %v1737_v30 = vmul.f32 %v481_v27, %v464_v23  ;;  %v459_v31 = vmul.f32 %v1735_v24, %v1735_v24  ;;  %v455_v32 = vmul.f32 0.03125, %v451_v29  ;;  %767 = vmatpush.msrb.mxu1 %v760_v4  ;;  %857 = vmatpush.msrb.mxu3 %v848_v14  ;;  %v754_v4 = vld [vmem:[#allocation7 + $0xb0] sm:$0xff] }
 0x166   :  { %v485_v34 = vmul.f32 0.5, %v484_v28 }
 0x167   :  { %v1742_v26 = vmul.f32 0.70710677, %v1737_v30  ;;  %v463_v35 = vsub.f32 %v455_v32, %v459_v31  ;;  %768 = vmatpush.msrb.mxu1 %v759_v13  ;;  %858 = vmatpush.msrb.mxu3 %v847_v25  ;;  %v753_v13 = vld [vmem:[#allocation7 + $0xa8] sm:$0xff] }
 0x168   :  { %v486_v38 = vsub.f32 1.5, %v485_v34  ;;  %v846_v34 = vld [vmem:[#allocation7 + $0x148] sm:$0xff] }
 0x169   :  { %v1744_v39 = vpop.eup %1410  ;;  %v524_v40 = vmul.f32 %v1742_v26, %v1742_v26  ;;  %v1748_v41 = vadd.f32 1e-05, %v463_v35  ;;  %v716_v35 = vld [vmem:[#allocation7 + $0x18] sm:$0xff]  ;;  %859 = vmatpush.msrb.mxu3 %v846_v34  ;;  %v1865_v34 = vld [vmem:[#allocation7 + $0x1a0] sm:$0xff] }
 0x16a   :  { %v487_v46 = vmul.f32 %v1409_v17, %v486_v38  ;;  %v493_v47 = vmul.f32 %v1744_v39, %v1731_v18  ;;  %vm499_vm12 = vweird.f32 %v1744_v39  ;;  %v758_v18 = vld [vmem:[#allocation7 + $0xd0] sm:$0xff]  ;;  %805 = vmatpush.msrb.mxu2 %v716_v35  ;;  %v751_v35 = vld [vmem:[#allocation7 + $0x98] sm:$0xff] }
 0x16b   :  { %v1754_v49 = vmin.f32 %v524_v40, 16.0  ;;  %1412 = vrsqrt.f32 %v1748_v41  ;;  %vm1796_vm14 = vmor %vm498_vm13, %vm499_vm12  ;;  %769 = vmatpush.msrb.mxu1 %v758_v18  ;;  %vm508_vm6 = vweird.f32 %v1748_v41 }
 0x16c   :  { %v491_v54 = vsel %vm490_vm11, %v1409_v17, %v487_v46  ;;  %v494_v55 = vmul.f32 %v1744_v39, %v493_v47  ;;  %v845_v46 = vld [vmem:[#allocation7 + $0x140] sm:$0xff]  ;;  %v715_v47 = vld [vmem:[#allocation7 + $0x10] sm:$0xff] }
 0x16d   :  { %v1764_v60 = vmul.f32 %v491_v54, %v465_v50  ;;  %v526_v63 = vmul.f32 2.1237322e-06, %v1754_v49  ;;  %v537_v2 = vmul.f32 3.8918573e-05, %v1754_v49  ;;  %770 = vmatpush.msrb.mxu1 %v757_v33  ;;  %860 = vmatpush.msrb.mxu3 %v845_v46  ;;  %v1825_v54 = vld [vmem:[#allocation7 + $0x1c0] sm:$0xff] }
 0x16e   :  { %v495_v0 = vmul.f32 0.5, %v494_v55  ;;  %806 = vmatpush.msrb.mxu2 %v715_v47 }
 0x16f   :  { %v1772_v3 = vmul.f32 0.70710677, %v1764_v60  ;;  %v527_v8 = vadd.f32 0.00028619796, %v526_v63  ;;  %v538_v9 = vadd.f32 0.001143296, %v537_v2  ;;  %771 = vmatpush.msrb.mxu1 %v756_v44  ;;  %861 = vmatpush.msrb.mxu3 %v844_v61 }
 0x170   :  { %v496_v5 = vsub.f32 1.5, %v495_v0  ;;  %v1834_v2 = vld [vmem:[#allocation7 + $0x1b8] sm:$0xff]  ;;  %807 = vmatpush.msrb.mxu2 %v714_v62  ;;  %v750_v44 = vld [vmem:[#allocation7 + $0x90] sm:$0xff] }
 0x171   :  { %v1778_v10 = vpop.eup %1412  ;;  %v564_v11 = vmul.f32 %v1772_v3, %v1772_v3  ;;  %v528_v20 = vmul.f32 %v527_v8, %v1754_v49  ;;  %v539_v27 = vmul.f32 %v538_v9, %v1754_v49  ;;  %772 = vmatpush.msrb.mxu1 %v755_v36  ;;  %v467_v8 = vsub.f32 %v1718_v51, %v1735_v24  ;;  %v713_v9 = vld [vmem:[#allocation7] sm:$0xff]  ;;  %v838_v36 = vld [vmem:[#allocation7 + $0x108] sm:$0xff] }
 0x172   :  { %v497_v16 = vmul.f32 %v1744_v39, %v496_v5  ;;  %v503_v17 = vmul.f32 %v1778_v10, %v1748_v41  ;;  %vm509_vm15 = vweird.f32 %v1778_v10  ;;  %862 = vmatpush.msrb.mxu3 %v843_v58  ;;  %808 = vmatpush.msrb.mxu2 %v713_v9  ;;  %v748_v9 = vld [vmem:[#allocation7 + $0x80] sm:$0xff] }
 0x173   :  { %v1790_v21 = vmin.f32 %v564_v11, 16.0  ;;  %v529_v31 = vadd.f32 0.0036580483, %v528_v20  ;;  %v540_v40 = vadd.f32 0.014752088, %v539_v27  ;;  %vm1821_vm7 = vmor %vm508_vm6, %vm509_vm15  ;;  %v1840_v11 = vld [vmem:[#allocation7 + $0x1b0] sm:$0xff]  ;;  %773 = vmatpush.msrb.mxu1 %v754_v4 }
 0x174   :  { %v501_v28 = vsel %vm1796_vm14, %v1744_v39, %v497_v16  ;;  %v504_v29 = vmul.f32 %v1778_v10, %v503_v17  ;;  %v1813_v39 = vld [vmem:[#allocation7 + $0x1c8] sm:$0xff] }
 0x175   :  { %v566_v32 = vmul.f32 2.1237322e-06, %v1790_v21  ;;  %v1811_v37 = vmul.f32 %v501_v28, %v466_v22  ;;  %v577_v42 = vmul.f32 3.8918573e-05, %v1790_v21  ;;  %923 = vmatpush.msra.mxu0 %v1813_v39  ;;  %v530_v50 = vmul.f32 %v529_v31, %v1754_v49  ;;  %774 = vmatpush.msrb.mxu1 %v753_v13  ;;  %v842_v27 = vld [vmem:[#allocation7 + $0x128] sm:$0xff]  ;;  %v752_v31 = vld [vmem:[#allocation7 + $0xa0] sm:$0xff] }
 0x176   :  { %v505_v38 = vmul.f32 0.5, %v504_v29  ;;  %v541_v41 = vmul.f32 %v540_v40, %v1754_v49  ;;  %863 = vmatpush.msrb.mxu3 %v842_v27 }
 0x177   :  { %v567_v43 = vadd.f32 0.00028619796, %v566_v32  ;;  %v578_v55 = vadd.f32 0.001143296, %v577_v42  ;;  %924 = vmatpush.msra.mxu0 %v1825_v54  ;;  %v1831_v63 = vmul.f32 0.70710677, %v1811_v37  ;;  %775 = vmatpush.msrb.mxu1 %v752_v31 }
 0x178   :  { %v506_v52 = vsub.f32 1.5, %v505_v38  ;;  %v542_v57 = vadd.f32 0.112945676, %v541_v41  ;;  %v531_v14 = vadd.f32 0.05243302, %v530_v50  ;;  %v841_v32 = vld [vmem:[#allocation7 + $0x120] sm:$0xff] }
 0x179   :  { %v568_v56 = vmul.f32 %v567_v43, %v1790_v21  ;;  %v579_v5 = vmul.f32 %v578_v55, %v1790_v21  ;;  %925 = vmatpush.msra.mxu0 %v1834_v2  ;;  %v604_v15 = vmul.f32 %v1831_v63, %v1831_v63  ;;  %v840_v38 = vld [vmem:[#allocation7 + $0x118] sm:$0xff]  ;;  %864 = vmatpush.msrb.mxu3 %v841_v32  ;;  %v1877_v55 = vld [vmem:[#allocation7 + $0x190] sm:$0xff] }
 0x17a   :  { %v507_v0 = vmul.f32 %v1778_v10, %v506_v52  ;;  %v543_v51 = vmul.f32 %v542_v57, %v1754_v49  ;;  %v1869_v43 = vld [vmem:[#allocation7 + $0x198] sm:$0xff]  ;;  %776 = vmatpush.msrb.mxu1 %v751_v35  ;;  %v839_v52 = vld [vmem:[#allocation7 + $0x110] sm:$0xff] }
 0x17b   :  { %v569_v16 = vadd.f32 0.0036580483, %v568_v56  ;;  %v580_v24 = vadd.f32 0.014752088, %v579_v5  ;;  %926 = vmatpush.msra.mxu0 %v1840_v11  ;;  %v1852_v18 = vmin.f32 %v604_v15, 16.0  ;;  %865 = vmatpush.msrb.mxu3 %v840_v38  ;;  %v749_v56 = vld [vmem:[#allocation7 + $0x88] sm:$0xff] }
 0x17c   :  { %v511_v17 = vsel %vm1821_vm7, %v1778_v10, %v507_v0  ;;  %v544_v22 = vadd.f32 0.4994258, %v543_v51  ;;  %v532_v10 = vmul.f32 %v531_v14, %v1754_v49  ;;  %777 = vmatpush.msrb.mxu1 %v750_v44  ;;  %v980_v32 = vld [vmem:[#allocation7 + $0x278] sm:$0xff] }
 0x17d   :  { %v1848_v20 = vmul.f32 %v511_v17, %v467_v8  ;;  %v581_v23 = vmul.f32 %v580_v24, %v1790_v21  ;;  %v570_v28 = vmul.f32 %v569_v16, %v1790_v21  ;;  %927 = vmatpush.msra.mxu0 %v1860_v45  ;;  %v606_v46 = vmul.f32 2.1237322e-06, %v1852_v18  ;;  %866 = vmatpush.msrb.mxu3 %v839_v52  ;;  %v1885_v8 = vld [vmem:[#allocation7 + $0x188] sm:$0xff]  ;;  %v837_v16 = vld [vmem:[#allocation7 + $0x100] sm:$0xff] }
 0x17e   :  { %v545_v29 = vmul.f32 %v544_v22, %v1754_v49  ;;  %v533_v50 = vadd.f32 0.18741608, %v532_v10  ;;  %v617_v4 = vmul.f32 3.8918573e-05, %v1852_v18  ;;  %778 = vmatpush.msrb.mxu1 %v749_v56  ;;  %v1890_v17 = vld [vmem:[#allocation7 + $0x180] sm:$0xff] }
 0x17f   :  { %v1855_v25 = vmul.f32 0.70710677, %v1848_v20  ;;  %v582_v40 = vadd.f32 0.112945676, %v581_v23  ;;  %928 = vmatpush.msra.mxu0 %v1865_v34  ;;  %v571_v41 = vadd.f32 0.05243302, %v570_v28  ;;  %867 = vmatpush.msrb.mxu3 %v838_v36 }
 0x180   :  { %v1867_v42 = vadd.f32 1.0, %v545_v29  ;;  %v607_v0 = vadd.f32 0.00028619796, %v606_v46  ;;  %v534_v15 = vmul.f32 %v533_v50, %v1754_v49  ;;  %v618_v51 = vadd.f32 0.001143296, %v617_v4  ;;  %779 = vmatpush.msrb.mxu1 %v748_v9  ;;  %v978_v46 = vld [vmem:[#allocation7 + $0x268] sm:$0xff] }
 0x181   :  { %v644_v33 = vmul.f32 %v1855_v25, %v1855_v25  ;;  %v583_v53 = vmul.f32 %v582_v40, %v1790_v21  ;;  %929 = vmatpush.msra.mxu0 %v1869_v43  ;;  %v572_v14 = vmul.f32 %v571_v41, %v1790_v21  ;;  %868 = vmatpush.msrb.mxu3 %v837_v16 }
 0x182   :  { %1414 = vrcp.f32 %v1867_v42  ;;  %v608_v13 = vmul.f32 %v607_v0, %v1852_v18  ;;  %v619_v28 = vmul.f32 %v618_v51, %v1852_v18  ;;  %v535_v38 = vadd.f32 1.1283791, %v534_v15  ;;  %981 = vmatpush.msra.mxu1 %v980_v32 }
 0x183   :  { %v1872_v47 = vmin.f32 %v644_v33, 16.0  ;;  %v584_v62 = vadd.f32 0.4994258, %v583_v53  ;;  %930 = vmatpush.msra.mxu0 %v1877_v55  ;;  %1380 = vmatpush.msra.mxu3 %v1752_v48  ;;  %v979_v33 = vld [vmem:[#allocation7 + $0x270] sm:$0xff]  ;;  %v573_v35 = vadd.f32 0.18741608, %v572_v14  ;;  %vm552_vm9 = vweird.f32 %v1867_v42 }
 0x184   :  { %v609_v10 = vadd.f32 0.0036580483, %v608_v13  ;;  %v620_v50 = vadd.f32 0.014752088, %v619_v28  ;;  %v556_v41 = vand.u32 2147483647, %v1867_v42  ;;  %982 = vmatpush.msra.mxu1 %v979_v33  ;;  %v536_v0 = vmul.f32 %v535_v38, %v1742_v26 }
 0x185   :  { %v646_v61 = vmul.f32 2.1237322e-06, %v1872_v47  ;;  %v657_v58 = vmul.f32 3.8918573e-05, %v1872_v47  ;;  %v585_v5 = vmul.f32 %v584_v62, %v1790_v21  ;;  %931 = vmatpush.msra.mxu0 %v1885_v8  ;;  %1381 = vmatpush.msra.mxu3 %v1762_v59  ;;  %v558_v48 = vand.u32 2147483648, %v1867_v42 }
 0x186   :  { %v610_v40 = vmul.f32 %v609_v10, %v1852_v18  ;;  %v574_v59 = vmul.f32 %v573_v35, %v1790_v21  ;;  %983 = vmatpush.msra.mxu1 %v978_v46  ;;  %vm557_vm11 = vcmp.eq.f32.partialorder %v556_v41, 8.507059e+37 }
 0x187   :  { %v647_v57 = vadd.f32 0.00028619796, %v646_v61  ;;  %v658_v24 = vadd.f32 0.001143296, %v657_v58  ;;  %v1893_v23 = vadd.f32 1.0, %v585_v5  ;;  %932 = vmatpush.msra.mxu0 %v1890_v17  ;;  %1382 = vmatpush.msra.mxu3 %v1768_v1  ;;  %v621_v61 = vmul.f32 %v620_v50, %v1852_v18 }
 0x188   :  { %v1415_v27 = vpop.eup %1414  ;;  %v611_v36 = vadd.f32 0.05243302, %v610_v40  ;;  %v559_v1 = vor.u32 1.1754944e-38, %v558_v48  ;;  %v575_v15 = vadd.f32 1.1283791, %v574_v59  ;;  %v975_v40 = vld [vmem:[#allocation7 + $0x250] sm:$0xff] }
 0x189   :  { %v648_v22 = vmul.f32 %v647_v57, %v1872_v47  ;;  %v659_v49 = vmul.f32 %v658_v24, %v1872_v47  ;;  %v548_v31 = vmul.f32 %v1415_v27, %v1867_v42  ;;  %1416 = vrcp.f32 %v1893_v23  ;;  %1383 = vmatpush.msra.mxu3 %v1776_v7 }
 0x18a   :  { %vm553_vm8 = vweird.f32 %v1415_v27  ;;  %v622_v57 = vadd.f32 0.112945676, %v621_v61  ;;  %v612_v21 = vmul.f32 %v611_v36, %v1852_v18  ;;  %v598_v24 = vand.u32 2147483648, %v1893_v23  ;;  %v973_v61 = vld [vmem:[#allocation7 + $0x240] sm:$0xff] }
 0x18b   :  { %v649_v29 = vadd.f32 0.0036580483, %v648_v22  ;;  %v549_v44 = vsub.f32 1.0, %v548_v31  ;;  %v660_v52 = vadd.f32 0.014752088, %v659_v49  ;;  %vm554_vm10 = vmor %vm552_vm9, %vm553_vm8  ;;  %1384 = vmatpush.msra.mxu3 %v1787_v19  ;;  %v976_v19 = vld [vmem:[#allocation7 + $0x258] sm:$0xff]  ;;  %vm592_vm13 = vweird.f32 %v1893_v23 }
 0x18c   :  { %v623_v26 = vmul.f32 %v622_v57, %v1852_v18  ;;  %v596_v49 = vand.u32 2147483647, %v1893_v23  ;;  %v613_v32 = vadd.f32 0.18741608, %v612_v21  ;;  %v599_v46 = vor.u32 1.1754944e-38, %v598_v24  ;;  %v968_v24 = vld [vmem:[#allocation7 + $0x218] sm:$0xff] }
 0x18d   :  { %v650_v53 = vmul.f32 %v649_v29, %v1872_v47  ;;  %v550_v56 = vmul.f32 %v1415_v27, %v549_v44  ;;  %v661_v62 = vmul.f32 %v660_v52, %v1872_v47  ;;  %1385 = vmatpush.msra.mxu3 %v1806_v6  ;;  %v977_v29 = vld [vmem:[#allocation7 + $0x260] sm:$0xff]  ;;  %v516_v6 = vmul.f32 0.5, %v1737_v30  ;;  %v974_v30 = vld [vmem:[#allocation7 + $0x248] sm:$0xff] }
 0x18e   :  { %v624_v22 = vadd.f32 0.4994258, %v623_v26  ;;  %984 = vmatpush.msra.mxu1 %v977_v29  ;;  %vm597_vm15 = vcmp.eq.f32.partialorder %v596_v49, 8.507059e+37 }
 0x18f   :  { %v1417_v4 = vpop.eup %1416  ;;  %v551_v58 = vadd.f32 %v1415_v27, %v550_v56  ;;  %v662_v5 = vadd.f32 0.112945676, %v661_v62  ;;  %v651_v9 = vadd.f32 0.05243302, %v650_v53  ;;  %1386 = vmatpush.msra.mxu3 %v1813_v39  ;;  %v576_v39 = vmul.f32 %v575_v15, %v1772_v3  ;;  %v972_v62 = vld [vmem:[#allocation7 + $0x238] sm:$0xff] }
 0x190   :  { %v588_v13 = vmul.f32 %v1417_v4, %v1893_v23  ;;  %vm593_vm12 = vweird.f32 %v1417_v4  ;;  %v625_v33 = vmul.f32 %v624_v22, %v1852_v18  ;;  %985 = vmatpush.msra.mxu1 %v976_v19  ;;  %v614_v56 = vmul.f32 %v613_v32, %v1852_v18  ;;  %v967_v19 = vld [vmem:[#allocation7 + $0x210] sm:$0xff] }
 0x191   :  { %v555_v14 = vsel %vm554_vm10, %v1415_v27, %v551_v58  ;;  %v663_v42 = vmul.f32 %v662_v5, %v1872_v47  ;;  %v652_v27 = vmul.f32 %v651_v9, %v1872_v47  ;;  %vm594_vm14 = vmor %vm592_vm13, %vm593_vm12  ;;  %1387 = vmatpush.msra.mxu3 %v1825_v54  ;;  %v970_v9 = vld [vmem:[#allocation7 + $0x228] sm:$0xff] }
 0x192   :  { %v560_v16 = vsel %vm557_vm11, %v559_v1, %v555_v14  ;;  %v589_v7 = vsub.f32 1.0, %v588_v13  ;;  %v1930_v50 = vadd.f32 1.0, %v625_v33  ;;  %986 = vmatpush.msra.mxu1 %v975_v40  ;;  %v615_v18 = vadd.f32 1.1283791, %v614_v56 }
 0x193   :  { %v561_v51 = vmul.f32 %v560_v16, %v536_v0  ;;  %v664_v10 = vadd.f32 0.4994258, %v663_v42  ;;  %v653_v53 = vadd.f32 0.18741608, %v652_v27  ;;  %1388 = vmatpush.msra.mxu3 %v1834_v2  ;;  %v517_v2 = vmul.f32 0.5, %v1764_v60  ;;  %v969_v42 = vld [vmem:[#allocation7 + $0x220] sm:$0xff] }
 0x194   :  { %v590_v28 = vmul.f32 %v1417_v4, %v589_v7  ;;  %1418 = vrcp.f32 %v1930_v50  ;;  %987 = vmatpush.msra.mxu1 %v974_v30  ;;  %v616_v60 = vmul.f32 %v615_v18, %v1831_v63  ;;  %vm632_vm6 = vweird.f32 %v1930_v50 }
 0x195   :  { %v1368_v31 = vclamps-f32 %v561_v51, 1.0  ;;  %v665_v35 = vmul.f32 %v664_v10, %v1872_v47  ;;  %1389 = vmatpush.msra.mxu3 %v1840_v11  ;;  %v654_v59 = vmul.f32 %v653_v53, %v1872_v47  ;;  %v636_v21 = vand.u32 2147483647, %v1930_v50  ;;  %v965_v53 = vld [vmem:[#allocation7 + $0x200] sm:$0xff] }
 0x196   :  { %v591_v38 = vadd.f32 %v1417_v4, %v590_v28  ;;  %988 = vmatpush.msra.mxu1 %v973_v61  ;;  %v638_v26 = vand.u32 2147483648, %v1930_v50 }
 0x197   :  { %v684_v44 = vadd.f32 1.0, %v1368_v31  ;;  %v1932_v52 = vadd.f32 1.0, %v665_v35  ;;  %1390 = vmatpush.msra.mxu3 %v1860_v45  ;;  %v655_v1 = vadd.f32 1.1283791, %v654_v59  ;;  %vm637_vm11 = vcmp.eq.f32.partialorder %v636_v21, 8.507059e+37 }
 0x198   :  { %v595_v41 = vsel %vm594_vm14, %v1417_v4, %v591_v38  ;;  %v971_v4 = vld [vmem:[#allocation7 + $0x230] sm:$0xff]  ;;  %989 = vmatpush.msra.mxu1 %v972_v62  ;;  %v639_v33 = vor.u32 1.1754944e-38, %v638_v26  ;;  %v966_v38 = vld [vmem:[#allocation7 + $0x208] sm:$0xff] }
 0x199   :  { %v1936_v48 = vmul.f32 %v684_v44, %v516_v6  ;;  %v600_v23 = vsel %vm597_vm15, %v599_v46, %v595_v41  ;;  %1420 = vrcp.f32 %v1932_v52  ;;  %1391 = vmatpush.msra.mxu3 %v1865_v34  ;;  %vm672_vm7 = vweird.f32 %v1932_v52 }
 0x19a   :  { %v601_v36 = vmul.f32 %v600_v23, %v576_v39  ;;  %v1419_v58 = vpop.eup %1418  ;;  %990 = vmatpush.msra.mxu1 %v971_v4  ;;  %v678_v63 = vand.u32 2147483648, %v1932_v52  ;;  %v676_v29 = vand.u32 2147483647, %v1932_v52  ;;  %v656_v46 = vmul.f32 %v655_v1, %v1855_v25 }
 0x19b   :  { %v697_v54 = vrot.slane %v1936_v48, 6  ;;  %v628_v47 = vmul.f32 %v1419_v58, %v1930_v50  ;;  %1392 = vmatpush.msra.mxu3 %v1869_v43  ;;  %vm633_vm8 = vweird.f32 %v1419_v58 }
 0x19c   :  { %v1369_v3 = vclamps-f32 %v601_v36, 1.0  ;;  %991 = vmatpush.msra.mxu1 %v970_v9  ;;  %vm634_vm10 = vmor %vm632_vm6, %vm633_vm8  ;;  %v679_v44 = vor.u32 1.1754944e-38, %v678_v63  ;;  %vm677_vm13 = vcmp.eq.f32.partialorder %v676_v29, 8.507059e+37  ;;  %v518_v36 = vmul.f32 0.5, %v1811_v37 }
 0x19d   :  { %1373 = vmatmul.msk.f32.vlgmr.msrb.gmra.mxu2 %vm1651_vm3, %v697_v54  ;;  %v1954_v5 = vsel %vm99_vm0, 0.0, %v697_v54  ;;  %v629_v14 = vsub.f32 1.0, %v628_v47  ;;  %1393 = vmatpush.msra.mxu3 %v1877_v55 }
 0x19e   :  { %v685_v0 = vadd.f32 1.0, %v1369_v3  ;;  %v733_v34 = vrot.slane %v1954_v5, 1  ;;  %v822_v7 = vrot.slane %v1954_v5, 2  ;;  %v886_v10 = vrot.slane %v1954_v5, 3  ;;  %992 = vmatpush.msra.mxu1 %v969_v42 }
 0x19f   :  { %v1949_v57 = vpop.eup %1420  ;;  %v630_v51 = vmul.f32 %v1419_v58, %v629_v14  ;;  %1394 = vmatpush.msra.mxu3 %v1885_v8  ;;  %v950_v42 = vrot.slane %v1954_v5, 4 }
 0x1a0   :  { %v1951_v11 = vmul.f32 %v685_v0, %v517_v2  ;;  %v668_v45 = vmul.f32 %v1949_v57, %v1932_v52  ;;  %vm673_vm9 = vweird.f32 %v1949_v57  ;;  %993 = vmatpush.msra.mxu1 %v968_v24 }
 0x1a1   :  { %v631_v28 = vadd.f32 %v1419_v58, %v630_v51  ;;  %vm674_vm12 = vmor %vm672_vm7, %vm673_vm9  ;;  %1395 = vmatpush.msra.mxu3 %v1890_v17  ;;  %v519_v17 = vmul.f32 0.5, %v1848_v20 }
 0x1a2   :  { %v698_v13 = vrot.slane %v1951_v11, 6  ;;  %v669_v15 = vsub.f32 1.0, %v668_v45  ;;  %994 = vmatpush.msra.mxu1 %v967_v19 }
 0x1a3   :  { %v635_v35 = vsel %vm634_vm10, %v1419_v58, %v631_v28 }
 0x1a4   :  { %v1970_v16 = vsel %vm99_vm0, %v697_v54, %v698_v13  ;;  %v670_v49 = vmul.f32 %v1949_v57, %v669_v15  ;;  %v1992_v8 = vsel %vm99_vm0, %v698_v13, 0.0  ;;  %v640_v40 = vsel %vm637_vm11, %v639_v33, %v635_v35  ;;  %995 = vmatpush.msra.mxu1 %v966_v38 }
 0x1a5   :  { %812 = vmatmul.f32.gmra.mxu2 %v1970_v16  ;;  %v734_v43 = vrot.slane %v1970_v16, 1  ;;  %v823_v22 = vrot.slane %v1970_v16, 2  ;;  %v887_v27 = vrot.slane %v1970_v16, 3  ;;  %v641_v50 = vmul.f32 %v640_v40, %v616_v60 }
 0x1a6   :  { %v671_v6 = vadd.f32 %v1949_v57, %v670_v49  ;;  %v736_v41 = vrot.slane %v1992_v8, 1  ;;  %v825_v30 = vrot.slane %v1992_v8, 2  ;;  %996 = vmatpush.msra.mxu1 %v965_v53  ;;  %v889_v21 = vrot.slane %v1992_v8, 3 }
 0x1a7   :  { %v735_v55 = vsel %vm136_vm1, %v733_v34, %v734_v43  ;;  %v824_v31 = vsel %vm226_vm2, %v822_v7, %v823_v22  ;;  %v888_v32 = vsel %vm291_vm4, %v886_v10, %v887_v27  ;;  %v1370_v56 = vclamps-f32 %v641_v50, 1.0 }
 0x1a8   :  { %780 = vmatmul.f32.vlgmr.msrb.gmra.mxu1 %v735_v55  ;;  %869 = vmatmul.f32.vlgmr.msrb.gmra.mxu3 %v824_v31  ;;  %v675_v39 = vsel %vm674_vm12, %v1949_v57, %v671_v6  ;;  %v737_v3 = vsel %vm136_vm1, %v734_v43, %v736_v41  ;;  %v826_v61 = vsel %vm226_vm2, %v823_v22, %v825_v30  ;;  %v951_v26 = vrot.slane %v1970_v16, 4 }
 0x1a9   :  { %933 = vmatmul.f32.vlgmr.msra.gmra.mxu0 %v888_v32  ;;  %v680_v23 = vsel %vm677_vm13, %v679_v44, %v675_v39  ;;  %v686_v54 = vadd.f32 1.0, %v1370_v56  ;;  %v890_v34 = vsel %vm291_vm4, %v887_v27, %v889_v21  ;;  %v953_v7 = vrot.slane %v1992_v8, 4  ;;  %v1404_v39 = vld [vmem:[%s2194_s4] ss:$0 sm:$0xff] }
 0x1aa   :  { %v681_v52 = vmul.f32 %v680_v23, %v656_v46  ;;  %v952_v15 = vsel %vm356_vm5, %v950_v42, %v951_v26 }
 0x1ab   :  { %v2008_v62 = vmul.f32 %v686_v54, %v518_v36  ;;  %v954_v43 = vsel %vm356_vm5, %v951_v26, %v953_v7 }
 0x1ac   :  { %v1371_v25 = vclamps-f32 %v681_v52, 1.0 }
 0x1ad   :  { %v700_v18 = vrot.slane %v2008_v62, 6 }
 0x1ae   :  { %v687_v59 = vadd.f32 1.0, %v1371_v25 }
 0x1af   :  { %v710_v0 = vsel %vm99_vm0, 0.0, %v700_v18  ;;  %1375 = vmatmul.msk.f32.gmra.mxu2 %vm1651_vm3, %v700_v18 }
 0x1b0   :  { %783 = vmatmul.f32.gmra.mxu1 %v737_v3  ;;  %872 = vmatmul.f32.gmra.mxu3 %v826_v61  ;;  %v2011_v2 = vmul.f32 %v687_v59, %v519_v17  ;;  %v738_v58 = vrot.slane %v710_v0, 1  ;;  %v827_v57 = vrot.slane %v710_v0, 2  ;;  %v891_v51 = vrot.slane %v710_v0, 3 }
 0x1b1   :  { %v955_v10 = vrot.slane %v710_v0, 4 }
 0x1b2   :  { %v701_v37 = vrot.slane %v2011_v2, 6 }
 0x1b4   :  { %v702_v4 = vsel %vm99_vm0, %v700_v18, %v701_v37  ;;  %v712_v60 = vsel %vm99_vm0, %v701_v37, 0.0 }
 0x1b5   :  { %v739_v20 = vrot.slane %v702_v4, 1  ;;  %v828_v47 = vrot.slane %v702_v4, 2  ;;  %v741_v45 = vrot.slane %v712_v60, 1  ;;  %v830_v12 = vrot.slane %v712_v60, 2 }
 0x1b6   :  { %v892_v63 = vrot.slane %v702_v4, 3  ;;  %v894_v22 = vrot.slane %v712_v60, 3  ;;  %v956_v5 = vrot.slane %v702_v4, 4  ;;  %v958_v28 = vrot.slane %v712_v60, 4 }
 0x1b7   :  { %v740_v9 = vsel %vm136_vm1, %v738_v58, %v739_v20  ;;  %v829_v1 = vsel %vm226_vm2, %v827_v57, %v828_v47  ;;  %818 = vmatmul.f32.gmra.mxu2 %v702_v4  ;;  %v742_v13 = vsel %vm136_vm1, %v739_v20, %v741_v45  ;;  %v831_v14 = vsel %vm226_vm2, %v828_v47, %v830_v12 }
 0x1b8   :  { %786 = vmatmul.f32.gmra.mxu1 %v740_v9  ;;  %875 = vmatmul.f32.gmra.mxu3 %v829_v1  ;;  %v893_v24 = vsel %vm291_vm4, %v891_v51, %v892_v63  ;;  %v895_v16 = vsel %vm291_vm4, %v892_v63, %v894_v22  ;;  %v957_v27 = vsel %vm356_vm5, %v955_v10, %v956_v5 }
 0x1b9   :  { %v959_v49 = vsel %vm356_vm5, %v956_v5, %v958_v28 }
 0x1c0   :  { %789 = vmatmul.f32.gmra.mxu1 %v742_v13  ;;  %878 = vmatmul.f32.gmra.mxu3 %v831_v14 }
 0x1c8   :  { %936 = vmatmul.f32.vlgmr.msra.gmra.mxu3 %v890_v34  ;;  %997 = vmatmul.f32.vlgmr.msra.gmra.mxu1 %v952_v15 }
 0x1d0   :  { %939 = vmatmul.f32.gmra.mxu3 %v893_v24  ;;  %1000 = vmatmul.f32.gmra.mxu1 %v954_v43 }
 0x1d8   :  { %942 = vmatmul.f32.gmra.mxu3 %v895_v16  ;;  %1003 = vmatmul.f32.gmra.mxu1 %v957_v27 }
 0x1e0   :  { %1006 = vmatmul.f32.gmra.mxu1 %v959_v49 }
 0x220   :  { %v810_v33 = vpop.f32.mrf.mxu2 }
 0x225   :  { %v781_v29 = vpop.f32.mrf.mxu1 }
 0x226   :  { %v811_v6 = vadd.f32 %v810_v33, %v781_v29  ;;  %v934_v40 = vpop.f32.mrf.mxu0 }
 0x228   :  { %v813_v44 = vpop.f32.mrf.mxu2 }
 0x22b   :  { %v870_v19 = vpop.f32.mrf.mxu3 }
 0x22c   :  { %v882_v38 = vadd.f32 %v870_v19, %v811_v6 }
 0x22d   :  { %v784_v55 = vpop.f32.mrf.mxu1 }
 0x22e   :  { %v946_v50 = vadd.f32 %v934_v40, %v882_v38  ;;  %v814_v30 = vadd.f32 %v813_v44, %v784_v55  ;;  %v1305_v55 = vld [vmem:[#allocation8 + $0x78] sm:$0xff]  ;;  %v1302_v44 = vld [vmem:[#allocation8 + $0x60] sm:$0xff] }
 0x22f   :  { %1309 = vmatpush.msra.mxu2 %v1305_v55 }
 0x232   :  { %v816_v25 = vpop.f32.mrf.mxu2 }
 0x233   :  { %v873_v31 = vpop.f32.mrf.mxu3 }
 0x234   :  { %v883_v56 = vadd.f32 %v873_v31, %v814_v30  ;;  %v1304_v31 = vld [vmem:[#allocation8 + $0x70] sm:$0xff] }
 0x235   :  { %v787_v32 = vpop.f32.mrf.mxu1  ;;  %1310 = vmatpush.msra.mxu2 %v1304_v31 }
 0x236   :  { %v817_v17 = vadd.f32 %v816_v25, %v787_v32 }
 0x23a   :  { %v819_v57 = vpop.f32.mrf.mxu2 }
 0x23b   :  { %v876_v35 = vpop.f32.mrf.mxu3 }
 0x23c   :  { %v884_v18 = vadd.f32 %v876_v35, %v817_v17 }
 0x23d   :  { %v790_v8 = vpop.f32.mrf.mxu1 }
 0x23e   :  { %v820_v47 = vadd.f32 %v819_v57, %v790_v8  ;;  %v1303_v8 = vld [vmem:[#allocation8 + $0x68] sm:$0xff] }
 0x23f   :  { %1311 = vmatpush.msra.mxu2 %v1303_v8 }
 0x241   :  { %1312 = vmatpush.msra.mxu2 %v1302_v44  ;;  %v1291_v44 = vld [vmem:[#allocation8 + $0x8] sm:$0xff] }
 0x243   :  { %v879_v46 = vpop.f32.mrf.mxu3 }
 0x244   :  { %v885_v1 = vadd.f32 %v879_v46, %v820_v47 }
 0x245   :  { %v998_v53 = vpop.f32.mrf.mxu1 }
 0x246   :  { %v1010_v41 = vadd.f32 %v998_v53, %v946_v50 }
 0x248   :  { %v2039_v23 = vadd.f32 %v1404_v39, %v1010_v41 }
 0x24a   :  { %1021 = vadd.xlane.f32.xlu2 %v2039_v23  ;;  %v1033_v52 = vmul.f32 %v2039_v23, %v2039_v23 }
 0x24b   :  { %v937_v36 = vpop.f32.mrf.mxu3 }
 0x24c   :  { %v947_v54 = vadd.f32 %v937_v36, %v883_v56  ;;  %1037 = vadd.xlane.f32.xlu0 %v1033_v52  ;;  %v1300_v36 = vld [vmem:[#allocation8 + $0x50] sm:$0xff] }
 0x24d   :  { %v1001_v3 = vpop.f32.mrf.mxu1 }
 0x24e   :  { %v1011_v61 = vadd.f32 %v1001_v3, %v947_v54 }
 0x250   :  { %v2044_v59 = vadd.f32 %v1404_v39, %v1011_v61 }
 0x252   :  { %1023 = vadd.xlane.f32.xlu1 %v2044_v59  ;;  %v1034_v0 = vmul.f32 %v2044_v59, %v2044_v59 }
 0x253   :  { %v940_v37 = vpop.f32.mrf.mxu3 }
 0x254   :  { %v948_v4 = vadd.f32 %v940_v37, %v884_v18  ;;  %1039 = vadd.xlane.f32.xlu2 %v1034_v0  ;;  %v1299_v18 = vld [vmem:[#allocation8 + $0x48] sm:$0xff] }
 0x255   :  { %v1004_v58 = vpop.f32.mrf.mxu1 }
 0x256   :  { %v1012_v20 = vadd.f32 %v1004_v58, %v948_v4 }
 0x258   :  { %v2049_v9 = vadd.f32 %v1404_v39, %v1012_v20  ;;  %v1298_v20 = vld [vmem:[#allocation8 + $0x40] sm:$0xff] }
 0x25a   :  { %1025 = vadd.xlane.f32.xlu0 %v2049_v9  ;;  %v1035_v60 = vmul.f32 %v2049_v9, %v2049_v9 }
 0x25b   :  { %v943_v45 = vpop.f32.mrf.mxu3 }
 0x25c   :  { %v949_v12 = vadd.f32 %v943_v45, %v885_v1  ;;  %1041 = vadd.xlane.f32.xlu1 %v1035_v60  ;;  %v1297_v1 = vld [vmem:[#allocation8 + $0x38] sm:$0xff] }
 0x25d   :  { %v1007_v13 = vpop.f32.mrf.mxu1 }
 0x25e   :  { %v1013_v14 = vadd.f32 %v1007_v13, %v949_v12 }
 0x260   :  { %v2054_v21 = vadd.f32 %v1404_v39, %v1013_v14  ;;  %v1301_v39 = vld [vmem:[#allocation8 + $0x58] sm:$0xff] }
 0x261   :  { %1313 = vmatpush.msra.mxu2 %v1301_v39 }
 0x262   :  { %1027 = vadd.xlane.f32.xlu2 %v2054_v21  ;;  %v1036_v26 = vmul.f32 %v2054_v21, %v2054_v21 }
 0x263   :  { %1314 = vmatpush.msra.mxu2 %v1300_v36 }
 0x264   :  { %1043 = vadd.xlane.f32.xlu0 %v1036_v26  ;;  %v1296_v26 = vld [vmem:[#allocation8 + $0x30] sm:$0xff] }
 0x265   :  { %1315 = vmatpush.msra.mxu2 %v1299_v18 }
 0x267   :  { %1316 = vmatpush.msra.mxu2 %v1298_v20 }
 0x269   :  { %1317 = vmatpush.msra.mxu2 %v1297_v1 }
 0x26b   :  { %1318 = vmatpush.msra.mxu2 %v1296_v26 }
 0x2bd   :  { %v1022_v42 = vpop.xlane.xlu2 %1021 }
 0x2be   :  { %v1029_v34 = vmul.f32 0.03125, %v1022_v42 }
 0x2bf   :  { %v1038_v15 = vpop.xlane.xlu0 %1037 }
 0x2c0   :  { %v1049_v63 = vmul.f32 %v1029_v34, %v1029_v34  ;;  %v1045_v7 = vmul.f32 0.03125, %v1038_v15  ;;  %v1057_v54 = vsub.f32 %v2039_v23, %v1029_v34 }
 0x2c2   :  { %v1053_v51 = vsub.f32 %v1045_v7, %v1049_v63  ;;  %v1295_v63 = vld [vmem:[#allocation8 + $0x28] sm:$0xff] }
 0x2c3   :  { %1319 = vmatpush.msra.mxu2 %v1295_v63 }
 0x2c4   :  { %v1061_v24 = vadd.f32 1e-05, %v1053_v51 }
 0x2c5   :  { %v1024_v43 = vpop.xlane.xlu1 %1023 }
 0x2c6   :  { %1422 = vrsqrt.f32 %v1061_v24  ;;  %v2059_v22 = vmul.f32 0.03125, %v1024_v43  ;;  %vm1071_vm1 = vweird.f32 %v1061_v24 }
 0x2c7   :  { %v1040_v5 = vpop.xlane.xlu2 %1039 }
 0x2c8   :  { %v1050_v10 = vmul.f32 %v2059_v22, %v2059_v22  ;;  %v1046_v16 = vmul.f32 0.03125, %v1040_v5  ;;  %v1058_v34 = vsub.f32 %v2044_v59, %v2059_v22  ;;  %v1293_v22 = vld [vmem:[#allocation8 + $0x18] sm:$0xff] }
 0x2ca   :  { %v1054_v27 = vsub.f32 %v1046_v16, %v1050_v10  ;;  %v1294_v10 = vld [vmem:[#allocation8 + $0x20] sm:$0xff] }
 0x2cb   :  { %1320 = vmatpush.msra.mxu2 %v1294_v10 }
 0x2cc   :  { %v1423_v28 = vpop.eup %1422  ;;  %v1062_v49 = vadd.f32 1e-05, %v1054_v27 }
 0x2cd   :  { %v1066_v29 = vmul.f32 %v1423_v28, %v1061_v24  ;;  %v1026_v19 = vpop.xlane.xlu0 %1025  ;;  %vm1072_vm0 = vweird.f32 %v1423_v28  ;;  %1321 = vmatpush.msra.mxu2 %v1293_v22 }
 0x2ce   :  { %1424 = vrsqrt.f32 %v1062_v49  ;;  %v2063_v32 = vmul.f32 0.03125, %v1026_v19  ;;  %vm1073_vm2 = vmor %vm1071_vm1, %vm1072_vm0  ;;  %vm1081_vm4 = vweird.f32 %v1062_v49 }
 0x2cf   :  { %v1067_v33 = vmul.f32 %v1423_v28, %v1066_v29  ;;  %v1042_v35 = vpop.xlane.xlu1 %1041 }
 0x2d0   :  { %v1051_v6 = vmul.f32 %v2063_v32, %v2063_v32  ;;  %v1047_v38 = vmul.f32 0.03125, %v1042_v35  ;;  %v1059_v8 = vsub.f32 %v2049_v9, %v2063_v32 }
 0x2d1   :  { %v1068_v40 = vmul.f32 0.5, %v1067_v33  ;;  %v1292_v33 = vld [vmem:[#allocation8 + $0x10] sm:$0xff] }
 0x2d2   :  { %v1055_v46 = vsub.f32 %v1047_v38, %v1051_v6  ;;  %1322 = vmatpush.msra.mxu2 %v1292_v33 }
 0x2d3   :  { %v1069_v50 = vsub.f32 1.5, %v1068_v40 }
 0x2d4   :  { %v1425_v53 = vpop.eup %1424  ;;  %v2067_v41 = vadd.f32 1e-05, %v1055_v46  ;;  %1323 = vmatpush.msra.mxu2 %v1291_v44 }
 0x2d5   :  { %v1070_v30 = vmul.f32 %v1423_v28, %v1069_v50  ;;  %v1076_v56 = vmul.f32 %v1425_v53, %v1062_v49  ;;  %v1028_v52 = vpop.xlane.xlu2 %1027  ;;  %vm1082_vm3 = vweird.f32 %v1425_v53 }
 0x2d6   :  { %1426 = vrsqrt.f32 %v2067_v41  ;;  %v2071_v25 = vmul.f32 0.03125, %v1028_v52  ;;  %vm1083_vm5 = vmor %vm1081_vm4, %vm1082_vm3  ;;  %vm1091_vm15 = vweird.f32 %v2067_v41 }
 0x2d7   :  { %v1074_v3 = vsel %vm1073_vm2, %v1423_v28, %v1070_v30  ;;  %v1077_v61 = vmul.f32 %v1425_v53, %v1076_v56  ;;  %v1044_v17 = vpop.xlane.xlu0 %1043  ;;  %v1290_v30 = vld [vmem:[#allocation8] sm:$0xff] }
 0x2d8   :  { %v2073_v0 = vmul.f32 %v1074_v3, %v1057_v54  ;;  %v1052_v37 = vmul.f32 %v2071_v25, %v2071_v25  ;;  %v1048_v4 = vmul.f32 0.03125, %v1044_v17  ;;  %1324 = vmatpush.msra.mxu2 %v1290_v30 }
 0x2d9   :  { %v1078_v58 = vmul.f32 0.5, %v1077_v61 }
 0x2da   :  { %v2078_v23 = vmul.f32 0.70710677, %v2073_v0  ;;  %v1056_v57 = vsub.f32 %v1048_v4, %v1052_v37 }
 0x2db   :  { %v1079_v47 = vsub.f32 1.5, %v1078_v58 }
 0x2dc   :  { %v1427_v60 = vpop.eup %1426  ;;  %v1117_v45 = vmul.f32 %v2078_v23, %v2078_v23  ;;  %v2082_v12 = vadd.f32 1e-05, %v1056_v57 }
 0x2dd   :  { %v1080_v13 = vmul.f32 %v1425_v53, %v1079_v47  ;;  %v1086_v14 = vmul.f32 %v1427_v60, %v2067_v41  ;;  %vm1092_vm14 = vweird.f32 %v1427_v60 }
 0x2de   :  { %v2085_v42 = vmin.f32 %v1117_v45, 16.0  ;;  %1428 = vrsqrt.f32 %v2082_v12  ;;  %vm1093_vm6 = vmor %vm1091_vm15, %vm1092_vm14  ;;  %vm1101_vm8 = vweird.f32 %v2082_v12 }
 0x2df   :  { %v1087_v15 = vmul.f32 %v1427_v60, %v1086_v14  ;;  %v1084_v7 = vsel %vm1083_vm5, %v1425_v53, %v1080_v13 }
 0x2e0   :  { %v1119_v51 = vmul.f32 2.1237322e-06, %v2085_v42  ;;  %v1130_v24 = vmul.f32 3.8918573e-05, %v2085_v42  ;;  %v2092_v43 = vmul.f32 %v1084_v7, %v1058_v34 }
 0x2e1   :  { %v1088_v5 = vmul.f32 0.5, %v1087_v15 }
 0x2e2   :  { %v1120_v16 = vadd.f32 0.00028619796, %v1119_v51  ;;  %v1131_v27 = vadd.f32 0.001143296, %v1130_v24  ;;  %v2095_v28 = vmul.f32 0.70710677, %v2092_v43 }
 0x2e3   :  { %v1089_v59 = vsub.f32 1.5, %v1088_v5 }
 0x2e4   :  { %v1429_v49 = vpop.eup %1428  ;;  %v1121_v29 = vmul.f32 %v1120_v16, %v2085_v42  ;;  %v1132_v19 = vmul.f32 %v1131_v27, %v2085_v42  ;;  %v1157_v35 = vmul.f32 %v2095_v28, %v2095_v28 }
 0x2e5   :  { %v1090_v55 = vmul.f32 %v1427_v60, %v1089_v59  ;;  %v1096_v31 = vmul.f32 %v1429_v49, %v2082_v12  ;;  %vm1102_vm7 = vweird.f32 %v1429_v49 }
 0x2e6   :  { %v1122_v6 = vadd.f32 0.0036580483, %v1121_v29  ;;  %v1133_v38 = vadd.f32 0.014752088, %v1132_v19  ;;  %v2105_v46 = vmin.f32 %v1157_v35, 16.0  ;;  %vm1103_vm9 = vmor %vm1101_vm8, %vm1102_vm7 }
 0x2e7   :  { %v1097_v40 = vmul.f32 %v1429_v49, %v1096_v31  ;;  %v1094_v50 = vsel %vm1093_vm6, %v1427_v60, %v1090_v55  ;;  %v1060_v60 = vsub.f32 %v2054_v21, %v2071_v25 }
 0x2e8   :  { %v1134_v39 = vmul.f32 %v1133_v38, %v2085_v42  ;;  %v2108_v53 = vmul.f32 %v1094_v50, %v1059_v8  ;;  %v1123_v56 = vmul.f32 %v1122_v6, %v2085_v42  ;;  %v1159_v9 = vmul.f32 2.1237322e-06, %v2105_v46 }
 0x2e9   :  { %v1098_v41 = vmul.f32 0.5, %v1097_v40  ;;  %v1170_v32 = vmul.f32 3.8918573e-05, %v2105_v46 }
 0x2ea   :  { %v1135_v52 = vadd.f32 0.112945676, %v1134_v39  ;;  %v1160_v54 = vadd.f32 0.00028619796, %v1159_v9  ;;  %v2116_v17 = vmul.f32 0.70710677, %v2108_v53 }
 0x2eb   :  { %v1099_v36 = vsub.f32 1.5, %v1098_v41  ;;  %v1171_v3 = vadd.f32 0.001143296, %v1170_v32  ;;  %v1124_v37 = vadd.f32 0.05243302, %v1123_v56 }
 0x2ec   :  { %v1136_v61 = vmul.f32 %v1135_v52, %v2085_v42  ;;  %v1161_v4 = vmul.f32 %v1160_v54, %v2105_v46  ;;  %v1197_v57 = vmul.f32 %v2116_v17, %v2116_v17 }
 0x2ed   :  { %v1100_v18 = vmul.f32 %v1429_v49, %v1099_v36  ;;  %v1172_v58 = vmul.f32 %v1171_v3, %v2105_v46  ;;  %v1125_v14 = vmul.f32 %v1124_v37, %v2085_v42 }
 0x2ee   :  { %v1137_v20 = vadd.f32 0.4994258, %v1136_v61  ;;  %v1162_v12 = vadd.f32 0.0036580483, %v1161_v4  ;;  %v2125_v13 = vmin.f32 %v1197_v57, 16.0 }
 0x2ef   :  { %v1173_v47 = vadd.f32 0.014752088, %v1172_v58  ;;  %v1104_v1 = vsel %vm1103_vm9, %v1429_v49, %v1100_v18  ;;  %v1126_v25 = vadd.f32 0.18741608, %v1125_v14 }
 0x2f0   :  { %v1138_v45 = vmul.f32 %v1137_v20, %v2085_v42  ;;  %v1199_v15 = vmul.f32 2.1237322e-06, %v2125_v13  ;;  %v2130_v63 = vmul.f32 %v1104_v1, %v1060_v60  ;;  %v1210_v51 = vmul.f32 3.8918573e-05, %v2125_v13 }
 0x2f1   :  { %v1174_v26 = vmul.f32 %v1173_v47, %v2105_v46  ;;  %v1163_v21 = vmul.f32 %v1162_v12, %v2105_v46  ;;  %v1127_v19 = vmul.f32 %v1126_v25, %v2085_v42 }
 0x2f2   :  { %v1139_v34 = vadd.f32 1.0, %v1138_v45  ;;  %v1200_v5 = vadd.f32 0.00028619796, %v1199_v15  ;;  %v1211_v10 = vadd.f32 0.001143296, %v1210_v51 }
 0x2f3   :  { %v1175_v7 = vadd.f32 0.112945676, %v1174_v26  ;;  %v2136_v16 = vmul.f32 0.70710677, %v2130_v63  ;;  %v1164_v22 = vadd.f32 0.05243302, %v1163_v21 }
 0x2f4   :  { %1430 = vrcp.f32 %v1139_v34  ;;  %v1201_v59 = vmul.f32 %v1200_v5, %v2125_v13  ;;  %v1212_v49 = vmul.f32 %v1211_v10, %v2125_v13  ;;  %v1128_v41 = vadd.f32 1.1283791, %v1127_v19 }
 0x2f5   :  { %v1176_v24 = vmul.f32 %v1175_v7, %v2105_v46  ;;  %v1237_v29 = vmul.f32 %v2136_v16, %v2136_v16  ;;  %v1165_v40 = vmul.f32 %v1164_v22, %v2105_v46  ;;  %v1149_v42 = vand.u32 2147483647, %v1139_v34 }
 0x2f6   :  { %v1202_v33 = vadd.f32 0.0036580483, %v1201_v59  ;;  %v1213_v35 = vadd.f32 0.014752088, %v1212_v49  ;;  %v1151_v56 = vand.u32 2147483648, %v1139_v34  ;;  %vm1145_vm11 = vweird.f32 %v1139_v34 }
 0x2f7   :  { %v1177_v27 = vadd.f32 0.4994258, %v1176_v24  ;;  %v2144_v8 = vmin.f32 %v1237_v29, 16.0  ;;  %v1166_v3 = vadd.f32 0.18741608, %v1165_v40  ;;  %v1129_v58 = vmul.f32 %v1128_v41, %v2078_v23 }
 0x2f8   :  { %v1214_v44 = vmul.f32 %v1213_v35, %v2125_v13  ;;  %v1203_v9 = vmul.f32 %v1202_v33, %v2125_v13  ;;  %vm1150_vm13 = vcmp.eq.f32.partialorder %v1149_v42, 8.507059e+37  ;;  %v1152_v20 = vor.u32 1.1754944e-38, %v1151_v56 }
 0x2f9   :  { %v1178_v55 = vmul.f32 %v1177_v27, %v2105_v46  ;;  %v1239_v50 = vmul.f32 2.1237322e-06, %v2144_v8  ;;  %v1250_v39 = vmul.f32 3.8918573e-05, %v2144_v8  ;;  %v1167_v14 = vmul.f32 %v1166_v3, %v2105_v46 }
 0x2fa   :  { %v1431_v31 = vpop.eup %1430  ;;  %v1215_v52 = vadd.f32 0.112945676, %v1214_v44  ;;  %v1204_v1 = vadd.f32 0.05243302, %v1203_v9  ;;  %v1109_v46 = vmul.f32 0.5, %v2073_v0 }
 0x2fb   :  { %v1141_v6 = vmul.f32 %v1431_v31, %v1139_v34  ;;  %v1179_v38 = vadd.f32 1.0, %v1178_v55  ;;  %vm1146_vm10 = vweird.f32 %v1431_v31  ;;  %v1240_v36 = vadd.f32 0.00028619796, %v1239_v50 }
 0x2fc   :  { %v1251_v54 = vadd.f32 0.001143296, %v1250_v39  ;;  %v1216_v18 = vmul.f32 %v1215_v52, %v2125_v13  ;;  %vm1147_vm12 = vmor %vm1145_vm11, %vm1146_vm10  ;;  %v1205_v24 = vmul.f32 %v1204_v1, %v2125_v13  ;;  %v1168_v27 = vadd.f32 1.1283791, %v1167_v14 }
 0x2fd   :  { %v1142_v30 = vsub.f32 1.0, %v1141_v6  ;;  %1432 = vrcp.f32 %v1179_v38  ;;  %v1241_v37 = vmul.f32 %v1240_v36, %v2144_v8  ;;  %v1191_v21 = vand.u32 2147483648, %v1179_v38 }
 0x2fe   :  { %v1252_v4 = vmul.f32 %v1251_v54, %v2144_v8  ;;  %v1217_v60 = vadd.f32 0.4994258, %v1216_v18  ;;  %v1189_v22 = vand.u32 2147483647, %v1179_v38  ;;  %vm1185_vm1 = vweird.f32 %v1179_v38 }
 0x2ff   :  { %v1143_v32 = vmul.f32 %v1431_v31, %v1142_v30  ;;  %v1242_v7 = vadd.f32 0.0036580483, %v1241_v37  ;;  %v1192_v33 = vor.u32 1.1754944e-38, %v1191_v21  ;;  %v1206_v35 = vadd.f32 0.18741608, %v1205_v24 }
 0x300   :  { %v1253_v45 = vadd.f32 0.014752088, %v1252_v4  ;;  %v1218_v15 = vmul.f32 %v1217_v60, %v2125_v13  ;;  %v1169_v6 = vmul.f32 %v1168_v27, %v2095_v28  ;;  %vm1190_vm3 = vcmp.eq.f32.partialorder %v1189_v22, 8.507059e+37 }
 0x301   :  { %v1144_v61 = vadd.f32 %v1431_v31, %v1143_v32  ;;  %v1243_v29 = vmul.f32 %v1242_v7, %v2144_v8  ;;  %v1110_v28 = vmul.f32 0.5, %v2092_v43  ;;  %vm1338_vm10 = vcmask 130048  }
 0x302   :  { %v1254_v51 = vmul.f32 %v1253_v45, %v2144_v8  ;;  %v1219_v5 = vadd.f32 1.0, %v1218_v15 }
 0x303   :  { %v1433_v57 = vpop.eup %1432  ;;  %v1148_v47 = vsel %vm1147_vm12, %v1431_v31, %v1144_v61  ;;  %v1244_v39 = vadd.f32 0.05243302, %v1243_v29  ;;  %v1405_v29 = vld [vmem:[%s2196_s6] ss:$0 sm:$0xff] }
 0x304   :  { %v1153_v12 = vsel %vm1150_vm13, %v1152_v20, %v1148_v47  ;;  %v1181_v26 = vmul.f32 %v1433_v57, %v1179_v38  ;;  %v1255_v10 = vadd.f32 0.112945676, %v1254_v51  ;;  %vm1186_vm0 = vweird.f32 %v1433_v57 }
 0x305   :  { %v1154_v34 = vmul.f32 %v1153_v12, %v1129_v58  ;;  %1434 = vrcp.f32 %v1219_v5  ;;  %vm1187_vm2 = vmor %vm1185_vm1, %vm1186_vm0  ;;  %v1207_v38 = vmul.f32 %v1206_v35, %v2125_v13  ;;  %v1245_v32 = vmul.f32 %v1244_v39, %v2144_v8 }
 0x306   :  { %v1182_v23 = vsub.f32 1.0, %v1181_v26  ;;  %v1256_v55 = vmul.f32 %v1255_v10, %v2144_v8  ;;  %v1229_v37 = vand.u32 2147483647, %v1219_v5  ;;  %vm1225_vm5 = vweird.f32 %v1219_v5 }
 0x307   :  { %v1376_v25 = vclamps-f32 %v1154_v34, 1.0  ;;  %v1208_v3 = vadd.f32 1.1283791, %v1207_v38  ;;  %v1246_v4 = vadd.f32 0.18741608, %v1245_v32  ;;  %v1111_v34 = vmul.f32 0.5, %v2108_v53 }
 0x308   :  { %v1183_v59 = vmul.f32 %v1433_v57, %v1182_v23  ;;  %v1257_v44 = vadd.f32 0.4994258, %v1256_v55  ;;  %vm1230_vm15 = vcmp.eq.f32.partialorder %v1229_v37, 8.507059e+37 }
 0x309   :  { %v1277_v49 = vadd.f32 1.0, %v1376_v25  ;;  %v1247_v60 = vmul.f32 %v1246_v4, %v2144_v8 }
 0x30a   :  { %v1184_v19 = vadd.f32 %v1433_v57, %v1183_v59  ;;  %v1258_v30 = vmul.f32 %v1257_v44, %v2144_v8  ;;  %v1112_v59 = vmul.f32 0.5, %v2130_v63 }
 0x30b   :  { %v1281_v31 = vmul.f32 %v1277_v49, %v1109_v46  ;;  %v1435_v42 = vpop.eup %1434 }
 0x30c   :  { %v1188_v40 = vsel %vm1187_vm2, %v1433_v57, %v1184_v19  ;;  %v1221_v9 = vmul.f32 %v1435_v42, %v1219_v5  ;;  %v1259_v52 = vadd.f32 1.0, %v1258_v30  ;;  %vm1226_vm4 = vweird.f32 %v1435_v42 }
 0x30d   :  { %v1285_v50 = vadd.f32 %v1281_v31, %v1936_v48  ;;  %v1193_v0 = vsel %vm1190_vm3, %v1192_v33, %v1188_v40  ;;  %v1231_v48 = vand.u32 2147483648, %v1219_v5  ;;  %vm1227_vm14 = vmor %vm1225_vm5, %vm1226_vm4  ;;  %v1209_v57 = vmul.f32 %v1208_v3, %v2116_v17 }
 0x30e   :  { %v1194_v41 = vmul.f32 %v1193_v0, %v1169_v6  ;;  %v1222_v54 = vsub.f32 1.0, %v1221_v9  ;;  %1436 = vrcp.f32 %v1259_v52  ;;  %v1271_v15 = vand.u32 2147483648, %v1259_v52 }
 0x30f   :  { %1325 = vmatmul.f32.vlgmr.msra.gmra.mxu2 %v1285_v50  ;;  %v1232_v20 = vor.u32 1.1754944e-38, %v1231_v48  ;;  %v1269_v23 = vand.u32 2147483647, %v1259_v52  ;;  %vm1265_vm7 = vweird.f32 %v1259_v52 }
 0x310   :  { %v1377_v56 = vclamps-f32 %v1194_v41, 1.0  ;;  %v1223_v18 = vmul.f32 %v1435_v42, %v1222_v54  ;;  %v1272_v25 = vor.u32 1.1754944e-38, %v1271_v15 }
 0x311   :  { %vm1270_vm9 = vcmp.eq.f32.partialorder %v1269_v23, 8.507059e+37 }
 0x312   :  { %v1278_v36 = vadd.f32 1.0, %v1377_v56  ;;  %v1224_v13 = vadd.f32 %v1435_v42, %v1223_v18 }
 0x314   :  { %v1282_v61 = vmul.f32 %v1278_v36, %v1110_v28  ;;  %v1228_v43 = vsel %vm1227_vm14, %v1435_v42, %v1224_v13  ;;  %v1437_v47 = vpop.eup %1436 }
 0x315   :  { %v1233_v1 = vsel %vm1230_vm15, %v1232_v20, %v1228_v43  ;;  %v1261_v12 = vmul.f32 %v1437_v47, %v1259_v52  ;;  %vm1266_vm6 = vweird.f32 %v1437_v47 }
 0x316   :  { %v1286_v58 = vadd.f32 %v1282_v61, %v1951_v11  ;;  %v1234_v45 = vmul.f32 %v1233_v1, %v1209_v57  ;;  %v1248_v11 = vadd.f32 1.1283791, %v1247_v60  ;;  %vm1267_vm8 = vmor %vm1265_vm7, %vm1266_vm6 }
 0x317   :  { %v1262_v26 = vsub.f32 1.0, %v1261_v12 }
 0x318   :  { %1328 = vmatmul.f32.gmra.mxu2 %v1286_v58  ;;  %v1378_v14 = vclamps-f32 %v1234_v45, 1.0  ;;  %v1249_v8 = vmul.f32 %v1248_v11, %v2136_v16 }
 0x319   :  { %v1263_v51 = vmul.f32 %v1437_v47, %v1262_v26 }
 0x31a   :  { %v1279_v7 = vadd.f32 1.0, %v1378_v14 }
 0x31b   :  { %v1264_v17 = vadd.f32 %v1437_v47, %v1263_v51 }
 0x31c   :  { %v1283_v21 = vmul.f32 %v1279_v7, %v1111_v34 }
 0x31d   :  { %v1268_v5 = vsel %vm1267_vm8, %v1437_v47, %v1264_v17 }
 0x31e   :  { %v1287_v24 = vadd.f32 %v1283_v21, %v2008_v62  ;;  %v1273_v10 = vsel %vm1270_vm9, %v1272_v25, %v1268_v5 }
 0x31f   :  { %v1274_v53 = vmul.f32 %v1273_v10, %v1249_v8 }
 0x320   :  { %1331 = vmatmul.f32.gmra.mxu2 %v1287_v24 }
 0x321   :  { %v1379_v27 = vclamps-f32 %v1274_v53, 1.0 }
 0x323   :  { %v1280_v22 = vadd.f32 1.0, %v1379_v27 }
 0x325   :  { %v1284_v46 = vmul.f32 %v1280_v22, %v1112_v59 }
 0x327   :  { %v1288_v49 = vadd.f32 %v1284_v46, %v2011_v2 }
 0x329   :  { %1334 = vmatmul.f32.gmra.mxu2 %v1288_v49 }
 0x392   :  { %v1326_v62 = vpop.f32.mrf.mxu2 }
 0x393   :  { %v1327_v16 = vadd.f32 %v1405_v29, %v1326_v62 }
 0x395   :  { %1339 = vst.msk [vmem:[#allocation10] sm:$0xff] %vm1338_vm10, %v1327_v16 }
 0x39b   :  { %v1329_v19 = vpop.f32.mrf.mxu2 }
 0x39c   :  { %v1330_v55 = vadd.f32 %v1405_v29, %v1329_v19 }
 0x39e   :  { %1340 = vst.msk [vmem:[#allocation10 + $0x8] sm:$0xff] %vm1338_vm10, %v1330_v55 }
 0x3a3   :  { %v1332_v31 = vpop.f32.mrf.mxu2 }
 0x3a4   :  { %v1333_v63 = vadd.f32 %v1405_v29, %v1332_v31 }
 0x3a6   :  { %1341 = vst.msk [vmem:[#allocation10 + $0x10] sm:$0xff] %vm1338_vm10, %v1333_v63 }
 0x3ac   :  { %v1335_v2 = vpop.f32.mrf.mxu2 }
 0x3ad   :  { %v1336_v33 = vadd.f32 %v1405_v29, %v1335_v2 }
 0x3af   :  { %1342 = vst.msk [vmem:[#allocation10 + $0x18] sm:$0xff] %vm1338_vm10, %v1336_v33 }
 0x3b0   :  { %1355 = dma.vmem_to_hbm [thread:$0]  %s1348_s24, 512, %s1350_s27, [#allocation4], %s1567_s9, %s1567_s9, %s1568_s10  }
 0x3b1   :  { %1564 = dma.done.wait [#allocation4], 512  }
 0x3b2   :  { %1565 = vsyncadd [#allocation4], 4294966784 }
 0x3b3   :  { %1360 = vsyncpa [#allocation3], 1 }
 0x3b4   :  { %1361 = vsyncpa [#allocation6], 1 }
 0x3b5   :  { %1362 = vsyncpa [#allocation9], 1 }
 0x3b6   :  { %1363 = vsyncpa [#allocation4], 1 }

</bundles_post_ra>
